<compile_context>
chip_gen: v7x
topology: tpu7x:2x2x1
jax: 0.10.0
libtpu: 0.0.40
codegen_flags: <defaults>
</compile_context>

<pallas_src>
import functools
import math

import jax
import jax.numpy as jnp
import numpy as np
from jax.experimental import pallas as pl
from jax.experimental.pallas import tpu as pltpu


def _round_up(x, m):
    return (x + m - 1) // m * m


# ---------------------------------------------------------------------------
# Fused kernel: one grid step = BB batch elements.
# Layout: channels on sublanes, (batch-block x flattened-spatial) on lanes.
# ---------------------------------------------------------------------------

def _fused_forward_kernel(xcol_ref, w1_ref, b1_ref, w2_ref, b2_ref, pool_ref,
                          fc1w_ref, fc1b_ref, fc2w_ref, fc2b_ref,
                          out_ref, h1_ref, *, grid1, k, c1, c2, n_blk, pad_end):
    """xcol_ref : (K1p, n_blk)    bf16 conv1 im2col (K on sublanes, cols on lanes)
       w1_ref   : (c1, K1p)       bf16 conv1 weight
       w2_ref   : (k^3, c2, c1)   f32 conv2 weight, tap-major (kd, kh, kw)
       pool_ref : (n_blk, BB)     f32 masked-mean weights (1/Nvalid at valid cols)
       h1_ref   : (c1, n_blk+pad) f32 VMEM scratch: relu(conv1), per-element
                                  columns [bb*S1_pad, bb*S1_pad+S1).
       out_ref  : (n_cls, BB)     logits for this batch block.
    """
    _, H1, W1 = grid1   # conv1 output grid per element (flat col = d*H1*W1+h*W1+w)

    # Overhang columns are only read (lane-shifted) for *masked* conv2 columns;
    # they just need to be finite.  Single (c1, 128) store -> do it every step
    # (a program_id==0 guard would be unsafe when the parallel grid axis is
    # split across TensorCores, each with its own scratch).
    h1_ref[:, pl.ds(n_blk, pad_end)] = jnp.zeros((c1, pad_end), jnp.float32)

    # ---- encoder conv1 + ReLU: ONE MXU dot, bf16 operands, f32 accumulate ----
    h1 = jnp.dot(w1_ref[...], xcol_ref[...], preferred_element_type=jnp.float32)
    h1 = jnp.maximum(h1 + b1_ref[...], 0.0)                  # (c1, n_blk) f32
    h1_ref[:, pl.ds(0, n_blk)] = h1

    # ---- encoder conv2 + ReLU: 27 shifted-tap dots, vreg-resident accumulator
    # Output column p of the flattened conv1 grid reads columns p + shift;
    # columns whose window wraps / crosses an element boundary are garbage but
    # finite and carry zero weight in the pooling mask.
    acc = jnp.zeros((c2, n_blk), jnp.float32)
    for kd in range(k):
        for kh in range(k):
            for kw in range(k):
                tap = (kd * k + kh) * k + kw
                shift = (kd * H1 + kh) * W1 + kw
                lhs = h1_ref[:, pl.ds(shift, n_blk)]          # (c1, n_blk)
                acc = acc + jnp.dot(w2_ref[tap], lhs,
                                    preferred_element_type=jnp.float32)
    z = jnp.maximum(acc + b2_ref[...], 0.0)                   # (c2, n_blk)

    # ---- invariant: masked global mean-pool as one MXU dot ----
    pooled = jnp.dot(z, pool_ref[...],
                     preferred_element_type=jnp.float32)      # (c2, BB)

    # ---- mlp: Linear -> ReLU -> Linear (batch on lanes, all on-chip) ----
    hid = jnp.maximum(
        jnp.dot(fc1w_ref[...], pooled, preferred_element_type=jnp.float32)
        + fc1b_ref[...], 0.0)                                 # (hidden, BB)
    logits = (jnp.dot(fc2w_ref[...], hid, preferred_element_type=jnp.float32)
              + fc2b_ref[...])                                # (n_cls, BB)
    out_ref[...] = logits.astype(out_ref.dtype)


# ---------------------------------------------------------------------------
# Wrapper: layout plumbing (XLA-side im2col / transposes) + single pallas_call.
# ---------------------------------------------------------------------------

def invariant_classifier_forward(x_ncdhw, params, *, k=3, batch_block=4):
    B, c_in, D, H, W = x_ncdhw.shape
    c1 = params["conv1_b"].shape[0]
    c2 = params["conv2_b"].shape[0]
    hidden = params["fc1_b"].shape[0]
    n_cls = params["fc2_b"].shape[0]

    D1, H1, W1 = D - (k - 1), H - (k - 1), W - (k - 1)      # conv1 output grid
    D2, H2, W2 = D1 - (k - 1), H1 - (k - 1), W1 - (k - 1)   # conv2 output grid
    S1 = D1 * H1 * W1
    K1 = k ** 3 * c_in
    K1p = _round_up(K1, 16)                                 # bf16 sublane tile

    BB = max(1, min(batch_block, B))
    B_pad = _round_up(B, BB)
    G = B_pad // BB                                         # grid length

    # Per-element lane pitch: >= S1, and BB*S1_pad a multiple of 128 lanes so
    # the x-im2col block shape satisfies the (8, 128) BlockSpec constraint.
    S1_pad = _round_up(S1, 128 // math.gcd(BB, 128))
    n_blk = BB * S1_pad
    max_shift = (k - 1) * (H1 * W1 + W1 + 1)
    pad_end = _round_up(max_shift, 128)
    # Static guards for the "garbage-but-finite" shifted-read trick.
    assert S1_pad >= S1 and pad_end >= max_shift

    xf = x_ncdhw.astype(jnp.float32)
    if B_pad != B:
        xf = jnp.pad(xf, ((0, B_pad - B),) + ((0, 0),) * 4)

    # conv1 im2col on the wrapper: rows = tap-major (kd,kh,kw,c_in), cols =
    # flattened conv1-output grid, per-element column pitch S1_pad (zero pad).
    patches = []
    for kd in range(k):
        for kh in range(k):
            for kw in range(k):
                patches.append(xf[:, :, kd:kd + D1, kh:kh + H1, kw:kw + W1])
    xc = jnp.stack(patches, axis=1).reshape(B_pad, K1, S1)
    xc = jnp.pad(xc, ((0, 0), (0, K1p - K1), (0, S1_pad - S1)))
    xc = jnp.transpose(xc, (1, 0, 2)).reshape(K1p, B_pad * S1_pad)
    xc = xc.astype(jnp.bfloat16)

    # conv weights, tap-major to match the kernel's tap loop.
    w1m = jnp.transpose(params["conv1_w"], (0, 2, 3, 4, 1)).reshape(c1, K1)
    w1m = jnp.pad(w1m, ((0, 0), (0, K1p - K1))).astype(jnp.bfloat16)
    b1 = params["conv1_b"].reshape(c1, 1).astype(jnp.float32)
    w2m = jnp.transpose(params["conv2_w"], (2, 3, 4, 0, 1)).reshape(k ** 3, c2, c1)
    w2m = w2m.astype(jnp.float32)
    b2 = params["conv2_b"].reshape(c2, 1).astype(jnp.float32)

    # Pooling mask precomputed host-side: column bb*S1_pad + flat(d,h,w) of a
    # valid conv2 output voxel gets weight 1/(D2*H2*W2) for batch lane bb.
    m = np.zeros((n_blk, BB), np.float32)
    inv = 1.0 / (D2 * H2 * W2)
    for bb in range(BB):
        for d in range(D2):
            for h in range(H2):
                for w in range(W2):
                    m[bb * S1_pad + (d * H1 + h) * W1 + w, bb] = inv
    pool_mask = jnp.asarray(m)

    fc1w = params["fc1_w"].T.astype(jnp.float32)            # (hidden, c2)
    fc1b = params["fc1_b"].reshape(hidden, 1).astype(jnp.float32)
    fc2w = params["fc2_w"].T.astype(jnp.float32)            # (n_cls, hidden)
    fc2b = params["fc2_b"].reshape(n_cls, 1).astype(jnp.float32)

    args = (xc, w1m, b1, w2m, b2, pool_mask, fc1w, fc1b, fc2w, fc2b)

    flops = int(B_pad * 2 * S1 * K1 * c1                     # conv1
                + G * 2 * n_blk * (k ** 3) * c1 * c2         # conv2 (incl. pad cols)
                + G * 2 * n_blk * c2 * BB                    # masked pool
                + B_pad * 2 * (c2 * hidden + hidden * n_cls))
    bytes_accessed = int(sum(a.size * a.dtype.itemsize for a in args)
                         + G * n_cls * BB * 4)

    kernel = functools.partial(
        _fused_forward_kernel, grid1=(D1, H1, W1), k=k, c1=c1, c2=c2,
        n_blk=n_blk, pad_end=pad_end)

    out = pl.pallas_call(
        kernel,
        out_shape=jax.ShapeDtypeStruct((G, n_cls, BB), jnp.float32),
        grid=(G,),
        in_specs=[
            pl.BlockSpec((K1p, n_blk), lambda i: (0, i)),          # x im2col
            pl.BlockSpec((c1, K1p), lambda i: (0, 0)),             # conv1 w
            pl.BlockSpec((c1, 1), lambda i: (0, 0)),               # conv1 b
            pl.BlockSpec((k ** 3, c2, c1), lambda i: (0, 0, 0)),   # conv2 taps
            pl.BlockSpec((c2, 1), lambda i: (0, 0)),               # conv2 b
            pl.BlockSpec((n_blk, BB), lambda i: (0, 0)),           # pool mask
            pl.BlockSpec((hidden, c2), lambda i: (0, 0)),          # fc1 w
            pl.BlockSpec((hidden, 1), lambda i: (0, 0)),           # fc1 b
            pl.BlockSpec((n_cls, hidden), lambda i: (0, 0)),       # fc2 w
            pl.BlockSpec((n_cls, 1), lambda i: (0, 0)),            # fc2 b
        ],
        out_specs=pl.BlockSpec((None, n_cls, BB), lambda i: (i, 0, 0)),
        scratch_shapes=[pltpu.VMEM((c1, n_blk + pad_end), jnp.float32)],
        compiler_params=pltpu.CompilerParams(
            dimension_semantics=("parallel",)),    # v7x: 2 TCs split the G steps
        cost_estimate=pl.CostEstimate(flops=flops, transcendentals=0,
                                      bytes_accessed=bytes_accessed),
    )(*args)

    out = jnp.transpose(out, (0, 2, 1)).reshape(B_pad, n_cls)
    return out[:B]


# ---------------------------------------------------------------------------
# Pure-JAX (XLA) reference, used only to validate the fused kernel.
# ---------------------------------------------------------------------------

def reference_forward(x_ncdhw, params, *, k=3):
    x = jnp.transpose(x_ncdhw, (0, 2, 3, 4, 1)).astype(jnp.float32)

    def conv_relu(x, w_t, b):
        Bb, D, H, W, C = x.shape
        Do, Ho, Wo = D - k + 1, H - k + 1, W - k + 1
        cols = []
        for dz in range(k):
            for dy in range(k):
                for dx in range(k):
                    cols.append(x[:, dz:dz + Do, dy:dy + Ho, dx:dx + Wo, :])
        p = jnp.stack(cols, axis=-2).reshape(Bb, Do, Ho, Wo, k ** 3 * C)
        w = jnp.transpose(w_t, (2, 3, 4, 1, 0)).reshape(k ** 3 * C, w_t.shape[0])
        return jnp.maximum(jnp.einsum("bdhwk,kc->bdhwc", p, w) + b, 0.0)

    z = conv_relu(x, params["conv1_w"], params["conv1_b"])
    z = conv_relu(z, params["conv2_w"], params["conv2_b"])
    z = jnp.mean(z, axis=(1, 2, 3))
    h = jnp.maximum(z @ params["fc1_w"] + params["fc1_b"], 0.0)
    return h @ params["fc2_w"] + params["fc2_b"]


# ---------------------------------------------------------------------------
# Deterministic synthetic parameters (same instantiation as previous version).
# ---------------------------------------------------------------------------

def make_params():
    key = jax.random.PRNGKey(0)
    ks = jax.random.split(key, 8)
    c_in, c1, c2, hidden, n_cls, k = 4, 8, 16, 32, 20, 3
    scale = 0.05
    return {
        # PyTorch Conv3d weight layout: (C_out, C_in, k, k, k)
        "conv1_w": scale * jax.random.normal(ks[0], (c1, c_in, k, k, k), jnp.float32),
        "conv1_b": scale * jax.random.normal(ks[1], (c1,), jnp.float32),
        "conv2_w": scale * jax.random.normal(ks[2], (c2, c1, k, k, k), jnp.float32),
        "conv2_b": scale * jax.random.normal(ks[3], (c2,), jnp.float32),
        # Linear weights stored as (in, out)
        "fc1_w": scale * jax.random.normal(ks[4], (c2, hidden), jnp.float32),
        "fc1_b": scale * jax.random.normal(ks[5], (hidden,), jnp.float32),
        "fc2_w": scale * jax.random.normal(ks[6], (hidden, n_cls), jnp.float32),
        "fc2_b": scale * jax.random.normal(ks[7], (n_cls,), jnp.float32),
    }


if __name__ == "__main__":
    params = make_params()
    # Input: voxelized atoms, NCDHW = (batch=8, channels=4, 8x8x8 grid).
    # batch=8 with batch_block=4 -> grid of 2 "parallel" steps (both v7x TCs fed).
    x = jax.random.normal(jax.random.PRNGKey(0), (8, 4, 8, 8, 8), jnp.float32)

    fwd = jax.jit(functools.partial(invariant_classifier_forward, params=params))
    logits = jax.block_until_ready(fwd(x))

    assert logits.shape == (8, 20), logits.shape
    assert bool(jnp.all(jnp.isfinite(logits)))

    # Validate against the pure-XLA reference (tolerance covers the bf16
    # operand cast of conv1 and default TPU matmul precision; any logic error
    # would be O(0.1)).
    ref = reference_forward(x, params)
    assert jnp.allclose(logits, ref, atol=2e-2, rtol=1e-1), float(
        jnp.max(jnp.abs(logits - ref)))

    print("KERNEL_OK")
</pallas_src>

<mosaic_0001>
module attributes {stable_mosaic.version = 11 : i64} {
  func.func @_fused_forward_kernel(%arg0: i32, %arg1: memref<112x896xbf16, #tpu.memory_space<vmem>>, %arg2: memref<8x112xbf16, #tpu.memory_space<vmem>>, %arg3: memref<8x1xf32, #tpu.memory_space<vmem>>, %arg4: memref<27x16x8xf32, #tpu.memory_space<vmem>>, %arg5: memref<16x1xf32, #tpu.memory_space<vmem>>, %arg6: memref<896x4xf32, #tpu.memory_space<vmem>>, %arg7: memref<32x16xf32, #tpu.memory_space<vmem>>, %arg8: memref<32x1xf32, #tpu.memory_space<vmem>>, %arg9: memref<20x32xf32, #tpu.memory_space<vmem>>, %arg10: memref<20x1xf32, #tpu.memory_space<vmem>>, %arg11: memref<1x20x4xf32, #tpu.memory_space<vmem>>, %arg12: memref<8x1024xf32, #tpu.memory_space<vmem>>) attributes {dimension_semantics = [#tpu.dimension_semantics<parallel>], iteration_bounds = array<i64: 2>, scalar_prefetch = 0 : i64, scratch_operands = 1 : i64, tpu.core_type = #tpu.core_type<tc>, window_params = [{transform_indices = @transform_0, window_bounds = array<i64: 112, 896>}, {pipeline_mode = #tpu.pipeline_mode<synchronous>, transform_indices = @transform_1, window_bounds = array<i64: 8, 112>}, {pipeline_mode = #tpu.pipeline_mode<synchronous>, transform_indices = @transform_2, window_bounds = array<i64: 8, 1>}, {pipeline_mode = #tpu.pipeline_mode<synchronous>, transform_indices = @transform_3, window_bounds = array<i64: 27, 16, 8>}, {pipeline_mode = #tpu.pipeline_mode<synchronous>, transform_indices = @transform_4, window_bounds = array<i64: 16, 1>}, {pipeline_mode = #tpu.pipeline_mode<synchronous>, transform_indices = @transform_5, window_bounds = array<i64: 896, 4>}, {pipeline_mode = #tpu.pipeline_mode<synchronous>, transform_indices = @transform_6, window_bounds = array<i64: 32, 16>}, {pipeline_mode = #tpu.pipeline_mode<synchronous>, transform_indices = @transform_7, window_bounds = array<i64: 32, 1>}, {pipeline_mode = #tpu.pipeline_mode<synchronous>, transform_indices = @transform_8, window_bounds = array<i64: 20, 32>}, {pipeline_mode = #tpu.pipeline_mode<synchronous>, transform_indices = @transform_9, window_bounds = array<i64: 20, 1>}, {transform_indices = @transform_10, window_bounds = array<i64: 1, 20, 4>}]} {
    %cst = arith.constant 0.000000e+00 : f32
    %0 = vector.broadcast %cst : f32 to vector<8x128xf32>
    %c0 = arith.constant 0 : index
    %c896 = arith.constant 896 : index
    %1 = vector.load %arg12[%c0, %c896] : memref<8x1024xf32, #tpu.memory_space<vmem>>, vector<8x128xf32>
    tpu.vector_store %arg12[%c0, %c896], %0 {strides = array<i32>} : memref<8x1024xf32, #tpu.memory_space<vmem>>, vector<8x128xf32>,
    %c0_0 = arith.constant 0 : index
    %c0_1 = arith.constant 0 : index
    %2 = vector.load %arg2[%c0_0, %c0_1] : memref<8x112xbf16, #tpu.memory_space<vmem>>, vector<8x112xbf16>
    %c0_2 = arith.constant 0 : index
    %c0_3 = arith.constant 0 : index
    %3 = vector.load %arg1[%c0_2, %c0_3] : memref<112x896xbf16, #tpu.memory_space<vmem>>, vector<112x896xbf16>
    %cst_4 = arith.constant dense<0.000000e+00> : vector<8x896xf32>
    %4 = tpu.matmul %2, %3, %cst_4 {dimension_numbers = #tpu.dot_dimension_numbers<[1], [0], [0], [1], [0, 0, 1, 1], [], []>} : vector<8x112xbf16>, vector<112x896xbf16>, vector<8x896xf32> -> vector<8x896xf32>
    %c0_5 = arith.constant 0 : index
    %c0_6 = arith.constant 0 : index
    %5 = vector.load %arg3[%c0_5, %c0_6] : memref<8x1xf32, #tpu.memory_space<vmem>>, vector<8x1xf32>
    %6 = vector.broadcast %5 : vector<8x1xf32> to vector<8x896xf32>
    %7 = arith.addf %4, %6 : vector<8x896xf32>
    %cst_7 = arith.constant 0.000000e+00 : f32
    %8 = vector.broadcast %cst_7 : f32 to vector<8x896xf32>
    %9 = arith.maximumf %7, %8 : vector<8x896xf32>
    %c0_8 = arith.constant 0 : index
    %c0_9 = arith.constant 0 : index
    %10 = vector.load %arg12[%c0_8, %c0_9] : memref<8x1024xf32, #tpu.memory_space<vmem>>, vector<8x896xf32>
    tpu.vector_store %arg12[%c0_8, %c0_9], %9 {strides = array<i32>} : memref<8x1024xf32, #tpu.memory_space<vmem>>, vector<8x896xf32>,
    %cst_10 = arith.constant 0.000000e+00 : f32
    %11 = vector.broadcast %cst_10 : f32 to vector<16x896xf32>
    %c0_11 = arith.constant 0 : index
    %c0_12 = arith.constant 0 : index
    %12 = vector.load %arg12[%c0_11, %c0_12] : memref<8x1024xf32, #tpu.memory_space<vmem>>, vector<8x896xf32>
    %c0_13 = arith.constant 0 : index
    %c0_14 = arith.constant 0 : index
    %c0_15 = arith.constant 0 : index
    %13 = vector.load %arg4[%c0_13, %c0_14, %c0_15] : memref<27x16x8xf32, #tpu.memory_space<vmem>>, vector<1x16x8xf32>
    %14 = vector.shape_cast %13 : vector<1x16x8xf32> to vector<16x8xf32>
    %cst_16 = arith.constant dense<0.000000e+00> : vector<16x896xf32>
    %15 = tpu.matmul %14, %12, %cst_16 {dimension_numbers = #tpu.dot_dimension_numbers<[1], [0], [0], [1], [0, 0, 1, 1], [], []>} : vector<16x8xf32>, vector<8x896xf32>, vector<16x896xf32> -> vector<16x896xf32>
    %16 = arith.addf %11, %15 : vector<16x896xf32>
    %c0_17 = arith.constant 0 : index
    %c1 = arith.constant 1 : index
    %17 = vector.load %arg12[%c0_17, %c1] : memref<8x1024xf32, #tpu.memory_space<vmem>>, vector<8x896xf32>
    %c1_18 = arith.constant 1 : index
    %c0_19 = arith.constant 0 : index
    %c0_20 = arith.constant 0 : index
    %18 = vector.load %arg4[%c1_18, %c0_19, %c0_20] : memref<27x16x8xf32, #tpu.memory_space<vmem>>, vector<1x16x8xf32>
    %19 = vector.shape_cast %18 : vector<1x16x8xf32> to vector<16x8xf32>
    %cst_21 = arith.constant dense<0.000000e+00> : vector<16x896xf32>
    %20 = tpu.matmul %19, %17, %cst_21 {dimension_numbers = #tpu.dot_dimension_numbers<[1], [0], [0], [1], [0, 0, 1, 1], [], []>} : vector<16x8xf32>, vector<8x896xf32>, vector<16x896xf32> -> vector<16x896xf32>
    %21 = arith.addf %16, %20 : vector<16x896xf32>
    %c0_22 = arith.constant 0 : index
    %c2 = arith.constant 2 : index
    %22 = vector.load %arg12[%c0_22, %c2] : memref<8x1024xf32, #tpu.memory_space<vmem>>, vector<8x896xf32>
    %c2_23 = arith.constant 2 : index
    %c0_24 = arith.constant 0 : index
    %c0_25 = arith.constant 0 : index
    %23 = vector.load %arg4[%c2_23, %c0_24, %c0_25] : memref<27x16x8xf32, #tpu.memory_space<vmem>>, vector<1x16x8xf32>
    %24 = vector.shape_cast %23 : vector<1x16x8xf32> to vector<16x8xf32>
    %cst_26 = arith.constant dense<0.000000e+00> : vector<16x896xf32>
    %25 = tpu.matmul %24, %22, %cst_26 {dimension_numbers = #tpu.dot_dimension_numbers<[1], [0], [0], [1], [0, 0, 1, 1], [], []>} : vector<16x8xf32>, vector<8x896xf32>, vector<16x896xf32> -> vector<16x896xf32>
    %26 = arith.addf %21, %25 : vector<16x896xf32>
    %c0_27 = arith.constant 0 : index
    %c6 = arith.constant 6 : index
    %27 = vector.load %arg12[%c0_27, %c6] : memref<8x1024xf32, #tpu.memory_space<vmem>>, vector<8x896xf32>
    %c3 = arith.constant 3 : index
    %c0_28 = arith.constant 0 : index
    %c0_29 = arith.constant 0 : index
    %28 = vector.load %arg4[%c3, %c0_28, %c0_29] : memref<27x16x8xf32, #tpu.memory_space<vmem>>, vector<1x16x8xf32>
    %29 = vector.shape_cast %28 : vector<1x16x8xf32> to vector<16x8xf32>
    %cst_30 = arith.constant dense<0.000000e+00> : vector<16x896xf32>
    %30 = tpu.matmul %29, %27, %cst_30 {dimension_numbers = #tpu.dot_dimension_numbers<[1], [0], [0], [1], [0, 0, 1, 1], [], []>} : vector<16x8xf32>, vector<8x896xf32>, vector<16x896xf32> -> vector<16x896xf32>
    %31 = arith.addf %26, %30 : vector<16x896xf32>
    %c0_31 = arith.constant 0 : index
    %c7 = arith.constant 7 : index
    %32 = vector.load %arg12[%c0_31, %c7] : memref<8x1024xf32, #tpu.memory_space<vmem>>, vector<8x896xf32>
    %c4 = arith.constant 4 : index
    %c0_32 = arith.constant 0 : index
    %c0_33 = arith.constant 0 : index
    %33 = vector.load %arg4[%c4, %c0_32, %c0_33] : memref<27x16x8xf32, #tpu.memory_space<vmem>>, vector<1x16x8xf32>
    %34 = vector.shape_cast %33 : vector<1x16x8xf32> to vector<16x8xf32>
    %cst_34 = arith.constant dense<0.000000e+00> : vector<16x896xf32>
    %35 = tpu.matmul %34, %32, %cst_34 {dimension_numbers = #tpu.dot_dimension_numbers<[1], [0], [0], [1], [0, 0, 1, 1], [], []>} : vector<16x8xf32>, vector<8x896xf32>, vector<16x896xf32> -> vector<16x896xf32>
    %36 = arith.addf %31, %35 : vector<16x896xf32>
    %c0_35 = arith.constant 0 : index
    %c8 = arith.constant 8 : index
    %37 = vector.load %arg12[%c0_35, %c8] : memref<8x1024xf32, #tpu.memory_space<vmem>>, vector<8x896xf32>
    %c5 = arith.constant 5 : index
    %c0_36 = arith.constant 0 : index
    %c0_37 = arith.constant 0 : index
    %38 = vector.load %arg4[%c5, %c0_36, %c0_37] : memref<27x16x8xf32, #tpu.memory_space<vmem>>, vector<1x16x8xf32>
    %39 = vector.shape_cast %38 : vector<1x16x8xf32> to vector<16x8xf32>
    %cst_38 = arith.constant dense<0.000000e+00> : vector<16x896xf32>
    %40 = tpu.matmul %39, %37, %cst_38 {dimension_numbers = #tpu.dot_dimension_numbers<[1], [0], [0], [1], [0, 0, 1, 1], [], []>} : vector<16x8xf32>, vector<8x896xf32>, vector<16x896xf32> -> vector<16x896xf32>
    %41 = arith.addf %36, %40 : vector<16x896xf32>
    %c0_39 = arith.constant 0 : index
    %c12 = arith.constant 12 : index
    %42 = vector.load %arg12[%c0_39, %c12] : memref<8x1024xf32, #tpu.memory_space<vmem>>, vector<8x896xf32>
    %c6_40 = arith.constant 6 : index
    %c0_41 = arith.constant 0 : index
    %c0_42 = arith.constant 0 : index
    %43 = vector.load %arg4[%c6_40, %c0_41, %c0_42] : memref<27x16x8xf32, #tpu.memory_space<vmem>>, vector<1x16x8xf32>
    %44 = vector.shape_cast %43 : vector<1x16x8xf32> to vector<16x8xf32>
    %cst_43 = arith.constant dense<0.000000e+00> : vector<16x896xf32>
    %45 = tpu.matmul %44, %42, %cst_43 {dimension_numbers = #tpu.dot_dimension_numbers<[1], [0], [0], [1], [0, 0, 1, 1], [], []>} : vector<16x8xf32>, vector<8x896xf32>, vector<16x896xf32> -> vector<16x896xf32>
    %46 = arith.addf %41, %45 : vector<16x896xf32>
    %c0_44 = arith.constant 0 : index
    %c13 = arith.constant 13 : index
    %47 = vector.load %arg12[%c0_44, %c13] : memref<8x1024xf32, #tpu.memory_space<vmem>>, vector<8x896xf32>
    %c7_45 = arith.constant 7 : index
    %c0_46 = arith.constant 0 : index
    %c0_47 = arith.constant 0 : index
    %48 = vector.load %arg4[%c7_45, %c0_46, %c0_47] : memref<27x16x8xf32, #tpu.memory_space<vmem>>, vector<1x16x8xf32>
    %49 = vector.shape_cast %48 : vector<1x16x8xf32> to vector<16x8xf32>
    %cst_48 = arith.constant dense<0.000000e+00> : vector<16x896xf32>
    %50 = tpu.matmul %49, %47, %cst_48 {dimension_numbers = #tpu.dot_dimension_numbers<[1], [0], [0], [1], [0, 0, 1, 1], [], []>} : vector<16x8xf32>, vector<8x896xf32>, vector<16x896xf32> -> vector<16x896xf32>
    %51 = arith.addf %46, %50 : vector<16x896xf32>
    %c0_49 = arith.constant 0 : index
    %c14 = arith.constant 14 : index
    %52 = vector.load %arg12[%c0_49, %c14] : memref<8x1024xf32, #tpu.memory_space<vmem>>, vector<8x896xf32>
    %c8_50 = arith.constant 8 : index
    %c0_51 = arith.constant 0 : index
    %c0_52 = arith.constant 0 : index
    %53 = vector.load %arg4[%c8_50, %c0_51, %c0_52] : memref<27x16x8xf32, #tpu.memory_space<vmem>>, vector<1x16x8xf32>
    %54 = vector.shape_cast %53 : vector<1x16x8xf32> to vector<16x8xf32>
    %cst_53 = arith.constant dense<0.000000e+00> : vector<16x896xf32>
    %55 = tpu.matmul %54, %52, %cst_53 {dimension_numbers = #tpu.dot_dimension_numbers<[1], [0], [0], [1], [0, 0, 1, 1], [], []>} : vector<16x8xf32>, vector<8x896xf32>, vector<16x896xf32> -> vector<16x896xf32>
    %56 = arith.addf %51, %55 : vector<16x896xf32>
    %c0_54 = arith.constant 0 : index
    %c36 = arith.constant 36 : index
    %57 = vector.load %arg12[%c0_54, %c36] : memref<8x1024xf32, #tpu.memory_space<vmem>>, vector<8x896xf32>
    %c9 = arith.constant 9 : index
    %c0_55 = arith.constant 0 : index
    %c0_56 = arith.constant 0 : index
    %58 = vector.load %arg4[%c9, %c0_55, %c0_56] : memref<27x16x8xf32, #tpu.memory_space<vmem>>, vector<1x16x8xf32>
    %59 = vector.shape_cast %58 : vector<1x16x8xf32> to vector<16x8xf32>
    %cst_57 = arith.constant dense<0.000000e+00> : vector<16x896xf32>
    %60 = tpu.matmul %59, %57, %cst_57 {dimension_numbers = #tpu.dot_dimension_numbers<[1], [0], [0], [1], [0, 0, 1, 1], [], []>} : vector<16x8xf32>, vector<8x896xf32>, vector<16x896xf32> -> vector<16x896xf32>
    %61 = arith.addf %56, %60 : vector<16x896xf32>
    %c0_58 = arith.constant 0 : index
    %c37 = arith.constant 37 : index
    %62 = vector.load %arg12[%c0_58, %c37] : memref<8x1024xf32, #tpu.memory_space<vmem>>, vector<8x896xf32>
    %c10 = arith.constant 10 : index
    %c0_59 = arith.constant 0 : index
    %c0_60 = arith.constant 0 : index
    %63 = vector.load %arg4[%c10, %c0_59, %c0_60] : memref<27x16x8xf32, #tpu.memory_space<vmem>>, vector<1x16x8xf32>
    %64 = vector.shape_cast %63 : vector<1x16x8xf32> to vector<16x8xf32>
    %cst_61 = arith.constant dense<0.000000e+00> : vector<16x896xf32>
    %65 = tpu.matmul %64, %62, %cst_61 {dimension_numbers = #tpu.dot_dimension_numbers<[1], [0], [0], [1], [0, 0, 1, 1], [], []>} : vector<16x8xf32>, vector<8x896xf32>, vector<16x896xf32> -> vector<16x896xf32>
    %66 = arith.addf %61, %65 : vector<16x896xf32>
    %c0_62 = arith.constant 0 : index
    %c38 = arith.constant 38 : index
    %67 = vector.load %arg12[%c0_62, %c38] : memref<8x1024xf32, #tpu.memory_space<vmem>>, vector<8x896xf32>
    %c11 = arith.constant 11 : index
    %c0_63 = arith.constant 0 : index
    %c0_64 = arith.constant 0 : index
    %68 = vector.load %arg4[%c11, %c0_63, %c0_64] : memref<27x16x8xf32, #tpu.memory_space<vmem>>, vector<1x16x8xf32>
    %69 = vector.shape_cast %68 : vector<1x16x8xf32> to vector<16x8xf32>
    %cst_65 = arith.constant dense<0.000000e+00> : vector<16x896xf32>
    %70 = tpu.matmul %69, %67, %cst_65 {dimension_numbers = #tpu.dot_dimension_numbers<[1], [0], [0], [1], [0, 0, 1, 1], [], []>} : vector<16x8xf32>, vector<8x896xf32>, vector<16x896xf32> -> vector<16x896xf32>
    %71 = arith.addf %66, %70 : vector<16x896xf32>
    %c0_66 = arith.constant 0 : index
    %c42 = arith.constant 42 : index
    %72 = vector.load %arg12[%c0_66, %c42] : memref<8x1024xf32, #tpu.memory_space<vmem>>, vector<8x896xf32>
    %c12_67 = arith.constant 12 : index
    %c0_68 = arith.constant 0 : index
    %c0_69 = arith.constant 0 : index
    %73 = vector.load %arg4[%c12_67, %c0_68, %c0_69] : memref<27x16x8xf32, #tpu.memory_space<vmem>>, vector<1x16x8xf32>
    %74 = vector.shape_cast %73 : vector<1x16x8xf32> to vector<16x8xf32>
    %cst_70 = arith.constant dense<0.000000e+00> : vector<16x896xf32>
    %75 = tpu.matmul %74, %72, %cst_70 {dimension_numbers = #tpu.dot_dimension_numbers<[1], [0], [0], [1], [0, 0, 1, 1], [], []>} : vector<16x8xf32>, vector<8x896xf32>, vector<16x896xf32> -> vector<16x896xf32>
    %76 = arith.addf %71, %75 : vector<16x896xf32>
    %c0_71 = arith.constant 0 : index
    %c43 = arith.constant 43 : index
    %77 = vector.load %arg12[%c0_71, %c43] : memref<8x1024xf32, #tpu.memory_space<vmem>>, vector<8x896xf32>
    %c13_72 = arith.constant 13 : index
    %c0_73 = arith.constant 0 : index
    %c0_74 = arith.constant 0 : index
    %78 = vector.load %arg4[%c13_72, %c0_73, %c0_74] : memref<27x16x8xf32, #tpu.memory_space<vmem>>, vector<1x16x8xf32>
    %79 = vector.shape_cast %78 : vector<1x16x8xf32> to vector<16x8xf32>
    %cst_75 = arith.constant dense<0.000000e+00> : vector<16x896xf32>
    %80 = tpu.matmul %79, %77, %cst_75 {dimension_numbers = #tpu.dot_dimension_numbers<[1], [0], [0], [1], [0, 0, 1, 1], [], []>} : vector<16x8xf32>, vector<8x896xf32>, vector<16x896xf32> -> vector<16x896xf32>
    %81 = arith.addf %76, %80 : vector<16x896xf32>
    %c0_76 = arith.constant 0 : index
    %c44 = arith.constant 44 : index
    %82 = vector.load %arg12[%c0_76, %c44] : memref<8x1024xf32, #tpu.memory_space<vmem>>, vector<8x896xf32>
    %c14_77 = arith.constant 14 : index
    %c0_78 = arith.constant 0 : index
    %c0_79 = arith.constant 0 : index
    %83 = vector.load %arg4[%c14_77, %c0_78, %c0_79] : memref<27x16x8xf32, #tpu.memory_space<vmem>>, vector<1x16x8xf32>
    %84 = vector.shape_cast %83 : vector<1x16x8xf32> to vector<16x8xf32>
    %cst_80 = arith.constant dense<0.000000e+00> : vector<16x896xf32>
    %85 = tpu.matmul %84, %82, %cst_80 {dimension_numbers = #tpu.dot_dimension_numbers<[1], [0], [0], [1], [0, 0, 1, 1], [], []>} : vector<16x8xf32>, vector<8x896xf32>, vector<16x896xf32> -> vector<16x896xf32>
    %86 = arith.addf %81, %85 : vector<16x896xf32>
    %c0_81 = arith.constant 0 : index
    %c48 = arith.constant 48 : index
    %87 = vector.load %arg12[%c0_81, %c48] : memref<8x1024xf32, #tpu.memory_space<vmem>>, vector<8x896xf32>
    %c15 = arith.constant 15 : index
    %c0_82 = arith.constant 0 : index
    %c0_83 = arith.constant 0 : index
    %88 = vector.load %arg4[%c15, %c0_82, %c0_83] : memref<27x16x8xf32, #tpu.memory_space<vmem>>, vector<1x16x8xf32>
    %89 = vector.shape_cast %88 : vector<1x16x8xf32> to vector<16x8xf32>
    %cst_84 = arith.constant dense<0.000000e+00> : vector<16x896xf32>
    %90 = tpu.matmul %89, %87, %cst_84 {dimension_numbers = #tpu.dot_dimension_numbers<[1], [0], [0], [1], [0, 0, 1, 1], [], []>} : vector<16x8xf32>, vector<8x896xf32>, vector<16x896xf32> -> vector<16x896xf32>
    %91 = arith.addf %86, %90 : vector<16x896xf32>
    %c0_85 = arith.constant 0 : index
    %c49 = arith.constant 49 : index
    %92 = vector.load %arg12[%c0_85, %c49] : memref<8x1024xf32, #tpu.memory_space<vmem>>, vector<8x896xf32>
    %c16 = arith.constant 16 : index
    %c0_86 = arith.constant 0 : index
    %c0_87 = arith.constant 0 : index
    %93 = vector.load %arg4[%c16, %c0_86, %c0_87] : memref<27x16x8xf32, #tpu.memory_space<vmem>>, vector<1x16x8xf32>
    %94 = vector.shape_cast %93 : vector<1x16x8xf32> to vector<16x8xf32>
    %cst_88 = arith.constant dense<0.000000e+00> : vector<16x896xf32>
    %95 = tpu.matmul %94, %92, %cst_88 {dimension_numbers = #tpu.dot_dimension_numbers<[1], [0], [0], [1], [0, 0, 1, 1], [], []>} : vector<16x8xf32>, vector<8x896xf32>, vector<16x896xf32> -> vector<16x896xf32>
    %96 = arith.addf %91, %95 : vector<16x896xf32>
    %c0_89 = arith.constant 0 : index
    %c50 = arith.constant 50 : index
    %97 = vector.load %arg12[%c0_89, %c50] : memref<8x1024xf32, #tpu.memory_space<vmem>>, vector<8x896xf32>
    %c17 = arith.constant 17 : index
    %c0_90 = arith.constant 0 : index
    %c0_91 = arith.constant 0 : index
    %98 = vector.load %arg4[%c17, %c0_90, %c0_91] : memref<27x16x8xf32, #tpu.memory_space<vmem>>, vector<1x16x8xf32>
    %99 = vector.shape_cast %98 : vector<1x16x8xf32> to vector<16x8xf32>
    %cst_92 = arith.constant dense<0.000000e+00> : vector<16x896xf32>
    %100 = tpu.matmul %99, %97, %cst_92 {dimension_numbers = #tpu.dot_dimension_numbers<[1], [0], [0], [1], [0, 0, 1, 1], [], []>} : vector<16x8xf32>, vector<8x896xf32>, vector<16x896xf32> -> vector<16x896xf32>
    %101 = arith.addf %96, %100 : vector<16x896xf32>
    %c0_93 = arith.constant 0 : index
    %c72 = arith.constant 72 : index
    %102 = vector.load %arg12[%c0_93, %c72] : memref<8x1024xf32, #tpu.memory_space<vmem>>, vector<8x896xf32>
    %c18 = arith.constant 18 : index
    %c0_94 = arith.constant 0 : index
    %c0_95 = arith.constant 0 : index
    %103 = vector.load %arg4[%c18, %c0_94, %c0_95] : memref<27x16x8xf32, #tpu.memory_space<vmem>>, vector<1x16x8xf32>
    %104 = vector.shape_cast %103 : vector<1x16x8xf32> to vector<16x8xf32>
    %cst_96 = arith.constant dense<0.000000e+00> : vector<16x896xf32>
    %105 = tpu.matmul %104, %102, %cst_96 {dimension_numbers = #tpu.dot_dimension_numbers<[1], [0], [0], [1], [0, 0, 1, 1], [], []>} : vector<16x8xf32>, vector<8x896xf32>, vector<16x896xf32> -> vector<16x896xf32>
    %106 = arith.addf %101, %105 : vector<16x896xf32>
    %c0_97 = arith.constant 0 : index
    %c73 = arith.constant 73 : index
    %107 = vector.load %arg12[%c0_97, %c73] : memref<8x1024xf32, #tpu.memory_space<vmem>>, vector<8x896xf32>
    %c19 = arith.constant 19 : index
    %c0_98 = arith.constant 0 : index
    %c0_99 = arith.constant 0 : index
    %108 = vector.load %arg4[%c19, %c0_98, %c0_99] : memref<27x16x8xf32, #tpu.memory_space<vmem>>, vector<1x16x8xf32>
    %109 = vector.shape_cast %108 : vector<1x16x8xf32> to vector<16x8xf32>
    %cst_100 = arith.constant dense<0.000000e+00> : vector<16x896xf32>
    %110 = tpu.matmul %109, %107, %cst_100 {dimension_numbers = #tpu.dot_dimension_numbers<[1], [0], [0], [1], [0, 0, 1, 1], [], []>} : vector<16x8xf32>, vector<8x896xf32>, vector<16x896xf32> -> vector<16x896xf32>
    %111 = arith.addf %106, %110 : vector<16x896xf32>
    %c0_101 = arith.constant 0 : index
    %c74 = arith.constant 74 : index
    %112 = vector.load %arg12[%c0_101, %c74] : memref<8x1024xf32, #tpu.memory_space<vmem>>, vector<8x896xf32>
    %c20 = arith.constant 20 : index
    %c0_102 = arith.constant 0 : index
    %c0_103 = arith.constant 0 : index
    %113 = vector.load %arg4[%c20, %c0_102, %c0_103] : memref<27x16x8xf32, #tpu.memory_space<vmem>>, vector<1x16x8xf32>
    %114 = vector.shape_cast %113 : vector<1x16x8xf32> to vector<16x8xf32>
    %cst_104 = arith.constant dense<0.000000e+00> : vector<16x896xf32>
    %115 = tpu.matmul %114, %112, %cst_104 {dimension_numbers = #tpu.dot_dimension_numbers<[1], [0], [0], [1], [0, 0, 1, 1], [], []>} : vector<16x8xf32>, vector<8x896xf32>, vector<16x896xf32> -> vector<16x896xf32>
    %116 = arith.addf %111, %115 : vector<16x896xf32>
    %c0_105 = arith.constant 0 : index
    %c78 = arith.constant 78 : index
    %117 = vector.load %arg12[%c0_105, %c78] : memref<8x1024xf32, #tpu.memory_space<vmem>>, vector<8x896xf32>
    %c21 = arith.constant 21 : index
    %c0_106 = arith.constant 0 : index
    %c0_107 = arith.constant 0 : index
    %118 = vector.load %arg4[%c21, %c0_106, %c0_107] : memref<27x16x8xf32, #tpu.memory_space<vmem>>, vector<1x16x8xf32>
    %119 = vector.shape_cast %118 : vector<1x16x8xf32> to vector<16x8xf32>
    %cst_108 = arith.constant dense<0.000000e+00> : vector<16x896xf32>
    %120 = tpu.matmul %119, %117, %cst_108 {dimension_numbers = #tpu.dot_dimension_numbers<[1], [0], [0], [1], [0, 0, 1, 1], [], []>} : vector<16x8xf32>, vector<8x896xf32>, vector<16x896xf32> -> vector<16x896xf32>
    %121 = arith.addf %116, %120 : vector<16x896xf32>
    %c0_109 = arith.constant 0 : index
    %c79 = arith.constant 79 : index
    %122 = vector.load %arg12[%c0_109, %c79] : memref<8x1024xf32, #tpu.memory_space<vmem>>, vector<8x896xf32>
    %c22 = arith.constant 22 : index
    %c0_110 = arith.constant 0 : index
    %c0_111 = arith.constant 0 : index
    %123 = vector.load %arg4[%c22, %c0_110, %c0_111] : memref<27x16x8xf32, #tpu.memory_space<vmem>>, vector<1x16x8xf32>
    %124 = vector.shape_cast %123 : vector<1x16x8xf32> to vector<16x8xf32>
    %cst_112 = arith.constant dense<0.000000e+00> : vector<16x896xf32>
    %125 = tpu.matmul %124, %122, %cst_112 {dimension_numbers = #tpu.dot_dimension_numbers<[1], [0], [0], [1], [0, 0, 1, 1], [], []>} : vector<16x8xf32>, vector<8x896xf32>, vector<16x896xf32> -> vector<16x896xf32>
    %126 = arith.addf %121, %125 : vector<16x896xf32>
    %c0_113 = arith.constant 0 : index
    %c80 = arith.constant 80 : index
    %127 = vector.load %arg12[%c0_113, %c80] : memref<8x1024xf32, #tpu.memory_space<vmem>>, vector<8x896xf32>
    %c23 = arith.constant 23 : index
    %c0_114 = arith.constant 0 : index
    %c0_115 = arith.constant 0 : index
    %128 = vector.load %arg4[%c23, %c0_114, %c0_115] : memref<27x16x8xf32, #tpu.memory_space<vmem>>, vector<1x16x8xf32>
    %129 = vector.shape_cast %128 : vector<1x16x8xf32> to vector<16x8xf32>
    %cst_116 = arith.constant dense<0.000000e+00> : vector<16x896xf32>
    %130 = tpu.matmul %129, %127, %cst_116 {dimension_numbers = #tpu.dot_dimension_numbers<[1], [0], [0], [1], [0, 0, 1, 1], [], []>} : vector<16x8xf32>, vector<8x896xf32>, vector<16x896xf32> -> vector<16x896xf32>
    %131 = arith.addf %126, %130 : vector<16x896xf32>
    %c0_117 = arith.constant 0 : index
    %c84 = arith.constant 84 : index
    %132 = vector.load %arg12[%c0_117, %c84] : memref<8x1024xf32, #tpu.memory_space<vmem>>, vector<8x896xf32>
    %c24 = arith.constant 24 : index
    %c0_118 = arith.constant 0 : index
    %c0_119 = arith.constant 0 : index
    %133 = vector.load %arg4[%c24, %c0_118, %c0_119] : memref<27x16x8xf32, #tpu.memory_space<vmem>>, vector<1x16x8xf32>
    %134 = vector.shape_cast %133 : vector<1x16x8xf32> to vector<16x8xf32>
    %cst_120 = arith.constant dense<0.000000e+00> : vector<16x896xf32>
    %135 = tpu.matmul %134, %132, %cst_120 {dimension_numbers = #tpu.dot_dimension_numbers<[1], [0], [0], [1], [0, 0, 1, 1], [], []>} : vector<16x8xf32>, vector<8x896xf32>, vector<16x896xf32> -> vector<16x896xf32>
    %136 = arith.addf %131, %135 : vector<16x896xf32>
    %c0_121 = arith.constant 0 : index
    %c85 = arith.constant 85 : index
    %137 = vector.load %arg12[%c0_121, %c85] : memref<8x1024xf32, #tpu.memory_space<vmem>>, vector<8x896xf32>
    %c25 = arith.constant 25 : index
    %c0_122 = arith.constant 0 : index
    %c0_123 = arith.constant 0 : index
    %138 = vector.load %arg4[%c25, %c0_122, %c0_123] : memref<27x16x8xf32, #tpu.memory_space<vmem>>, vector<1x16x8xf32>
    %139 = vector.shape_cast %138 : vector<1x16x8xf32> to vector<16x8xf32>
    %cst_124 = arith.constant dense<0.000000e+00> : vector<16x896xf32>
    %140 = tpu.matmul %139, %137, %cst_124 {dimension_numbers = #tpu.dot_dimension_numbers<[1], [0], [0], [1], [0, 0, 1, 1], [], []>} : vector<16x8xf32>, vector<8x896xf32>, vector<16x896xf32> -> vector<16x896xf32>
    %141 = arith.addf %136, %140 : vector<16x896xf32>
    %c0_125 = arith.constant 0 : index
    %c86 = arith.constant 86 : index
    %142 = vector.load %arg12[%c0_125, %c86] : memref<8x1024xf32, #tpu.memory_space<vmem>>, vector<8x896xf32>
    %c26 = arith.constant 26 : index
    %c0_126 = arith.constant 0 : index
    %c0_127 = arith.constant 0 : index
    %143 = vector.load %arg4[%c26, %c0_126, %c0_127] : memref<27x16x8xf32, #tpu.memory_space<vmem>>, vector<1x16x8xf32>
    %144 = vector.shape_cast %143 : vector<1x16x8xf32> to vector<16x8xf32>
    %cst_128 = arith.constant dense<0.000000e+00> : vector<16x896xf32>
    %145 = tpu.matmul %144, %142, %cst_128 {dimension_numbers = #tpu.dot_dimension_numbers<[1], [0], [0], [1], [0, 0, 1, 1], [], []>} : vector<16x8xf32>, vector<8x896xf32>, vector<16x896xf32> -> vector<16x896xf32>
    %146 = arith.addf %141, %145 : vector<16x896xf32>
    %c0_129 = arith.constant 0 : index
    %c0_130 = arith.constant 0 : index
    %147 = vector.load %arg5[%c0_129, %c0_130] : memref<16x1xf32, #tpu.memory_space<vmem>>, vector<16x1xf32>
    %148 = vector.broadcast %147 : vector<16x1xf32> to vector<16x896xf32>
    %149 = arith.addf %146, %148 : vector<16x896xf32>
    %cst_131 = arith.constant 0.000000e+00 : f32
    %150 = vector.broadcast %cst_131 : f32 to vector<16x896xf32>
    %151 = arith.maximumf %149, %150 : vector<16x896xf32>
    %c0_132 = arith.constant 0 : index
    %c0_133 = arith.constant 0 : index
    %152 = vector.load %arg6[%c0_132, %c0_133] : memref<896x4xf32, #tpu.memory_space<vmem>>, vector<896x4xf32>
    %cst_134 = arith.constant dense<0.000000e+00> : vector<16x4xf32>
    %153 = tpu.matmul %151, %152, %cst_134 {dimension_numbers = #tpu.dot_dimension_numbers<[1], [0], [0], [1], [0, 0, 1, 1], [], []>} : vector<16x896xf32>, vector<896x4xf32>, vector<16x4xf32> -> vector<16x4xf32>
    %c0_135 = arith.constant 0 : index
    %c0_136 = arith.constant 0 : index
    %154 = vector.load %arg7[%c0_135, %c0_136] : memref<32x16xf32, #tpu.memory_space<vmem>>, vector<32x16xf32>
    %cst_137 = arith.constant dense<0.000000e+00> : vector<32x4xf32>
    %155 = tpu.matmul %154, %153, %cst_137 {dimension_numbers = #tpu.dot_dimension_numbers<[1], [0], [0], [1], [0, 0, 1, 1], [], []>} : vector<32x16xf32>, vector<16x4xf32>, vector<32x4xf32> -> vector<32x4xf32>
    %c0_138 = arith.constant 0 : index
    %c0_139 = arith.constant 0 : index
    %156 = vector.load %arg8[%c0_138, %c0_139] : memref<32x1xf32, #tpu.memory_space<vmem>>, vector<32x1xf32>
    %157 = vector.broadcast %156 : vector<32x1xf32> to vector<32x4xf32>
    %158 = arith.addf %155, %157 : vector<32x4xf32>
    %cst_140 = arith.constant 0.000000e+00 : f32
    %159 = vector.broadcast %cst_140 : f32 to vector<32x4xf32>
    %160 = arith.maximumf %158, %159 : vector<32x4xf32>
    %c0_141 = arith.constant 0 : index
    %c0_142 = arith.constant 0 : index
    %161 = vector.load %arg9[%c0_141, %c0_142] : memref<20x32xf32, #tpu.memory_space<vmem>>, vector<20x32xf32>
    %cst_143 = arith.constant dense<0.000000e+00> : vector<20x4xf32>
    %162 = tpu.matmul %161, %160, %cst_143 {dimension_numbers = #tpu.dot_dimension_numbers<[1], [0], [0], [1], [0, 0, 1, 1], [], []>} : vector<20x32xf32>, vector<32x4xf32>, vector<20x4xf32> -> vector<20x4xf32>
    %c0_144 = arith.constant 0 : index
    %c0_145 = arith.constant 0 : index
    %163 = vector.load %arg10[%c0_144, %c0_145] : memref<20x1xf32, #tpu.memory_space<vmem>>, vector<20x1xf32>
    %164 = vector.broadcast %163 : vector<20x1xf32> to vector<20x4xf32>
    %165 = arith.addf %162, %164 : vector<20x4xf32>
    %c0_146 = arith.constant 0 : index
    %c0_147 = arith.constant 0 : index
    %c0_148 = arith.constant 0 : index
    %166 = vector.load %arg11[%c0_146, %c0_147, %c0_148] : memref<1x20x4xf32, #tpu.memory_space<vmem>>, vector<1x20x4xf32>
    %167 = vector.shape_cast %166 : vector<1x20x4xf32> to vector<20x4xf32>
    %168 = vector.shape_cast %165 : vector<20x4xf32> to vector<1x20x4xf32>
    tpu.vector_store %arg11[%c0_146, %c0_147, %c0_148], %168 {strides = array<i32>} : memref<1x20x4xf32, #tpu.memory_space<vmem>>, vector<1x20x4xf32>,
    return
  }
  func.func @transform_0(%arg0: i32) -> (i32, i32) {
    %c0_i32 = arith.constant 0 : i32
    %c0_i32_0 = arith.constant 0 : i32
    return %c0_i32, %arg0 : i32, i32
  }
  func.func @transform_1(%arg0: i32) -> (i32, i32) {
    %c0_i32 = arith.constant 0 : i32
    %c0_i32_0 = arith.constant 0 : i32
    %c0_i32_1 = arith.constant 0 : i32
    return %c0_i32, %c0_i32_0 : i32, i32
  }
  func.func @transform_2(%arg0: i32) -> (i32, i32) {
    %c0_i32 = arith.constant 0 : i32
    %c0_i32_0 = arith.constant 0 : i32
    %c0_i32_1 = arith.constant 0 : i32
    return %c0_i32, %c0_i32_0 : i32, i32
  }
  func.func @transform_3(%arg0: i32) -> (i32, i32, i32) {
    %c0_i32 = arith.constant 0 : i32
    %c0_i32_0 = arith.constant 0 : i32
    %c0_i32_1 = arith.constant 0 : i32
    %c0_i32_2 = arith.constant 0 : i32
    return %c0_i32, %c0_i32_0, %c0_i32_1 : i32, i32, i32
  }
  func.func @transform_4(%arg0: i32) -> (i32, i32) {
    %c0_i32 = arith.constant 0 : i32
    %c0_i32_0 = arith.constant 0 : i32
    %c0_i32_1 = arith.constant 0 : i32
    return %c0_i32, %c0_i32_0 : i32, i32
  }
  func.func @transform_5(%arg0: i32) -> (i32, i32) {
    %c0_i32 = arith.constant 0 : i32
    %c0_i32_0 = arith.constant 0 : i32
    %c0_i32_1 = arith.constant 0 : i32
    return %c0_i32, %c0_i32_0 : i32, i32
  }
  func.func @transform_6(%arg0: i32) -> (i32, i32) {
    %c0_i32 = arith.constant 0 : i32
    %c0_i32_0 = arith.constant 0 : i32
    %c0_i32_1 = arith.constant 0 : i32
    return %c0_i32, %c0_i32_0 : i32, i32
  }
  func.func @transform_7(%arg0: i32) -> (i32, i32) {
    %c0_i32 = arith.constant 0 : i32
    %c0_i32_0 = arith.constant 0 : i32
    %c0_i32_1 = arith.constant 0 : i32
    return %c0_i32, %c0_i32_0 : i32, i32
  }
  func.func @transform_8(%arg0: i32) -> (i32, i32) {
    %c0_i32 = arith.constant 0 : i32
    %c0_i32_0 = arith.constant 0 : i32
    %c0_i32_1 = arith.constant 0 : i32
    return %c0_i32, %c0_i32_0 : i32, i32
  }
  func.func @transform_9(%arg0: i32) -> (i32, i32) {
    %c0_i32 = arith.constant 0 : i32
    %c0_i32_0 = arith.constant 0 : i32
    %c0_i32_1 = arith.constant 0 : i32
    return %c0_i32, %c0_i32_0 : i32, i32
  }
  func.func @transform_10(%arg0: i32) -> (i32, i32, i32) {
    %c0_i32 = arith.constant 0 : i32
    %c0_i32_0 = arith.constant 0 : i32
    %c0_i32_1 = arith.constant 0 : i32
    return %arg0, %c0_i32, %c0_i32_0 : i32, i32, i32
  }
}

</mosaic_0001>

<bundles_post_ra>
// kernel: invariant_classifier_forward.1
= control target key start
LH: loop header
LB: loop body
LE: loop exit
PB: predicated region body
PF: predicated region fallthrough
CT: control target
= control target key end

     0   :  { %s13000_s13 = smov 0   ;;  %s13002_s14 = smov 0   ;;  %s15660_s0 = inlined_call_operand.vmem [shape: bf16[112,1792], index: 0, kind: input, shape index: {}]   ;;  %s15661_s1 = inlined_call_operand.vmem [shape: bf16[8,112], index: 1, kind: input, shape index: {}]   ;;  %s15662_s2 = inlined_call_operand.vmem [shape: f32[8,1], index: 2, kind: input, shape index: {}]   ;;  %s15663_s3 = inlined_call_operand.vmem [shape: f32[27,16,8], index: 3, kind: input, shape index: {}]   ;;  %s15664_s4 = inlined_call_operand.vmem [shape: f32[16,1], index: 4, kind: input, shape index: {}]   ;;  %s15665_s5 = inlined_call_operand.vmem [shape: f32[896,4], index: 5, kind: input, shape index: {}]   ;;  %s15666_s6 = inlined_call_operand.vmem [shape: f32[32,16], index: 6, kind: input, shape index: {}]   ;;  %s15667_s7 = inlined_call_operand.vmem [shape: f32[32,1], index: 7, kind: input, shape index: {}]   ;;  %s15668_s8 = inlined_call_operand.vmem [shape: f32[20,32], index: 8, kind: input, shape index: {}]   ;;  %s15669_s9 = inlined_call_operand.vmem [shape: f32[20,1], index: 9, kind: input, shape index: {}]   ;;  %s15670_s10 = inlined_call_operand.vmem [shape: f32[2,20,4], index: 10, kind: output, shape index: {}]  }
   0x1   :  { %s13004_s15 = smov 0  }
   0x2 LB: > { %s11445_s16 = sadd.s32 4294967295, %s12913_s15   ;;  %s13017_s17 = sadd.s32 1, %s12913_s15   ;;  %s12913_s15 = sphi %s13004_s15, %s15673_s15   ;;  %s12909_s14 = sphi %s13002_s14, %s15672_s14   ;;  %s12905_s13 = sphi %s13000_s13, %s15671_s13  }
   0x3   : > { %s24_s18 = ssub.s32 %s12913_s15, %s13017_s17  ;;  %s27_s19 = sadd.s32 1, %s12909_s14 }
   0x4   : > { %p25_p0 = scmp.eq.s32.totalorder %s24_s18, 0  ;;  %p34_p1 = scmp.ne.s32.totalorder %s12909_s14, %s12905_s13 }
   0x5   : > { %p35_p2 = scmp.eq.s32.totalorder %s12913_s15, 0  ;;  %p11448_p4 = scmp.ge.s32.totalorder %s12913_s15, 2 }
   0x6   : > { %s13026_s20 = scalar_select %p25_p0, %s12909_s14, %s27_s19  }
   0x7   : > { %p36_p3 = por %p35_p2, %p34_p1  ;;  %302 = sbr.rel (%p11448_p4) target bundleno = 49 (0x31), region = 52 }
   0xe   : > { %305 = sbr.rel (!%p36_p3) target bundleno = 49 (0x31), region = 56  ;;  %s307_s21 = sand.u32 (%p36_p3), 1, %s12909_s14  }
   0xf   : > { %s11810_s22 = smul.u32 (%p36_p3), 28, %s12913_s15 }
  0x10   : > { %s12762_s23 = smul.u32 (%p36_p3), 392, %s307_s21 }
  0x11   : > { %s13034_s26 = scalar_lea.vmem (%p36_p3), %s15660_s0, %s11810_s22 }
  0x12   : > { %v327_v0 = vld [vmem:[%s13034_s26] sm:$0xff] (%p36_p3)  ;;  %v329_v1 = vld [vmem:[%s13034_s26 + $0x8] sm:$0xff] (%p36_p3)  ;;  %v331_v2 = vld [vmem:[%s13034_s26 + $0x10] sm:$0xff] (%p36_p3)  ;;  %s13039_s27 = scalar_lea.vmem (%p36_p3), [#allocation3], %s12762_s23 }
  0x13   : > { %328 = vst [vmem:[%s13039_s27] sm:$0xff] (%p36_p3), %v327_v0  ;;  %330 = vst [vmem:[%s13039_s27 + $0x8] sm:$0xff] (%p36_p3), %v329_v1  ;;  %v333_v3 = vld [vmem:[%s13034_s26 + $0x38] sm:$0xff] (%p36_p3)  ;;  %v335_v4 = vld [vmem:[%s13034_s26 + $0x40] sm:$0xff] (%p36_p3) }
  0x14   : > { %332 = vst [vmem:[%s13039_s27 + $0x10] sm:$0xff] (%p36_p3), %v331_v2  ;;  %v337_v5 = vld [vmem:[%s13034_s26 + $0x48] sm:$0xff] (%p36_p3)  ;;  %334 = vst [vmem:[%s13039_s27 + $0x1c] sm:$0xff] (%p36_p3), %v333_v3  ;;  %v339_v6 = vld [vmem:[%s13034_s26 + $0x70] sm:$0xff] (%p36_p3) }
  0x15   : > { %336 = vst [vmem:[%s13039_s27 + $0x24] sm:$0xff] %v335_v4  ;;  %338 = vst [vmem:[%s13039_s27 + $0x2c] sm:$0xff] %v337_v5  ;;  %v341_v7 = vld [vmem:[%s13034_s26 + $0x78] sm:$0xff]  ;;  %v343_v8 = vld [vmem:[%s13034_s26 + $0x80] sm:$0xff] }
  0x16   : > { %340 = vst [vmem:[%s13039_s27 + $0x38] sm:$0xff] %v339_v6  ;;  %342 = vst [vmem:[%s13039_s27 + $0x40] sm:$0xff] %v341_v7  ;;  %v345_v9 = vld [vmem:[%s13034_s26 + $0xa8] sm:$0xff]  ;;  %v347_v10 = vld [vmem:[%s13034_s26 + $0xb0] sm:$0xff] }
  0x17   : > { %344 = vst [vmem:[%s13039_s27 + $0x48] sm:$0xff] %v343_v8  ;;  %v349_v11 = vld [vmem:[%s13034_s26 + $0xb8] sm:$0xff]  ;;  %346 = vst [vmem:[%s13039_s27 + $0x54] sm:$0xff] %v345_v9  ;;  %v351_v12 = vld [vmem:[%s13034_s26 + $0xe0] sm:$0xff] }
  0x18   : > { %348 = vst [vmem:[%s13039_s27 + $0x5c] sm:$0xff] %v347_v10  ;;  %350 = vst [vmem:[%s13039_s27 + $0x64] sm:$0xff] %v349_v11  ;;  %v353_v13 = vld [vmem:[%s13034_s26 + $0xe8] sm:$0xff]  ;;  %v355_v14 = vld [vmem:[%s13034_s26 + $0xf0] sm:$0xff] }
  0x19   : > { %352 = vst [vmem:[%s13039_s27 + $0x70] sm:$0xff] %v351_v12  ;;  %354 = vst [vmem:[%s13039_s27 + $0x78] sm:$0xff] %v353_v13  ;;  %v357_v15 = vld [vmem:[%s13034_s26 + $0x118] sm:$0xff]  ;;  %v359_v16 = vld [vmem:[%s13034_s26 + $0x120] sm:$0xff] }
  0x1a   : > { %356 = vst [vmem:[%s13039_s27 + $0x80] sm:$0xff] %v355_v14  ;;  %v361_v17 = vld [vmem:[%s13034_s26 + $0x128] sm:$0xff]  ;;  %358 = vst [vmem:[%s13039_s27 + $0x8c] sm:$0xff] %v357_v15  ;;  %v363_v18 = vld [vmem:[%s13034_s26 + $0x150] sm:$0xff] }
  0x1b   : > { %360 = vst [vmem:[%s13039_s27 + $0x94] sm:$0xff] %v359_v16  ;;  %362 = vst [vmem:[%s13039_s27 + $0x9c] sm:$0xff] %v361_v17  ;;  %v365_v19 = vld [vmem:[%s13034_s26 + $0x158] sm:$0xff]  ;;  %v367_v20 = vld [vmem:[%s13034_s26 + $0x160] sm:$0xff] }
  0x1c   : > { %364 = vst [vmem:[%s13039_s27 + $0xa8] sm:$0xff] %v363_v18  ;;  %366 = vst [vmem:[%s13039_s27 + $0xb0] sm:$0xff] %v365_v19  ;;  %v369_v21 = vld [vmem:[%s13034_s26 + $0x188] sm:$0xff]  ;;  %v371_v22 = vld [vmem:[%s13034_s26 + $0x190] sm:$0xff] }
  0x1d   : > { %368 = vst [vmem:[%s13039_s27 + $0xb8] sm:$0xff] %v367_v20  ;;  %v373_v23 = vld [vmem:[%s13034_s26 + $0x198] sm:$0xff]  ;;  %370 = vst [vmem:[%s13039_s27 + $0xc4] sm:$0xff] %v369_v21  ;;  %v375_v24 = vld [vmem:[%s13034_s26 + $0x1c0] sm:$0xff] }
  0x1e   : > { %372 = vst [vmem:[%s13039_s27 + $0xcc] sm:$0xff] %v371_v22  ;;  %374 = vst [vmem:[%s13039_s27 + $0xd4] sm:$0xff] %v373_v23  ;;  %v377_v25 = vld [vmem:[%s13034_s26 + $0x1c8] sm:$0xff]  ;;  %v379_v26 = vld [vmem:[%s13034_s26 + $0x1d0] sm:$0xff] }
  0x1f   : > { %376 = vst [vmem:[%s13039_s27 + $0xe0] sm:$0xff] %v375_v24  ;;  %378 = vst [vmem:[%s13039_s27 + $0xe8] sm:$0xff] %v377_v25  ;;  %v381_v27 = vld [vmem:[%s13034_s26 + $0x1f8] sm:$0xff]  ;;  %v383_v28 = vld [vmem:[%s13034_s26 + $0x200] sm:$0xff] }
  0x20   : > { %380 = vst [vmem:[%s13039_s27 + $0xf0] sm:$0xff] %v379_v26  ;;  %v385_v29 = vld [vmem:[%s13034_s26 + $0x208] sm:$0xff]  ;;  %382 = vst [vmem:[%s13039_s27 + $0xfc] sm:$0xff] %v381_v27  ;;  %v387_v30 = vld [vmem:[%s13034_s26 + $0x230] sm:$0xff] }
  0x21   : > { %384 = vst [vmem:[%s13039_s27 + $0x104] sm:$0xff] %v383_v28  ;;  %386 = vst [vmem:[%s13039_s27 + $0x10c] sm:$0xff] %v385_v29  ;;  %v389_v31 = vld [vmem:[%s13034_s26 + $0x238] sm:$0xff]  ;;  %v391_v32 = vld [vmem:[%s13034_s26 + $0x240] sm:$0xff] }
  0x22   : > { %388 = vst [vmem:[%s13039_s27 + $0x118] sm:$0xff] %v387_v30  ;;  %390 = vst [vmem:[%s13039_s27 + $0x120] sm:$0xff] %v389_v31  ;;  %v393_v33 = vld [vmem:[%s13034_s26 + $0x268] sm:$0xff]  ;;  %v395_v34 = vld [vmem:[%s13034_s26 + $0x270] sm:$0xff] }
  0x23   : > { %392 = vst [vmem:[%s13039_s27 + $0x128] sm:$0xff] %v391_v32  ;;  %v397_v35 = vld [vmem:[%s13034_s26 + $0x278] sm:$0xff]  ;;  %394 = vst [vmem:[%s13039_s27 + $0x134] sm:$0xff] %v393_v33  ;;  %v399_v36 = vld [vmem:[%s13034_s26 + $0x2a0] sm:$0xff] }
  0x24   : > { %396 = vst [vmem:[%s13039_s27 + $0x13c] sm:$0xff] %v395_v34  ;;  %398 = vst [vmem:[%s13039_s27 + $0x144] sm:$0xff] %v397_v35  ;;  %v401_v37 = vld [vmem:[%s13034_s26 + $0x2a8] sm:$0xff]  ;;  %v403_v38 = vld [vmem:[%s13034_s26 + $0x2b0] sm:$0xff] }
  0x25   : > { %400 = vst [vmem:[%s13039_s27 + $0x150] sm:$0xff] %v399_v36  ;;  %402 = vst [vmem:[%s13039_s27 + $0x158] sm:$0xff] %v401_v37  ;;  %v405_v39 = vld [vmem:[%s13034_s26 + $0x2d8] sm:$0xff]  ;;  %v407_v40 = vld [vmem:[%s13034_s26 + $0x2e0] sm:$0xff] }
  0x26   : > { %404 = vst [vmem:[%s13039_s27 + $0x160] sm:$0xff] %v403_v38  ;;  %v409_v41 = vld [vmem:[%s13034_s26 + $0x2e8] sm:$0xff]  ;;  %406 = vst [vmem:[%s13039_s27 + $0x16c] sm:$0xff] %v405_v39  ;;  %v11450_v42 = vld [vmem:[%s13034_s26 + $0x18] sm:$0xf] }
  0x27   : > { %408 = vst [vmem:[%s13039_s27 + $0x174] sm:$0xff] %v407_v40  ;;  %410 = vst [vmem:[%s13039_s27 + $0x17c] sm:$0xff] %v409_v41  ;;  %v11452_v43 = vld [vmem:[%s13034_s26 + $0x50] sm:$0xf]  ;;  %v11454_v44 = vld [vmem:[%s13034_s26 + $0x88] sm:$0xf] }
  0x28   : > { %11451 = vst [vmem:[%s13039_s27 + $0x18] sm:$0xf] %v11450_v42  ;;  %11453 = vst [vmem:[%s13039_s27 + $0x34] sm:$0xf] %v11452_v43  ;;  %v11456_v45 = vld [vmem:[%s13034_s26 + $0xc0] sm:$0xf] }
  0x29   : > { %11455 = vst [vmem:[%s13039_s27 + $0x50] sm:$0xf] %v11454_v44  ;;  %v11458_v46 = vld [vmem:[%s13034_s26 + $0xf8] sm:$0xf]  ;;  %v11460_v47 = vld [vmem:[%s13034_s26 + $0x130] sm:$0xf] }
  0x2a   : > { %11457 = vst [vmem:[%s13039_s27 + $0x6c] sm:$0xf] %v11456_v45  ;;  %11459 = vst [vmem:[%s13039_s27 + $0x88] sm:$0xf] %v11458_v46  ;;  %v11462_v48 = vld [vmem:[%s13034_s26 + $0x168] sm:$0xf] }
  0x2b   : > { %11461 = vst [vmem:[%s13039_s27 + $0xa4] sm:$0xf] %v11460_v47  ;;  %v11464_v49 = vld [vmem:[%s13034_s26 + $0x1a0] sm:$0xf]  ;;  %v11466_v50 = vld [vmem:[%s13034_s26 + $0x1d8] sm:$0xf] }
  0x2c   : > { %11463 = vst [vmem:[%s13039_s27 + $0xc0] sm:$0xf] %v11462_v48  ;;  %11465 = vst [vmem:[%s13039_s27 + $0xdc] sm:$0xf] %v11464_v49  ;;  %v11468_v51 = vld [vmem:[%s13034_s26 + $0x210] sm:$0xf] }
  0x2d   : > { %11467 = vst [vmem:[%s13039_s27 + $0xf8] sm:$0xf] %v11466_v50  ;;  %v11470_v52 = vld [vmem:[%s13034_s26 + $0x248] sm:$0xf]  ;;  %v11472_v53 = vld [vmem:[%s13034_s26 + $0x280] sm:$0xf] }
  0x2e   : > { %11469 = vst [vmem:[%s13039_s27 + $0x114] sm:$0xf] %v11468_v51  ;;  %11471 = vst [vmem:[%s13039_s27 + $0x130] sm:$0xf] %v11470_v52  ;;  %v11474_v54 = vld [vmem:[%s13034_s26 + $0x2b8] sm:$0xf] }
  0x2f   : > { %11473 = vst [vmem:[%s13039_s27 + $0x14c] sm:$0xf] %v11472_v53  ;;  %v11476_v55 = vld [vmem:[%s13034_s26 + $0x2f0] sm:$0xf]  ;;  %11475 = vst [vmem:[%s13039_s27 + $0x168] sm:$0xf] %v11474_v54 }
  0x30   : > { %11477 = vst [vmem:[%s13039_s27 + $0x184] sm:$0xf] %v11476_v55 }
  0x31 PF: > { %p11478_p5 = scmp.ge.s32.totalorder %s12913_s15, 1  ;;  %p450_p6 = scmp.lt.s32.totalorder %s12913_s15, 3 }
  0x33   : > { %p451_p7 = pnand %p11478_p5, %p450_p6 }
  0x34   : > { %s457_s28 = sand.u32 (!%p451_p7), 1, %s12905_s13   ;;  %v12915_v56 = vmov (!%p451_p7), 0   ;;  %v559_v57 = vld [vmem:[%s15662_s2] sm:$0xff] (!%p451_p7)  ;;  %vm817_vm0 = vcmask (!%p451_p7), 916480   ;;  %v12916_v26 = vmov (!%p451_p7), 0.0   ;;  %vm12917_vm1 = vmmov (!%p451_p7), 0  }
  0x35   : > { %454 = sbr.rel (%p451_p7) target bundleno = 1853 (0x73d), region = 82  ;;  %853 = vmatprep.mubr.bf16.mxu0 (!%p451_p7), %v12915_v56  ;;  %894 = vmatprep.mubr.bf16.mxu1 (!%p451_p7), %v12915_v56  ;;  %v502_v23 = vld [vmem:[%s15661_s1] sm:$0xf] (!%p451_p7)  ;;  %s12918_s19 = smov (!%p451_p7), 127   ;;  %vm1042_vm2 = vcmask (!%p451_p7), 1039360   ;;  %vm1057_vm3 = vcmask (!%p451_p7), 64512  }
  0x36   : > { %s12763_s29 = smul.u32 (!%p451_p7), 392, %s457_s28  ;;  %12819 = vset.pattern.permute.xlu0 (!%p451_p7), %v12915_v56  ;;  %12820 = vset.pattern.permute.xlu1 (!%p451_p7), %v12915_v56  ;;  %s12919_s21 = smov (!%p451_p7), 126   ;;  %vm1701_vm4 = vcmask (!%p451_p7), 1031168   ;;  %vm2061_vm5 = vcmask (!%p451_p7), 998400   ;;  %vm2421_vm6 = vcmask (!%p451_p7), 990208   ;;  %vm2781_vm7 = vcmask (!%p451_p7), 982016  }
  0x37   : > { %562 = vperm.xlu0 (!%p451_p7), %12819, %v559_v57   ;;  %s12920_s22 = smov (!%p451_p7), 122   ;;  %s12921_s23 = smov (!%p451_p7), 121   ;;  %vm3141_vm8 = vcmask (!%p451_p7), 949248   ;;  %vm3501_vm9 = vcmask (!%p451_p7), 941056   ;;  %vm3861_vm10 = vcmask (!%p451_p7), 932864   ;;  %vm4221_vm11 = vcmask (!%p451_p7), 752640  }
  0x38   : > { %s13160_s12 = scalar_lea.vmem (!%p451_p7), [#allocation3], %s12763_s29  ;;  %s12922_s24 = smov (!%p451_p7), 120   ;;  %vm4581_vm12 = vcmask (!%p451_p7), 744448   ;;  %vm4941_vm13 = vcmask (!%p451_p7), 736256   ;;  %vm5301_vm14 = vcmask (!%p451_p7), 703488   ;;  %vm5661_vm15 = vcmask (!%p451_p7), 695296  }
  0x39   : > { %v12821_v58 = vld [vmem:[%s13160_s12 + $0x4] ss:$28 sps:$4 sm:$0xff] (!%p451_p7)   ;;  %v12823_v59 = vld [vmem:[%s13160_s12 + $0xc] ss:$28 sps:$4 sm:$0xff] (!%p451_p7)   ;;  %v12827_v62 = vld [vmem:[%s13160_s12 + $0x3c] ss:$28 sps:$4 sm:$0xff] (!%p451_p7)  }
  0x3a   : > { %821 = vmatprep.subr.bf16.mxu0 (!%p451_p7), %v12821_v58  ;;  %v12825_v60 = vld [vmem:[%s13160_s12] ss:$28 sps:$4 sm:$0xff] (!%p451_p7)   ;;  %v12826_v61 = vld [vmem:[%s13160_s12 + $0x8] ss:$28 sps:$4 sm:$0xff] (!%p451_p7)   ;;  %862 = vmatprep.subr.bf16.mxu1 (!%p451_p7), %v12823_v59  ;;  %v12831_v0 = vld [vmem:[%s13160_s12 + $0x38] ss:$28 sps:$4 sm:$0xff] (!%p451_p7)  }
  0x3b   : > { %822 = vmatpush1.bf16.msra.mxu0 (!%p451_p7), %v12825_v60  ;;  %863 = vmatpush1.bf16.msra.mxu1 (!%p451_p7), %v12826_v61  ;;  %v12829_v63 = vld [vmem:[%s13160_s12 + $0x44] ss:$28 sps:$4 sm:$0xff] (!%p451_p7)   ;;  %v12833_v2 = vld [vmem:[%s13160_s12 + $0x74] ss:$28 sps:$4 sm:$0xff] (!%p451_p7)   ;;  %v12835_v3 = vld [vmem:[%s13160_s12 + $0x7c] ss:$28 sps:$4 sm:$0xff] (!%p451_p7)  }
  0x3c   : > { %823 = vmatprep.subr.bf16.mxu0 %v12827_v62  ;;  %v12832_v1 = vld [vmem:[%s13160_s12 + $0x40] ss:$28 sps:$4 sm:$0xff]   ;;  %864 = vmatprep.subr.bf16.mxu1 %v12829_v63  ;;  %v12837_v4 = vld [vmem:[%s13160_s12 + $0x70] ss:$28 sps:$4 sm:$0xff]   ;;  %v12838_v5 = vld [vmem:[%s13160_s12 + $0x78] ss:$28 sps:$4 sm:$0xff]  }
  0x3d   : > { %v12839_v6 = vld [vmem:[%s13160_s12 + $0xac] ss:$28 sps:$4 sm:$0xff]   ;;  %v12841_v7 = vld [vmem:[%s13160_s12 + $0xb4] ss:$28 sps:$4 sm:$0xff]   ;;  %v12845_v10 = vld [vmem:[%s13160_s12 + $0xe4] ss:$28 sps:$4 sm:$0xff]  }
  0x3e   : > { %v12843_v8 = vld [vmem:[%s13160_s12 + $0xa8] ss:$28 sps:$4 sm:$0xff]   ;;  %v12844_v9 = vld [vmem:[%s13160_s12 + $0xb0] ss:$28 sps:$4 sm:$0xff]   ;;  %v12849_v12 = vld [vmem:[%s13160_s12 + $0xe0] ss:$28 sps:$4 sm:$0xff]  }
  0x3f   : > { %824 = vmatpush1.bf16.msra.mxu0 %v12831_v0  ;;  %865 = vmatpush1.bf16.msra.mxu1 %v12832_v1  ;;  %v12847_v11 = vld [vmem:[%s13160_s12 + $0xec] ss:$28 sps:$4 sm:$0xff]   ;;  %v12851_v14 = vld [vmem:[%s13160_s12 + $0x11c] ss:$28 sps:$4 sm:$0xff]   ;;  %v12853_v15 = vld [vmem:[%s13160_s12 + $0x124] ss:$28 sps:$4 sm:$0xff]  }
  0x40   : > { %825 = vmatprep.subr.bf16.mxu0 %v12833_v2  ;;  %866 = vmatprep.subr.bf16.mxu1 %v12835_v3  ;;  %v12850_v13 = vld [vmem:[%s13160_s12 + $0xe8] ss:$28 sps:$4 sm:$0xff]   ;;  %v12855_v16 = vld [vmem:[%s13160_s12 + $0x118] ss:$28 sps:$4 sm:$0xff]   ;;  %v12856_v17 = vld [vmem:[%s13160_s12 + $0x120] ss:$28 sps:$4 sm:$0xff]  }
  0x41   : > { %v12857_v18 = vld [vmem:[%s13160_s12 + $0x154] ss:$28 sps:$4 sm:$0xff]   ;;  %v12859_v19 = vld [vmem:[%s13160_s12 + $0x15c] ss:$28 sps:$4 sm:$0xff]   ;;  %v12869_v27 = vld [vmem:[%s13160_s12 + $0x4c] ss:$28 sps:$4 sm:$0xff]  }
  0x42   : > { %v12861_v20 = vld [vmem:[%s13160_s12 + $0x150] ss:$28 sps:$4 sm:$0xff]   ;;  %v12862_v21 = vld [vmem:[%s13160_s12 + $0x158] ss:$28 sps:$4 sm:$0xff]   ;;  %v12867_v28 = vld [vmem:[%s13160_s12 + $0x48] ss:$28 sps:$4 sm:$0xff]  }
  0x43   : > { %826 = vmatpush1.bf16.msra.mxu0 %v12837_v4  ;;  %867 = vmatpush1.bf16.msra.mxu1 %v12838_v5  ;;  %v12865_v22 = vld [vmem:[%s13160_s12 + $0x14] ss:$28 sps:$4 sm:$0xff]   ;;  %v12873_v30 = vld [vmem:[%s13160_s12 + $0x84] ss:$28 sps:$4 sm:$0xff]   ;;  %v12877_v33 = vld [vmem:[%s13160_s12 + $0xbc] ss:$28 sps:$4 sm:$0xff]  }
  0x44   : > { %827 = vmatprep.subr.bf16.mxu0 %v12839_v6  ;;  %868 = vmatprep.subr.bf16.mxu1 %v12841_v7  ;;  %v12863_v24 = vld [vmem:[%s13160_s12 + $0x10] ss:$28 sps:$4 sm:$0xff]   ;;  %v12866_v25 = vld [vmem:[%s13160_s12 + $0x18] ss:$28 sps:$4 sm:$0xff]   ;;  %v12871_v31 = vld [vmem:[%s13160_s12 + $0x80] ss:$28 sps:$4 sm:$0xff]  }
  0x45   : > { %v12870_v29 = vld [vmem:[%s13160_s12 + $0x50] ss:$28 sps:$4 sm:$0xff]   ;;  %v12874_v32 = vld [vmem:[%s13160_s12 + $0x88] ss:$28 sps:$4 sm:$0xff]   ;;  %v12875_v34 = vld [vmem:[%s13160_s12 + $0xb8] ss:$28 sps:$4 sm:$0xff]  }
  0x46   : > { %v12878_v35 = vld [vmem:[%s13160_s12 + $0xc0] ss:$28 sps:$4 sm:$0xff]   ;;  %v12881_v36 = vld [vmem:[%s13160_s12 + $0xf4] ss:$28 sps:$4 sm:$0xff]   ;;  %v12885_v39 = vld [vmem:[%s13160_s12 + $0x12c] ss:$28 sps:$4 sm:$0xff]  }
  0x47   : > { %828 = vmatpush1.bf16.msra.mxu0 %v12843_v8  ;;  %869 = vmatpush1.bf16.msra.mxu1 %v12844_v9  ;;  %v12879_v37 = vld [vmem:[%s13160_s12 + $0xf0] ss:$28 sps:$4 sm:$0xff]   ;;  %v12882_v38 = vld [vmem:[%s13160_s12 + $0xf8] ss:$28 sps:$4 sm:$0xff]   ;;  %v12883_v40 = vld [vmem:[%s13160_s12 + $0x128] ss:$28 sps:$4 sm:$0xff]  }
  0x48   : > { %829 = vmatprep.subr.bf16.mxu0 %v12845_v10  ;;  %870 = vmatprep.subr.bf16.mxu1 %v12847_v11  ;;  %v12886_v41 = vld [vmem:[%s13160_s12 + $0x130] ss:$28 sps:$4 sm:$0xff]   ;;  %v12889_v42 = vld [vmem:[%s13160_s12 + $0x164] ss:$28 sps:$4 sm:$0xff]   ;;  %s12923_s25 = smov 116   ;;  %s12924_s26 = smov 115  }
  0x49   : > { %v12887_v43 = vld [vmem:[%s13160_s12 + $0x160] ss:$28 sps:$4 sm:$0xff]   ;;  %v12890_v44 = vld [vmem:[%s13160_s12 + $0x168] ss:$28 sps:$4 sm:$0xff]   ;;  %s12925_s27 = smov 114   ;;  %s12926_s28 = smov 92  }
  0x4a   : > { %s12927_s13 = smov 91   ;;  %s12928_s18 = smov 90  }
  0x4b   : > { %830 = vmatpush1.bf16.msra.mxu0 %v12849_v12  ;;  %871 = vmatpush1.bf16.msra.mxu1 %v12850_v13  ;;  %s12931_s11 = smov 84   ;;  %s12936_s30 = smov 55  }
  0x4c   : > { %831 = vmatprep.subr.bf16.mxu0 %v12851_v14  ;;  %872 = vmatprep.subr.bf16.mxu1 %v12853_v15  ;;  %s12940_s29 = smov 48   ;;  %s12941_s12 = smov 44  }
  0x4d   : > { %p495_p8 = scmp.lt.s32.totalorder %s11445_s16, 1 }
  0x4f   : > { %832 = vmatpush1.bf16.msra.mxu0 %v12855_v16  ;;  %873 = vmatpush1.bf16.msra.mxu1 %v12856_v17  ;;  %v13361_v16 = vld [vmem:[%s15663_s3 + $0x10] sm:$0xff]  ;;  %s15675_s16 = smov (!%p495_p8, %s11445_s16), 1 }
  0x50   : > { %833 = vmatprep.subr.bf16.mxu0 %v12857_v18  ;;  %874 = vmatprep.subr.bf16.mxu1 %v12859_v19  ;;  %v13374_v18 = vld [vmem:[%s15663_s3 + $0x18] sm:$0xff] }
  0x53   : > { %834 = vmatpush1.bf16.msra.mxu0 %v12861_v20  ;;  %875 = vmatpush1.bf16.msra.mxu1 %v12862_v21 }
  0x54   : > { %903 = vmatprep.subr.bf16.mxu0 %v12865_v22  ;;  %12045 = vmatprep.subr.bf16.mxu1 %v12916_v26 }
  0x56   : > { %11529 = vmatmul.mubr.msk.bf16.vlgmr.msra.gmra.mrb[0].mxu0 %vm817_vm0, %v502_v23  ;;  %11530 = vmatmul.mubr.msk.bf16.vlgmr.msra.gmra.mrb[0].mxu1 %vm817_vm0, %v502_v23 }
  0x57   : > { %904 = vmatpush1.bf16.msra.mxu0 %v12863_v24  ;;  %12046 = vmatpush3.bf16.msra.mxu1 %v12866_v25 }
  0x58   : > { %905 = vmatprep.subr.bf16.mxu0 %v12869_v27  ;;  %12047 = vmatprep.subr.bf16.mxu1 %v12916_v26 }
  0x59   : > { %935 = vmatprep.mubr.bf16.mxu0 %v12915_v56  ;;  %12059 = vmatprep.mubr.msk.bf16.mxu1 %vm12917_vm1, %v12916_v26 }
  0x5b   : > { %906 = vmatpush1.bf16.msra.mxu0 %v12867_v28  ;;  %12048 = vmatpush3.bf16.msra.mxu1 %v12870_v29 }
  0x5c   : > { %907 = vmatprep.subr.bf16.mxu0 %v12873_v30  ;;  %12049 = vmatprep.subr.bf16.mxu1 %v12916_v26  ;;  %v13435_v30 = vld [vmem:[%s15663_s3] sm:$0xff] }
  0x5f   : > { %908 = vmatpush1.bf16.msra.mxu0 %v12871_v31  ;;  %12050 = vmatpush3.bf16.msra.mxu1 %v12874_v32 }
  0x60   : > { %909 = vmatprep.subr.bf16.mxu0 %v12877_v33  ;;  %12051 = vmatprep.subr.bf16.mxu1 %v12916_v26 }
  0x63   : > { %910 = vmatpush1.bf16.msra.mxu0 %v12875_v34  ;;  %12052 = vmatpush3.bf16.msra.mxu1 %v12878_v35  ;;  %v13452_v34 = vld [vmem:[%s15663_s3 + $0x8] sm:$0xff] }
  0x64   : > { %911 = vmatprep.subr.bf16.mxu0 %v12881_v36  ;;  %12053 = vmatprep.subr.bf16.mxu1 %v12916_v26 }
  0x67   : > { %912 = vmatpush1.bf16.msra.mxu0 %v12879_v37  ;;  %12054 = vmatpush3.bf16.msra.mxu1 %v12882_v38 }
  0x68   : > { %913 = vmatprep.subr.bf16.mxu0 %v12885_v39  ;;  %12055 = vmatprep.subr.bf16.mxu1 %v12916_v26 }
  0x6b   : > { %914 = vmatpush1.bf16.msra.mxu0 %v12883_v40  ;;  %12056 = vmatpush3.bf16.msra.mxu1 %v12886_v41 }
  0x6c   : > { %915 = vmatprep.subr.bf16.mxu0 %v12889_v42  ;;  %12057 = vmatprep.subr.bf16.mxu1 %v12916_v26 }
  0x6f   : > { %916 = vmatpush1.bf16.msra.mxu0 %v12887_v43  ;;  %12058 = vmatpush3.bf16.msra.mxu1 %v12890_v44  ;;  %v13487_v43 = vld [vmem:[%s15663_s3 + $0x20] sm:$0xff] }
  0x72   : > { %11531 = vmatmul.mubr.msk.bf16.vlgmr.msra.gmra.mrb[4].mxu0 %vm817_vm0, %v502_v23  ;;  %12060 = vmatmul.mubr.msk.bf16.vlgmr.msra.gmra.mrb[4].mxu1 %vm817_vm0, %v502_v23  ;;  %vm6021_vm0 = vcmask 687104  }
  0x73   : > { %1128 = vmatprep.mubr.f32.mxu0 %v12916_v26  ;;  %1205 = vmatprep.mubr.f32.mxu1 %v12916_v26 }
  0xb6   : > { %v13230_v45 = vpop.permute.xlu0 %562 }
 0x129   : > { %v855_v46 = vpop.f32.mrb[0].mxu0  ;;  %v896_v47 = vpop.f32.mrb[0].mxu1 }
 0x12a   : > { %v897_v48 = vadd.f32 %v896_v47, %v13230_v45  ;;  %v857_v49 = vpop.f32.mrb[1].mxu0  ;;  %v13233_v50 = vpop.f32.mrb[1].mxu1  ;;  %v856_v54 = vadd.f32 %v855_v46, %v13230_v45 }
 0x12b   : > { %v858_v51 = vadd.f32 %v857_v49, %v13230_v45  ;;  %v859_v52 = vpop.f32.mrb[2].mxu0  ;;  %v900_v53 = vpop.f32.mrb[2].mxu1  ;;  %v899_v10 = vadd.f32 %v13233_v50, %v13230_v45 }
 0x12c   : > { %v13237_v55 = vmax.f32 %v897_v48, 0.0  ;;  %v860_v56 = vpop.f32.mrb[3].mxu0  ;;  %v901_v57 = vpop.f32.mrb[3].mxu1  ;;  %v13245_v59 = vmax.f32 %v856_v54, 0.0  ;;  %v13505_v48 = vld [vmem:[%s15663_s3 + $0x28] sm:$0xff] }
 0x12d   : > { %v13239_v58 = vmax.f32 %v858_v51, 0.0  ;;  %v13340_v11 = vmax.f32 %v899_v10, 0.0 }
 0x12e   : > { %1030 = vrot.lane.b32.xlu1 %v13237_v55, %s12918_s19 }
 0x12f   : > { %1028 = vrot.lane.b32.xlu0 %v13239_v58, %s12918_s19 }
 0x132   : > { %1026 = vrot.lane.b32.xlu1 %v13245_v59, %s12918_s19 }
 0x145   : > { %v937_v60 = vpop.f32.mrb[4].mxu0  ;;  %v978_v61 = vpop.f32.mrb[4].mxu1 }
 0x146   : > { %v979_v62 = vadd.f32 %v978_v61, %v13230_v45  ;;  %v939_v63 = vpop.f32.mrb[5].mxu0  ;;  %v12061_v0 = vpop.f32.mrb[5].mxu1  ;;  %v938_v7 = vadd.f32 %v937_v60, %v13230_v45  ;;  %v13542_v60 = vld [vmem:[%s15663_s3 + $0x30] sm:$0xff] }
 0x147   : > { %v940_v1 = vadd.f32 %v939_v63, %v13230_v45  ;;  %v941_v2 = vpop.f32.mrb[6].mxu0  ;;  %v981_v3 = vpop.f32.mrb[6].mxu1 }
 0x148   : > { %v13251_v4 = vmax.f32 %v979_v62, 0.0  ;;  %v942_v5 = vpop.f32.mrb[7].mxu0  ;;  %v12062_v6 = vpop.f32.mrb[7].mxu1  ;;  %v13260_v9 = vmax.f32 %v938_v7, 0.0 }
 0x149   : > { %v13254_v8 = vmax.f32 %v940_v1, 0.0  ;;  %v13562_v1 = vld [vmem:[%s15663_s3 + $0x38] sm:$0xff] }
 0x14a   : > { %1038 = vrot.lane.b32.xlu1 %v13251_v4, %s12918_s19 }
 0x14b   : > { %1036 = vrot.lane.b32.xlu0 %v13254_v8, %s12918_s19 }
 0x14e   : > { %1687 = vrot.lane.b32.xlu1 %v13239_v58, %s12919_s21 }
 0x14f   : > { %1034 = vrot.lane.b32.xlu0 %v13260_v9, %s12918_s19 }
 0x152   : > { %1685 = vrot.lane.b32.xlu1 %v13245_v59, %s12919_s21 }
 0x153   : > { %1689 = vrot.lane.b32.xlu0 %v13237_v55, %s12919_s21 }
 0x156   : > { %1697 = vrot.lane.b32.xlu1 %v13251_v4, %s12919_s21 }
 0x157   : > { %1695 = vrot.lane.b32.xlu0 %v13254_v8, %s12919_s21 }
 0x15a   : > { %2047 = vrot.lane.b32.xlu1 %v13239_v58, %s12920_s22 }
 0x15b   : > { %1693 = vrot.lane.b32.xlu0 %v13260_v9, %s12919_s21 }
 0x15e   : > { %2045 = vrot.lane.b32.xlu1 %v13245_v59, %s12920_s22 }
 0x15f   : > { %2049 = vrot.lane.b32.xlu0 %v13237_v55, %s12920_s22 }
 0x162   : > { %2057 = vrot.lane.b32.xlu1 %v13251_v4, %s12920_s22 }
 0x163   : > { %2055 = vrot.lane.b32.xlu0 %v13254_v8, %s12920_s22 }
 0x166   : > { %2407 = vrot.lane.b32.xlu1 %v13239_v58, %s12921_s23 }
 0x167   : > { %2053 = vrot.lane.b32.xlu0 %v13260_v9, %s12920_s22 }
 0x16a   : > { %2405 = vrot.lane.b32.xlu1 %v13245_v59, %s12921_s23 }
 0x16b   : > { %2409 = vrot.lane.b32.xlu0 %v13237_v55, %s12921_s23 }
 0x16e   : > { %2417 = vrot.lane.b32.xlu1 %v13251_v4, %s12921_s23 }
 0x16f   : > { %2413 = vrot.lane.b32.xlu0 %v13260_v9, %s12921_s23 }
 0x172   : > { %2767 = vrot.lane.b32.xlu1 %v13239_v58, %s12922_s24 }
 0x173   : > { %2415 = vrot.lane.b32.xlu0 %v13254_v8, %s12921_s23 }
 0x176   : > { %2765 = vrot.lane.b32.xlu1 %v13245_v59, %s12922_s24 }
 0x177   : > { %2769 = vrot.lane.b32.xlu0 %v13237_v55, %s12922_s24 }
 0x17a   : > { %2777 = vrot.lane.b32.xlu1 %v13251_v4, %s12922_s24 }
 0x17b   : > { %2773 = vrot.lane.b32.xlu0 %v13260_v9, %s12922_s24 }
 0x17e   : > { %3127 = vrot.lane.b32.xlu1 %v13239_v58, %s12923_s25 }
 0x17f   : > { %3129 = vrot.lane.b32.xlu0 %v13237_v55, %s12923_s25 }
 0x182   : > { %3125 = vrot.lane.b32.xlu1 %v13245_v59, %s12923_s25 }
 0x183   : > { %2775 = vrot.lane.b32.xlu0 %v13254_v8, %s12922_s24 }
 0x186   : > { %3137 = vrot.lane.b32.xlu1 %v13251_v4, %s12923_s25 }
 0x187   : > { %3133 = vrot.lane.b32.xlu0 %v13260_v9, %s12923_s25 }
 0x18a   : > { %3487 = vrot.lane.b32.xlu1 %v13239_v58, %s12924_s26 }
 0x18b   : > { %3489 = vrot.lane.b32.xlu0 %v13237_v55, %s12924_s26 }
 0x18e   : > { %3485 = vrot.lane.b32.xlu1 %v13245_v59, %s12924_s26 }
 0x18f   : > { %3493 = vrot.lane.b32.xlu0 %v13260_v9, %s12924_s26 }
 0x192   : > { %3497 = vrot.lane.b32.xlu1 %v13251_v4, %s12924_s26 }
 0x193   : > { %3135 = vrot.lane.b32.xlu0 %v13254_v8, %s12923_s25 }
 0x196   : > { %3847 = vrot.lane.b32.xlu1 %v13239_v58, %s12925_s27 }
 0x197   : > { %3849 = vrot.lane.b32.xlu0 %v13237_v55, %s12925_s27 }
 0x19a   : > { %3845 = vrot.lane.b32.xlu1 %v13245_v59, %s12925_s27 }
 0x19b   : > { %1032 = vrot.lane.b32.xlu0 %v13340_v11, %s12918_s19 }
 0x19e   : > { %3853 = vrot.lane.b32.xlu1 %v13260_v9, %s12925_s27 }
 0x19f   : > { %3857 = vrot.lane.b32.xlu0 %v13251_v4, %s12925_s27 }
 0x1a0   : > { %v13350_v12 = vpop.permute.xlu1 %1030 }
 0x1a1   : > { %v1029_v13 = vpop.permute.xlu0 %1028 }
 0x1a2   : > { %4207 = vrot.lane.b32.xlu1 %v13239_v58, %s12926_s28  ;;  %v1044_v14 = vsel %vm1042_vm2, %v1029_v13, %v13350_v12 }
 0x1a3   : > { %3495 = vrot.lane.b32.xlu0 %v13254_v8, %s12924_s26  ;;  %1064 = vmatprep.subr.mxu0 %v1044_v14 }
 0x1a4   : > { %v1027_v15 = vpop.permute.xlu1 %1026 }
 0x1a5   : > { %v1043_v17 = vsel %vm1042_vm2, %v1027_v15, %v1029_v13  ;;  %v13601_v15 = vld [vmem:[%s15663_s3 + $0x40] sm:$0xff] }
 0x1a6   : > { %4205 = vrot.lane.b32.xlu1 %v13245_v59, %s12926_s28  ;;  %1065 = vmatpush1.msra.mxu0 %v1043_v17 }
 0x1a7   : > { %1040 = vrot.lane.b32.xlu0 %v12916_v26, %s12918_s19  ;;  %11535 = vmatmul.mubr.msk.f32.vlgmr.msra.gmra.mrb[8].mxu0 %vm1057_vm3, %v13361_v16  ;;  %s12933_s19 = smov 79  }
 0x1a8   : > { %1134 = vmatprep.mubr.f32.mxu0 %v12916_v26 }
 0x1aa   : > { %4217 = vrot.lane.b32.xlu1 %v13251_v4, %s12926_s28 }
 0x1ab   : > { %4209 = vrot.lane.b32.xlu0 %v13237_v55, %s12926_s28  ;;  %11536 = vmatmul.mubr.msk.f32.gmra.mrb[10].mxu0 %vm1057_vm3, %v13374_v18 }
 0x1ac   : > { %1282 = vmatprep.mubr.f32.mxu0 %v12916_v26 }
 0x1ae   : > { %1691 = vrot.lane.b32.xlu1 %v13340_v11, %s12919_s21 }
 0x1af   : > { %4213 = vrot.lane.b32.xlu0 %v13260_v9, %s12926_s28 }
 0x1b2   : > { %3855 = vrot.lane.b32.xlu1 %v13254_v8, %s12925_s27 }
 0x1b3   : > { %4567 = vrot.lane.b32.xlu0 %v13239_v58, %s12927_s13 }
 0x1b6   : > { %4569 = vrot.lane.b32.xlu1 %v13237_v55, %s12927_s13 }
 0x1b7   : > { %4565 = vrot.lane.b32.xlu0 %v13245_v59, %s12927_s13 }
 0x1ba   : > { %1699 = vrot.lane.b32.xlu1 %v12916_v26, %s12919_s21  ;;  %s12930_s21 = smov 85  }
 0x1bb   : > { %4573 = vrot.lane.b32.xlu0 %v13260_v9, %s12927_s13 }
 0x1bc   : > { %v13399_v19 = vpop.permute.xlu1 %1038 }
 0x1bd   : > { %v1037_v20 = vpop.permute.xlu0 %1036 }
 0x1be   : > { %4577 = vrot.lane.b32.xlu1 %v13251_v4, %s12927_s13  ;;  %v1048_v21 = vsel %vm1042_vm2, %v1037_v20, %v13399_v19 }
 0x1bf   : > { %4927 = vrot.lane.b32.xlu0 %v13239_v58, %s12928_s18  ;;  %1218 = vmatprep.subr.mxu0 %v1048_v21 }
 0x1c0   : > { %v1688_v22 = vpop.permute.xlu1 %1687 }
 0x1c1   : > { %v13407_v23 = vpop.permute.xlu0 %1034 }
 0x1c2   : > { %2051 = vrot.lane.b32.xlu1 %v13340_v11, %s12920_s22  ;;  %v1047_v24 = vsel %vm1042_vm2, %v13407_v23, %v1037_v20 }
 0x1c3   : > { %4215 = vrot.lane.b32.xlu0 %v13254_v8, %s12926_s28  ;;  %1219 = vmatpush1.msra.mxu0 %v1047_v24  ;;  %v13622_v24 = vld [vmem:[%s15663_s3 + $0x48] sm:$0xff] }
 0x1c4   : > { %11539 = vmatmul.mubr.msk.f32.vlgmr.msra.gmra.mrb[12].mxu0 %vm1057_vm3, %v13361_v16  ;;  %1376 = vmatprep.subr.mxu0 %v13239_v58  ;;  %v1686_v25 = vpop.permute.xlu1 %1685 }
 0x1c5   : > { %v13418_v27 = vpop.permute.xlu0 %1689  ;;  %1377 = vmatpush1.msra.mxu0 %v13245_v59  ;;  %1288 = vmatprep.mubr.f32.mxu0 %v12916_v26  ;;  %v1702_v37 = vsel %vm1701_vm4, %v1686_v25, %v1688_v22 }
 0x1c6   : > { %4929 = vrot.lane.b32.xlu1 %v13237_v55, %s12928_s18  ;;  %1530 = vmatprep.subr.mxu0 %v13254_v8  ;;  %v1703_v33 = vsel %vm1701_vm4, %v1688_v22, %v13418_v27 }
 0x1c7   : > { %4925 = vrot.lane.b32.xlu0 %v13245_v59, %s12928_s18 }
 0x1c8   : > { %11540 = vmatmul.mubr.msk.f32.gmra.mrb[14].mxu0 %vm1057_vm3, %v13374_v18  ;;  %v13429_v28 = vpop.permute.xlu1 %1697 }
 0x1c9   : > { %v1696_v29 = vpop.permute.xlu0 %1695  ;;  %1440 = vmatprep.mubr.f32.mxu0 %v12916_v26 }
 0x1ca   : > { %2059 = vrot.lane.b32.xlu1 %v12916_v26, %s12920_s22  ;;  %s12929_s22 = smov 86   ;;  %v1707_v40 = vsel %vm1701_vm4, %v1696_v29, %v13429_v28 }
 0x1cb   : > { %2411 = vrot.lane.b32.xlu0 %v13340_v11, %s12921_s23 }
 0x1cc   : > { %11543 = vmatmul.mubr.msk.f32.vlgmr.msra.gmra.mrb[8].mxu0 %vm1057_vm3, %v13435_v30  ;;  %v2048_v31 = vpop.permute.xlu1 %2047 }
 0x1cd   : > { %1531 = vmatpush1.msra.mxu0 %v13260_v9  ;;  %v13444_v32 = vpop.permute.xlu0 %1693  ;;  %1446 = vmatprep.mubr.f32.mxu0 %v12916_v26 }
 0x1ce   : > { %1722 = vmatprep.subr.mxu0 %v1703_v33  ;;  %4933 = vrot.lane.b32.xlu1 %v13260_v9, %s12928_s18  ;;  %v1706_v44 = vsel %vm1701_vm4, %v13444_v32, %v1696_v29 }
 0x1cf   : > { %4937 = vrot.lane.b32.xlu0 %v13251_v4, %s12928_s18 }
 0x1d0   : > { %11544 = vmatmul.mubr.msk.f32.gmra.mrb[10].mxu0 %vm1057_vm3, %v13452_v34  ;;  %v2046_v35 = vpop.permute.xlu1 %2045 }
 0x1d1   : > { %v13460_v36 = vpop.permute.xlu0 %2049  ;;  %1594 = vmatprep.mubr.f32.mxu0 %v12916_v26  ;;  %v2062_v51 = vsel %vm2061_vm5, %v2046_v35, %v2048_v31 }
 0x1d2   : > { %5287 = vrot.lane.b32.xlu1 %v13239_v58, %s12929_s22  ;;  %v2063_v47 = vsel %vm2061_vm5, %v2048_v31, %v13460_v36 }
 0x1d3   : > { %4575 = vrot.lane.b32.xlu0 %v13254_v8, %s12927_s13 }
 0x1d4   : > { %11547 = vmatmul.mubr.msk.f32.vlgmr.msra.gmra.mrb[12].mxu0 %vm1057_vm3, %v13435_v30  ;;  %v13470_v38 = vpop.permute.xlu1 %2057 }
 0x1d5   : > { %1723 = vmatpush1.msra.mxu0 %v1702_v37  ;;  %v2056_v39 = vpop.permute.xlu0 %2055  ;;  %1600 = vmatprep.mubr.f32.mxu0 %v12916_v26 }
 0x1d6   : > { %1876 = vmatprep.subr.mxu0 %v1707_v40  ;;  %5285 = vrot.lane.b32.xlu1 %v13245_v59, %s12929_s22  ;;  %v2067_v54 = vsel %vm2061_vm5, %v2056_v39, %v13470_v38 }
 0x1d7   : > { %2419 = vrot.lane.b32.xlu0 %v12916_v26, %s12921_s23 }
 0x1d8   : > { %11548 = vmatmul.mubr.msk.f32.gmra.mrb[14].mxu0 %vm1057_vm3, %v13452_v34  ;;  %v2408_v41 = vpop.permute.xlu1 %2407 }
 0x1d9   : > { %v13481_v42 = vpop.permute.xlu0 %2053  ;;  %1786 = vmatprep.mubr.f32.mxu0 %v12916_v26 }
 0x1da   : > { %5293 = vrot.lane.b32.xlu1 %v13260_v9, %s12929_s22  ;;  %v2066_v61 = vsel %vm2061_vm5, %v13481_v42, %v2056_v39 }
 0x1db   : > { %5289 = vrot.lane.b32.xlu0 %v13237_v55, %s12929_s22 }
 0x1dc   : > { %11553 = vmatmul.mubr.msk.f32.vlgmr.msra.gmra.mrb[8].mxu0 %vm1057_vm3, %v13487_v43  ;;  %v2406_v45 = vpop.permute.xlu1 %2405 }
 0x1dd   : > { %1877 = vmatpush1.msra.mxu0 %v1706_v44  ;;  %v13497_v46 = vpop.permute.xlu0 %2409  ;;  %1792 = vmatprep.mubr.f32.mxu0 %v12916_v26  ;;  %v2422_v5 = vsel %vm2421_vm6, %v2406_v45, %v2408_v41 }
 0x1de   : > { %2082 = vmatprep.subr.mxu0 %v2063_v47  ;;  %3131 = vrot.lane.b32.xlu1 %v13340_v11, %s12923_s25  ;;  %v2423_v0 = vsel %vm2421_vm6, %v2408_v41, %v13497_v46  ;;  %v13664_v41 = vld [vmem:[%s15663_s3 + $0x50] sm:$0xff] }
 0x1df   : > { %2771 = vrot.lane.b32.xlu0 %v13340_v11, %s12922_s24 }
 0x1e0   : > { %11554 = vmatmul.mubr.msk.f32.gmra.mrb[10].mxu0 %vm1057_vm3, %v13505_v48  ;;  %v13513_v49 = vpop.permute.xlu1 %2417 }
 0x1e1   : > { %v13515_v50 = vpop.permute.xlu0 %2413  ;;  %1940 = vmatprep.mubr.f32.mxu0 %v12916_v26 }
 0x1e2   : > { %4935 = vrot.lane.b32.xlu1 %v13254_v8, %s12928_s18 }
 0x1e3   : > { %5297 = vrot.lane.b32.xlu0 %v13251_v4, %s12929_s22 }
 0x1e4   : > { %11557 = vmatmul.mubr.msk.f32.vlgmr.msra.gmra.mrb[12].mxu0 %vm1057_vm3, %v13487_v43  ;;  %v13525_v52 = vpop.permute.xlu1 %2767 }
 0x1e5   : > { %2083 = vmatpush1.msra.mxu0 %v2062_v51  ;;  %v2416_v53 = vpop.permute.xlu0 %2415  ;;  %1946 = vmatprep.mubr.f32.mxu0 %v12916_v26 }
 0x1e6   : > { %2236 = vmatprep.subr.mxu0 %v2067_v54  ;;  %5649 = vrot.lane.b32.xlu1 %v13237_v55, %s12930_s21  ;;  %v2427_v10 = vsel %vm2421_vm6, %v2416_v53, %v13513_v49  ;;  %v2426_v17 = vsel %vm2421_vm6, %v13515_v50, %v2416_v53 }
 0x1e7   : > { %2779 = vrot.lane.b32.xlu0 %v12916_v26, %s12922_s24  ;;  %s12934_s24 = smov 78  }
 0x1e8   : > { %11558 = vmatmul.mubr.msk.f32.gmra.mrb[14].mxu0 %vm1057_vm3, %v13505_v48  ;;  %v2766_v56 = vpop.permute.xlu1 %2765 }
 0x1e9   : > { %v13536_v57 = vpop.permute.xlu0 %2769  ;;  %2146 = vmatprep.mubr.f32.mxu0 %v12916_v26  ;;  %v2782_v31 = vsel %vm2781_vm7, %v2766_v56, %v13525_v52 }
 0x1ea   : > { %3139 = vrot.lane.b32.xlu1 %v12916_v26, %s12923_s25  ;;  %v2783_v22 = vsel %vm2781_vm7, %v13525_v52, %v13536_v57  ;;  %v13683_v52 = vld [vmem:[%s15663_s3 + $0x58] sm:$0xff]  ;;  %s12938_s25 = smov 50  }
 0x1eb   : > { %5647 = vrot.lane.b32.xlu0 %v13239_v58, %s12930_s21 }
 0x1ec   : > { %11563 = vmatmul.mubr.msk.f32.vlgmr.msra.gmra.mrb[8].mxu0 %vm1057_vm3, %v13542_v60  ;;  %v13552_v62 = vpop.permute.xlu1 %2777 }
 0x1ed   : > { %2237 = vmatpush1.msra.mxu0 %v2066_v61  ;;  %v13554_v63 = vpop.permute.xlu0 %2773  ;;  %2152 = vmatprep.mubr.f32.mxu0 %v12916_v26 }
 0x1ee   : > { %2442 = vmatprep.subr.mxu0 %v2423_v0  ;;  %5657 = vrot.lane.b32.xlu1 %v13251_v4, %s12930_s21 }
 0x1ef   : > { %5645 = vrot.lane.b32.xlu0 %v13245_v59, %s12930_s21 }
 0x1f0   : > { %11564 = vmatmul.mubr.msk.f32.gmra.mrb[10].mxu0 %vm1057_vm3, %v13562_v1  ;;  %v13570_v2 = vpop.permute.xlu1 %3127 }
 0x1f1   : > { %v13572_v3 = vpop.permute.xlu0 %3129  ;;  %2300 = vmatprep.mubr.f32.mxu0 %v12916_v26 }
 0x1f2   : > { %5295 = vrot.lane.b32.xlu1 %v13254_v8, %s12929_s22  ;;  %v3143_v51 = vsel %vm3141_vm8, %v13570_v2, %v13572_v3 }
 0x1f3   : > { %5653 = vrot.lane.b32.xlu0 %v13260_v9, %s12930_s21 }
 0x1f4   : > { %11567 = vmatmul.mubr.msk.f32.vlgmr.msra.gmra.mrb[12].mxu0 %vm1057_vm3, %v13542_v60  ;;  %v13582_v6 = vpop.permute.xlu1 %3125 }
 0x1f5   : > { %2443 = vmatpush1.msra.mxu0 %v2422_v5  ;;  %v2776_v7 = vpop.permute.xlu0 %2775  ;;  %2306 = vmatprep.mubr.f32.mxu0 %v12916_v26 }
 0x1f6   : > { %2596 = vmatprep.subr.mxu0 %v2427_v10  ;;  %3491 = vrot.lane.b32.xlu1 %v13340_v11, %s12924_s26  ;;  %v2787_v37 = vsel %vm2781_vm7, %v2776_v7, %v13552_v62  ;;  %v2786_v44 = vsel %vm2781_vm7, %v13554_v63, %v2776_v7  ;;  %v13736_v7 = vld [vmem:[%s15663_s3 + $0x60] sm:$0xff] }
 0x1f7   : > { %6007 = vrot.lane.b32.xlu0 %v13239_v58, %s12931_s11 }
 0x1f8   : > { %11568 = vmatmul.mubr.msk.f32.gmra.mrb[14].mxu0 %vm1057_vm3, %v13562_v1  ;;  %v13593_v13 = vpop.permute.xlu1 %3137 }
 0x1f9   : > { %v13595_v14 = vpop.permute.xlu0 %3133  ;;  %2506 = vmatprep.mubr.f32.mxu0 %v12916_v26 }
 0x1fa   : > { %6009 = vrot.lane.b32.xlu1 %v13237_v55, %s12931_s11 }
 0x1fb   : > { %6005 = vrot.lane.b32.xlu0 %v13245_v59, %s12931_s11 }
 0x1fc   : > { %11573 = vmatmul.mubr.msk.f32.vlgmr.msra.gmra.mrb[8].mxu0 %vm1057_vm3, %v13601_v15  ;;  %v13611_v20 = vpop.permute.xlu1 %3487 }
 0x1fd   : > { %2597 = vmatpush1.msra.mxu0 %v2426_v17  ;;  %v13613_v21 = vpop.permute.xlu0 %3489  ;;  %2512 = vmatprep.mubr.f32.mxu0 %v12916_v26 }
 0x1fe   : > { %2802 = vmatprep.subr.mxu0 %v2783_v22  ;;  %3499 = vrot.lane.b32.xlu1 %v12916_v26, %s12924_s26  ;;  %s12932_s26 = smov 80  }
 0x1ff   : > { %3851 = vrot.lane.b32.xlu0 %v13340_v11, %s12925_s27 }
 0x200   : > { %11574 = vmatmul.mubr.msk.f32.gmra.mrb[10].mxu0 %vm1057_vm3, %v13622_v24  ;;  %v13630_v25 = vpop.permute.xlu1 %3485 }
 0x201   : > { %v13632_v29 = vpop.permute.xlu0 %3493  ;;  %2660 = vmatprep.mubr.f32.mxu0 %v12916_v26 }
 0x202   : > { %6013 = vrot.lane.b32.xlu1 %v13260_v9, %s12931_s11 }
 0x203   : > { %5655 = vrot.lane.b32.xlu0 %v13254_v8, %s12930_s21 }
 0x204   : > { %11577 = vmatmul.mubr.msk.f32.vlgmr.msra.gmra.mrb[12].mxu0 %vm1057_vm3, %v13601_v15  ;;  %v13643_v33 = vpop.permute.xlu1 %3497 }
 0x205   : > { %2803 = vmatpush1.msra.mxu0 %v2782_v31  ;;  %v13645_v35 = vpop.permute.xlu0 %3135  ;;  %2666 = vmatprep.mubr.f32.mxu0 %v12916_v26  ;;  %v13765_v31 = vld [vmem:[%s15663_s3 + $0x68] sm:$0xff] }
 0x206   : > { %2956 = vmatprep.subr.mxu0 %v2787_v37  ;;  %6367 = vrot.lane.b32.xlu1 %v13239_v58, %s12932_s26  ;;  %v3147_v5 = vsel %vm3141_vm8, %v13645_v35, %v13593_v13 }
 0x207   : > { %6017 = vrot.lane.b32.xlu0 %v13251_v4, %s12931_s11 }
 0x208   : > { %11578 = vmatmul.mubr.msk.f32.gmra.mrb[14].mxu0 %vm1057_vm3, %v13622_v24  ;;  %v13656_v39 = vpop.permute.xlu1 %3847 }
 0x209   : > { %v13658_v40 = vpop.permute.xlu0 %3849  ;;  %2866 = vmatprep.mubr.f32.mxu0 %v12916_v26 }
 0x20a   : > { %6365 = vrot.lane.b32.xlu1 %v13245_v59, %s12932_s26 }
 0x20b   : > { %3859 = vrot.lane.b32.xlu0 %v12916_v26, %s12925_s27 }
 0x20c   : > { %11583 = vmatmul.mubr.msk.f32.vlgmr.msra.gmra.mrb[8].mxu0 %vm1057_vm3, %v13664_v41  ;;  %v13674_v45 = vpop.permute.xlu1 %3845 }
 0x20d   : > { %2957 = vmatpush1.msra.mxu0 %v2786_v44  ;;  %v1033_v47 = vpop.permute.xlu0 %1032  ;;  %2872 = vmatprep.mubr.f32.mxu0 %v12916_v26 }
 0x20e   : > { %3162 = vmatprep.subr.mxu0 %v3143_v51  ;;  %6373 = vrot.lane.b32.xlu1 %v13260_v9, %s12932_s26  ;;  %v1046_v53 = vsel %vm1042_vm2, %v1033_v47, %v13407_v23  ;;  %v1045_v54 = vsel %vm1042_vm2, %v13350_v12, %v1033_v47  ;;  %v3142_v12 = vsel %vm3141_vm8, %v13582_v6, %v13570_v2 }
 0x20f   : > { %1141 = vmatprep.subr.mxu1 %v1046_v53  ;;  %6369 = vrot.lane.b32.xlu0 %v13237_v55, %s12932_s26  ;;  %v3502_v47 = vsel %vm3501_vm9, %v13630_v25, %v13611_v20 }
 0x210   : > { %1142 = vmatpush1.msra.mxu1 %v1045_v54  ;;  %11584 = vmatmul.mubr.msk.f32.gmra.mrb[10].mxu0 %vm1057_vm3, %v13683_v52  ;;  %v13695_v56 = vpop.permute.xlu1 %3853  ;;  %v13823_v54 = vld [vmem:[%s15663_s3 + $0x70] sm:$0xff] }
 0x211   : > { %v13697_v61 = vpop.permute.xlu0 %3857  ;;  %3020 = vmatprep.mubr.f32.mxu0 %v12916_v26  ;;  %11537 = vmatmul.mubr.msk.f32.vlgmr.msra.gmra.mrb[8].mxu1 %vm1057_vm3, %v13361_v16 }
 0x212   : > { %6015 = vrot.lane.b32.xlu1 %v13254_v8, %s12931_s11  ;;  %1211 = vmatprep.mubr.f32.mxu1 %v12916_v26 }
 0x213   : > { %4211 = vrot.lane.b32.xlu0 %v13340_v11, %s12926_s28 }
 0x214   : > { %11587 = vmatmul.mubr.msk.f32.vlgmr.msra.gmra.mrb[12].mxu0 %vm1057_vm3, %v13664_v41  ;;  %v13712_v23 = vpop.permute.xlu1 %4207 }
 0x215   : > { %3163 = vmatpush1.msra.mxu0 %v3142_v12  ;;  %v13714_v0 = vpop.permute.xlu0 %3495  ;;  %3026 = vmatprep.mubr.f32.mxu0 %v12916_v26 }
 0x216   : > { %3316 = vmatprep.subr.mxu0 %v3147_v5  ;;  %4571 = vrot.lane.b32.xlu1 %v13340_v11, %s12927_s13  ;;  %v3507_v51 = vsel %vm3501_vm9, %v13714_v0, %v13643_v33  ;;  %v3506_v12 = vsel %vm3501_vm9, %v13632_v29, %v13714_v0  ;;  %v3863_v5 = vsel %vm3861_vm10, %v13656_v39, %v13658_v40 }
 0x217   : > { %6377 = vrot.lane.b32.xlu0 %v13251_v4, %s12932_s26  ;;  %11538 = vmatmul.mubr.msk.f32.gmra.mrb[10].mxu1 %vm1057_vm3, %v13374_v18 }
 0x218   : > { %11588 = vmatmul.mubr.msk.f32.gmra.mrb[14].mxu0 %vm1057_vm3, %v13683_v52  ;;  %v13728_v2 = vpop.permute.xlu1 %4205  ;;  %12065 = vmatprep.mubr.msk.f32.mxu1 %vm1057_vm3, %v13361_v16  ;;  %v3146_v16 = vsel %vm3141_vm8, %v13595_v14, %v13645_v35 }
 0x219   : > { %v1041_v6 = vpop.permute.xlu0 %1040  ;;  %3226 = vmatprep.mubr.f32.mxu0 %v12916_v26 }
 0x21a   : > { %6729 = vrot.lane.b32.xlu1 %v13237_v55, %s12933_s19  ;;  %v1049_v10 = vsel %vm1042_vm2, %v13399_v19, %v1041_v6  ;;  %v3503_v19 = vsel %vm3501_vm9, %v13611_v20, %v13613_v21  ;;  %vm6381_vm2 = vcmask 654336  }
 0x21b   : > { %4219 = vrot.lane.b32.xlu0 %v12916_v26, %s12926_s28  ;;  %12063 = vmatprep.subr.mxu1 %v1049_v10  ;;  %s12937_s28 = smov 54  }
 0x21c   : > { %12064 = vmatpush3.msra.mxu1 %v1049_v10  ;;  %11593 = vmatmul.mubr.msk.f32.vlgmr.msra.gmra.mrb[8].mxu0 %vm1057_vm3, %v13736_v7  ;;  %v13749_v17 = vpop.permute.xlu1 %4217 }
 0x21d   : > { %3317 = vmatpush1.msra.mxu0 %v3146_v16  ;;  %v13751_v22 = vpop.permute.xlu0 %4209  ;;  %12066 = vmatmul.mubr.msk.f32.vlgmr.msra.gmra.mrb[12].mxu1 %vm1057_vm3, %v13374_v18 }
 0x21e   : > { %1453 = vmatprep.subr.mxu1 %v13340_v11  ;;  %3522 = vmatprep.subr.mxu0 %v3503_v19 }
 0x21f   : > { %1454 = vmatpush1.msra.mxu1 %v13237_v55  ;;  %4579 = vrot.lane.b32.xlu1 %v12916_v26, %s12927_s13 }
 0x220   : > { %6727 = vrot.lane.b32.xlu0 %v13239_v58, %s12933_s19  ;;  %12068 = vmatprep.subr.mxu1 %v13251_v4  ;;  %v1692_v18 = vpop.permute.xlu1 %1691 }
 0x221   : > { %3232 = vmatprep.mubr.f32.mxu0 %v12916_v26  ;;  %1517 = vmatprep.mubr.f32.mxu1 %v12916_v26  ;;  %v13772_v35 = vpop.permute.xlu0 %4213  ;;  %v1705_v37 = vsel %vm1701_vm4, %v1692_v18, %v13444_v32  ;;  %v1704_v25 = vsel %vm1701_vm4, %v13418_v27, %v1692_v18  ;;  %v3862_v18 = vsel %vm3861_vm10, %v13674_v45, %v13656_v39 }
 0x222   : > { %11594 = vmatmul.mubr.msk.f32.gmra.mrb[10].mxu0 %vm1057_vm3, %v13765_v31  ;;  %11545 = vmatmul.mubr.msk.f32.vlgmr.msra.gmra.mrb[8].mxu1 %vm1057_vm3, %v13435_v30 }
 0x223   : > { %12069 = vmatpush3.msra.mxu1 %v13251_v4  ;;  %6375 = vrot.lane.b32.xlu1 %v13254_v8, %s12932_s26 }
 0x224   : > { %1799 = vmatprep.subr.mxu1 %v1705_v37  ;;  %6725 = vrot.lane.b32.xlu0 %v13245_v59, %s12933_s19  ;;  %v13785_v44 = vpop.permute.xlu1 %3855 }
 0x225   : > { %3380 = vmatprep.mubr.f32.mxu0 %v12916_v26  ;;  %1523 = vmatprep.mubr.f32.mxu1 %v12916_v26  ;;  %v13789_v32 = vpop.permute.xlu0 %4567 }
 0x226   : > { %11597 = vmatmul.mubr.msk.f32.vlgmr.msra.gmra.mrb[12].mxu0 %vm1057_vm3, %v13736_v7  ;;  %11546 = vmatmul.mubr.msk.f32.gmra.mrb[10].mxu1 %vm1057_vm3, %v13452_v34 }
 0x227   : > { %3523 = vmatpush1.msra.mxu0 %v3502_v47  ;;  %6737 = vrot.lane.b32.xlu1 %v13251_v4, %s12933_s19 }
 0x228   : > { %3676 = vmatprep.subr.mxu0 %v3507_v51  ;;  %6733 = vrot.lane.b32.xlu0 %v13260_v9, %s12933_s19  ;;  %v13805_v53 = vpop.permute.xlu1 %4569  ;;  %v3866_v51 = vsel %vm3861_vm10, %v13695_v56, %v13785_v44 }
 0x229   : > { %3386 = vmatprep.mubr.f32.mxu0 %v12916_v26  ;;  %12070 = vmatprep.mubr.msk.f32.mxu1 %vm1057_vm3, %v13435_v30  ;;  %v13810_v20 = vpop.permute.xlu0 %4565 }
 0x22a   : > { %11598 = vmatmul.mubr.msk.f32.gmra.mrb[14].mxu0 %vm1057_vm3, %v13765_v31  ;;  %12071 = vmatmul.mubr.msk.f32.vlgmr.msra.gmra.mrb[12].mxu1 %vm1057_vm3, %v13452_v34 }
 0x22b   : > { %1800 = vmatpush1.msra.mxu1 %v1704_v25  ;;  %4931 = vrot.lane.b32.xlu1 %v13340_v11, %s12928_s18 }
 0x22c   : > { %7087 = vrot.lane.b32.xlu0 %v13239_v58, %s12934_s24  ;;  %3586 = vmatprep.mubr.f32.mxu0 %v12916_v26  ;;  %v1700_v30 = vpop.permute.xlu1 %1699 }
 0x22d   : > { %1863 = vmatprep.mubr.f32.mxu1 %v12916_v26  ;;  %v13829_v27 = vpop.permute.xlu0 %4573  ;;  %v1708_v34 = vsel %vm1701_vm4, %v13429_v28, %v1700_v30  ;;  %v13848_v28 = vld [vmem:[%s15663_s3 + $0x78] sm:$0xff]  ;;  %vm6741_vm4 = vcmask 646144  }
 0x22e   : > { %11603 = vmatmul.mubr.msk.f32.vlgmr.msra.gmra.mrb[8].mxu0 %vm1057_vm3, %v13823_v54  ;;  %11555 = vmatmul.mubr.msk.f32.vlgmr.msra.gmra.mrb[8].mxu1 %vm1057_vm3, %v13487_v43 }
 0x22f   : > { %3677 = vmatpush1.msra.mxu0 %v3506_v12  ;;  %7089 = vrot.lane.b32.xlu1 %v13237_v55, %s12934_s24 }
 0x230   : > { %3882 = vmatprep.subr.mxu0 %v3863_v5  ;;  %12073 = vmatprep.subr.mxu1 %v1708_v34  ;;  %v13850_v6 = vpop.permute.xlu1 %4577 }
 0x231   : > { %7085 = vrot.lane.b32.xlu0 %v13245_v59, %s12934_s24  ;;  %12074 = vmatpush3.msra.mxu1 %v1708_v34  ;;  %v13854_v0 = vpop.permute.xlu0 %4927 }
 0x232   : > { %3592 = vmatprep.mubr.f32.mxu0 %v12916_v26  ;;  %1869 = vmatprep.mubr.f32.mxu1 %v12916_v26 }
 0x233   : > { %11604 = vmatmul.mubr.msk.f32.gmra.mrb[10].mxu0 %vm1057_vm3, %v13848_v28  ;;  %11556 = vmatmul.mubr.msk.f32.gmra.mrb[10].mxu1 %vm1057_vm3, %v13505_v48 }
 0x234   : > { %4939 = vrot.lane.b32.xlu1 %v12916_v26, %s12928_s18  ;;  %3740 = vmatprep.mubr.f32.mxu0 %v12916_v26  ;;  %v2052_v10 = vpop.permute.xlu1 %2051  ;;  %s12935_s18 = smov 56  }
 0x235   : > { %6735 = vrot.lane.b32.xlu0 %v13254_v8, %s12933_s19  ;;  %12075 = vmatprep.mubr.msk.f32.mxu1 %vm1057_vm3, %v13487_v43  ;;  %v13869_v16 = vpop.permute.xlu0 %4215  ;;  %v2065_v19 = vsel %vm2061_vm5, %v2052_v10, %v13481_v42  ;;  %v2064_v37 = vsel %vm2061_vm5, %v13460_v36, %v2052_v10  ;;  %v3867_v43 = vsel %vm3861_vm10, %v13785_v44, %v13697_v61  ;;  %v13904_v36 = vld [vmem:[%s15663_s3 + $0x80] sm:$0xff]  ;;  %v13931_v44 = vld [vmem:[%s15663_s3 + $0x88] sm:$0xff] }
 0x236   : > { %2159 = vmatprep.subr.mxu1 %v2065_v19  ;;  %v13986_v19 = vld [vmem:[%s15663_s3 + $0x90] sm:$0xff] }
 0x237   : > { %11607 = vmatmul.mubr.msk.f32.vlgmr.msra.gmra.mrb[12].mxu0 %vm1057_vm3, %v13823_v54  ;;  %12076 = vmatmul.mubr.msk.f32.vlgmr.msra.gmra.mrb[12].mxu1 %vm1057_vm3, %v13505_v48 }
 0x238   : > { %3883 = vmatpush1.msra.mxu0 %v3862_v18  ;;  %7093 = vrot.lane.b32.xlu1 %v13260_v9, %s12934_s24  ;;  %v13887_v42 = vpop.permute.xlu1 %4929  ;;  %v4226_v18 = vsel %vm4221_vm11, %v13772_v35, %v13869_v16 }
 0x239   : > { %4036 = vmatprep.subr.mxu0 %v3867_v43  ;;  %5291 = vrot.lane.b32.xlu0 %v13340_v11, %s12929_s22  ;;  %v13891_v39 = vpop.permute.xlu0 %4925  ;;  %v4583_v43 = vsel %vm4581_vm12, %v13789_v32, %v13805_v53 }
 0x23a   : > { %2160 = vmatpush1.msra.mxu1 %v2064_v37  ;;  %3746 = vmatprep.mubr.f32.mxu0 %v12916_v26 }
 0x23b   : > { %2223 = vmatprep.mubr.f32.mxu1 %v12916_v26  ;;  %11608 = vmatmul.mubr.msk.f32.gmra.mrb[14].mxu0 %vm1057_vm3, %v13848_v28 }
 0x23c   : > { %11565 = vmatmul.mubr.msk.f32.vlgmr.msra.gmra.mrb[8].mxu1 %vm1057_vm3, %v13542_v60  ;;  %7447 = vrot.lane.b32.xlu1 %v13239_v58, %s12935_s18  ;;  %v2060_v48 = vpop.permute.xlu1 %2059 }
 0x23d   : > { %7097 = vrot.lane.b32.xlu0 %v13251_v4, %s12934_s24  ;;  %3946 = vmatprep.mubr.f32.mxu0 %v12916_v26  ;;  %v2412_v45 = vpop.permute.xlu0 %2411  ;;  %v2068_v47 = vsel %vm2061_vm5, %v13470_v38, %v2060_v48  ;;  %v4223_v38 = vsel %vm4221_vm11, %v13712_v23, %v13751_v22  ;;  %v14009_v48 = vld [vmem:[%s15663_s3 + $0x98] sm:$0xff]  ;;  %vm7101_vm5 = vcmask 637952  }
 0x23e   : > { %2229 = vmatprep.mubr.f32.mxu1 %v12916_v26  ;;  %12078 = vmatprep.subr.mxu1 %v2068_v47  ;;  %v2425_v25 = vsel %vm2421_vm6, %v2412_v45, %v13515_v50  ;;  %v2424_v50 = vsel %vm2421_vm6, %v13497_v46, %v2412_v45 }
 0x23f   : > { %11613 = vmatmul.mubr.msk.f32.vlgmr.msra.gmra.mrb[8].mxu0 %vm1057_vm3, %v13904_v36  ;;  %12079 = vmatpush3.msra.mxu1 %v2068_v47 }
 0x240   : > { %4037 = vmatpush1.msra.mxu0 %v3866_v51  ;;  %11566 = vmatmul.mubr.msk.f32.gmra.mrb[10].mxu1 %vm1057_vm3, %v13562_v1  ;;  %v13924_v30 = vpop.permute.xlu1 %4933 }
 0x241   : > { %4242 = vmatprep.subr.mxu0 %v4223_v38  ;;  %7445 = vrot.lane.b32.xlu1 %v13245_v59, %s12935_s18  ;;  %v13933_v34 = vpop.permute.xlu0 %4937 }
 0x242   : > { %5299 = vrot.lane.b32.xlu0 %v12916_v26, %s12929_s22  ;;  %3952 = vmatprep.mubr.f32.mxu0 %v12916_v26 }
 0x243   : > { %12080 = vmatprep.mubr.msk.f32.mxu1 %vm1057_vm3, %v13542_v60  ;;  %2519 = vmatprep.subr.mxu1 %v2425_v25  ;;  %v4222_v60 = vsel %vm4221_vm11, %v13728_v2, %v13712_v23  ;;  %v14061_v25 = vld [vmem:[%s15663_s3 + $0xa0] sm:$0xff] }
 0x244   : > { %11614 = vmatmul.mubr.msk.f32.gmra.mrb[10].mxu0 %vm1057_vm3, %v13931_v44  ;;  %12081 = vmatmul.mubr.msk.f32.vlgmr.msra.gmra.mrb[12].mxu1 %vm1057_vm3, %v13562_v1  ;;  %v13946_v12 = vpop.permute.xlu1 %5287  ;;  %v4227_v1 = vsel %vm4221_vm11, %v13869_v16, %v13749_v17 }
 0x245   : > { %2520 = vmatpush1.msra.mxu1 %v2424_v50  ;;  %7095 = vrot.lane.b32.xlu1 %v13254_v8, %s12934_s24  ;;  %v13950_v5 = vpop.permute.xlu0 %4575 }
 0x246   : > { %7449 = vrot.lane.b32.xlu0 %v13237_v55, %s12935_s18  ;;  %4100 = vmatprep.mubr.f32.mxu0 %v12916_v26  ;;  %v4587_v51 = vsel %vm4581_vm12, %v13950_v5, %v13850_v6  ;;  %v4586_v50 = vsel %vm4581_vm12, %v13829_v27, %v13950_v5 }
 0x247   : > { %2583 = vmatprep.mubr.f32.mxu1 %v12916_v26 }
 0x248   : > { %11617 = vmatmul.mubr.msk.f32.vlgmr.msra.gmra.mrb[12].mxu0 %vm1057_vm3, %v13904_v36  ;;  %v13961_v46 = vpop.permute.xlu1 %5285  ;;  %11575 = vmatmul.mubr.msk.f32.vlgmr.msra.gmra.mrb[8].mxu1 %vm1057_vm3, %v13601_v15 }
 0x249   : > { %4243 = vmatpush1.msra.mxu0 %v4222_v60  ;;  %7453 = vrot.lane.b32.xlu1 %v13260_v9, %s12935_s18  ;;  %v2420_v10 = vpop.permute.xlu0 %2419 }
 0x24a   : > { %4396 = vmatprep.subr.mxu0 %v4227_v1  ;;  %5651 = vrot.lane.b32.xlu0 %v13340_v11, %s12930_s21  ;;  %v2428_v23 = vsel %vm2421_vm6, %v13513_v49, %v2420_v10  ;;  %vm7461_vm6 = vcmask 457728  }
 0x24b   : > { %4106 = vmatprep.mubr.f32.mxu0 %v12916_v26  ;;  %12083 = vmatprep.subr.mxu1 %v2428_v23 }
 0x24c   : > { %11618 = vmatmul.mubr.msk.f32.gmra.mrb[14].mxu0 %vm1057_vm3, %v13931_v44  ;;  %2589 = vmatprep.mubr.f32.mxu1 %v12916_v26  ;;  %v13978_v2 = vpop.permute.xlu1 %5293 }
 0x24d   : > { %6011 = vrot.lane.b32.xlu1 %v13340_v11, %s12931_s11  ;;  %4306 = vmatprep.mubr.f32.mxu0 %v12916_v26  ;;  %v13988_v49 = vpop.permute.xlu0 %5289 }
 0x24e   : > { %7457 = vrot.lane.b32.xlu0 %v13251_v4, %s12935_s18  ;;  %12084 = vmatpush3.msra.mxu1 %v2428_v23 }
 0x24f   : > { %11576 = vmatmul.mubr.msk.f32.gmra.mrb[10].mxu1 %vm1057_vm3, %v13622_v24 }
 0x250   : > { %11623 = vmatmul.mubr.msk.f32.vlgmr.msra.gmra.mrb[8].mxu0 %vm1057_vm3, %v13986_v19  ;;  %12085 = vmatprep.mubr.msk.f32.mxu1 %vm1057_vm3, %v13601_v15  ;;  %v3132_v37 = vpop.permute.xlu1 %3131 }
 0x251   : > { %4397 = vmatpush1.msra.mxu0 %v4226_v18  ;;  %7809 = vrot.lane.b32.xlu1 %v13237_v55, %s12936_s30  ;;  %v2772_v45 = vpop.permute.xlu0 %2771  ;;  %v3145_v60 = vsel %vm3141_vm8, %v3132_v37, %v13595_v14  ;;  %v3144_v14 = vsel %vm3141_vm8, %v13572_v3, %v3132_v37  ;;  %v4942_v18 = vsel %vm4941_vm13, %v13891_v39, %v13854_v0 }
 0x252   : > { %4602 = vmatprep.subr.mxu0 %v4583_v43  ;;  %5659 = vrot.lane.b32.xlu0 %v12916_v26, %s12930_s21  ;;  %v2785_v15 = vsel %vm2781_vm7, %v2772_v45, %v13554_v63  ;;  %v2784_v16 = vsel %vm2781_vm7, %v13536_v57, %v2772_v45  ;;  %v4582_v57 = vsel %vm4581_vm12, %v13810_v20, %v13789_v32 }
 0x253   : > { %4312 = vmatprep.mubr.f32.mxu0 %v12916_v26  ;;  %12086 = vmatmul.mubr.msk.f32.vlgmr.msra.gmra.mrb[12].mxu1 %vm1057_vm3, %v13622_v24 }
 0x254   : > { %11624 = vmatmul.mubr.msk.f32.gmra.mrb[10].mxu0 %vm1057_vm3, %v14009_v48  ;;  %2879 = vmatprep.subr.mxu1 %v2785_v15  ;;  %v14022_v47 = vpop.permute.xlu1 %4935 }
 0x255   : > { %7455 = vrot.lane.b32.xlu1 %v13254_v8, %s12935_s18  ;;  %4460 = vmatprep.mubr.f32.mxu0 %v12916_v26  ;;  %v14027_v63 = vpop.permute.xlu0 %5297  ;;  %v4947_v43 = vsel %vm4941_vm13, %v14022_v47, %v13933_v34 }
 0x256   : > { %7807 = vrot.lane.b32.xlu0 %v13239_v58, %s12936_s30  ;;  %2880 = vmatpush1.msra.mxu1 %v2784_v16  ;;  %v5303_v16 = vsel %vm5301_vm14, %v13946_v12, %v13988_v49 }
 0x257   : > { %2943 = vmatprep.mubr.f32.mxu1 %v12916_v26 }
 0x258   : > { %11627 = vmatmul.mubr.msk.f32.vlgmr.msra.gmra.mrb[12].mxu0 %vm1057_vm3, %v13986_v19  ;;  %11585 = vmatmul.mubr.msk.f32.vlgmr.msra.gmra.mrb[8].mxu1 %vm1057_vm3, %v13664_v41  ;;  %v14039_v24 = vpop.permute.xlu1 %5649 }
 0x259   : > { %4603 = vmatpush1.msra.mxu0 %v4582_v57  ;;  %6019 = vrot.lane.b32.xlu1 %v12916_v26, %s12931_s11  ;;  %v2780_v38 = vpop.permute.xlu0 %2779  ;;  %v14170_v57 = vld [vmem:[%s15663_s3 + $0xb8] sm:$0xff] }
 0x25a   : > { %4756 = vmatprep.subr.mxu0 %v4587_v51  ;;  %7805 = vrot.lane.b32.xlu0 %v13245_v59, %s12936_s30  ;;  %v2788_v32 = vsel %vm2781_vm7, %v13552_v62, %v2780_v38  ;;  %vm7821_vm7 = vcmask 449536  }
 0x25b   : > { %4466 = vmatprep.mubr.f32.mxu0 %v12916_v26  ;;  %2949 = vmatprep.mubr.f32.mxu1 %v12916_v26 }
 0x25c   : > { %11628 = vmatmul.mubr.msk.f32.gmra.mrb[14].mxu0 %vm1057_vm3, %v14009_v48  ;;  %11586 = vmatmul.mubr.msk.f32.gmra.mrb[10].mxu1 %vm1057_vm3, %v13683_v52  ;;  %v3140_v20 = vpop.permute.xlu1 %3139 }
 0x25d   : > { %7817 = vrot.lane.b32.xlu1 %v13251_v4, %s12936_s30  ;;  %12088 = vmatprep.subr.mxu1 %v2788_v32  ;;  %v14063_v62 = vpop.permute.xlu0 %5647  ;;  %v3148_v10 = vsel %vm3141_vm8, %v13593_v13, %v3140_v20  ;;  %vm8181_vm8 = vcmask 441344  }
 0x25e   : > { %7815 = vrot.lane.b32.xlu0 %v13254_v8, %s12936_s30  ;;  %4666 = vmatprep.mubr.f32.mxu0 %v12916_v26 }
 0x25f   : > { %12089 = vmatpush3.msra.mxu1 %v2788_v32  ;;  %12090 = vmatprep.mubr.msk.f32.mxu1 %vm1057_vm3, %v13664_v41  ;;  %v4943_v41 = vsel %vm4941_vm13, %v13854_v0, %v13887_v42 }
 0x260   : > { %11633 = vmatmul.mubr.msk.f32.vlgmr.msra.gmra.mrb[8].mxu0 %vm1057_vm3, %v14061_v25  ;;  %12091 = vmatmul.mubr.msk.f32.vlgmr.msra.gmra.mrb[12].mxu1 %vm1057_vm3, %v13683_v52  ;;  %v14079_v1 = vpop.permute.xlu1 %5657  ;;  %v14095_v52 = vld [vmem:[%s15663_s3 + $0xa8] sm:$0xff] }
 0x261   : > { %4757 = vmatpush1.msra.mxu0 %v4586_v50  ;;  %3239 = vmatprep.subr.mxu1 %v3145_v60  ;;  %v14086_v23 = vpop.permute.xlu0 %5645 }
 0x262   : > { %4962 = vmatprep.subr.mxu0 %v4943_v41  ;;  %6371 = vrot.lane.b32.xlu1 %v13340_v11, %s12932_s26 }
 0x263   : > { %3240 = vmatpush1.msra.mxu1 %v3144_v14  ;;  %7813 = vrot.lane.b32.xlu0 %v13260_v9, %s12936_s30  ;;  %v14254_v14 = vld [vmem:[%s15663_s3 + $0xc8] sm:$0xff] }
 0x264   : > { %12093 = vmatprep.subr.mxu1 %v3148_v10  ;;  %4672 = vmatprep.mubr.f32.mxu0 %v12916_v26  ;;  %v14100_v13 = vpop.permute.xlu1 %5295 }
 0x265   : > { %3303 = vmatprep.mubr.f32.mxu1 %v12916_v26  ;;  %11634 = vmatmul.mubr.msk.f32.gmra.mrb[10].mxu0 %vm1057_vm3, %v14095_v52  ;;  %v14105_v3 = vpop.permute.xlu0 %5653  ;;  %v5306_v41 = vsel %vm5301_vm14, %v13978_v2, %v14100_v13 }
 0x266   : > { %11595 = vmatmul.mubr.msk.f32.vlgmr.msra.gmra.mrb[8].mxu1 %vm1057_vm3, %v13736_v7  ;;  %8169 = vrot.lane.b32.xlu1 %v13237_v55, %s12937_s28 }
 0x267   : > { %12094 = vmatpush3.msra.mxu1 %v3148_v10  ;;  %8167 = vrot.lane.b32.xlu0 %v13239_v58, %s12937_s28  ;;  %v5663_v10 = vsel %vm5661_vm15, %v14063_v62, %v14039_v24 }
 0x268   : > { %4820 = vmatprep.mubr.f32.mxu0 %v12916_v26  ;;  %3309 = vmatprep.mubr.f32.mxu1 %v12916_v26  ;;  %v3492_v5 = vpop.permute.xlu1 %3491 }
 0x269   : > { %11637 = vmatmul.mubr.msk.f32.vlgmr.msra.gmra.mrb[12].mxu0 %vm1057_vm3, %v14061_v25  ;;  %v14120_v37 = vpop.permute.xlu0 %6007  ;;  %v3505_v0 = vsel %vm3501_vm9, %v3492_v5, %v13632_v29  ;;  %v3504_v39 = vsel %vm3501_vm9, %v13613_v21, %v3492_v5  ;;  %v14149_v29 = vld [vmem:[%s15663_s3 + $0xb0] sm:$0xff] }
 0x26a   : > { %4963 = vmatpush1.msra.mxu0 %v4942_v18  ;;  %11596 = vmatmul.mubr.msk.f32.gmra.mrb[10].mxu1 %vm1057_vm3, %v13765_v31 }
 0x26b   : > { %5116 = vmatprep.subr.mxu0 %v4947_v43  ;;  %6379 = vrot.lane.b32.xlu1 %v12916_v26, %s12932_s26 }
 0x26c   : > { %8165 = vrot.lane.b32.xlu0 %v13245_v59, %s12937_s28  ;;  %4826 = vmatprep.mubr.f32.mxu0 %v12916_v26  ;;  %v14136_v45 = vpop.permute.xlu1 %6009 }
 0x26d   : > { %12095 = vmatprep.mubr.msk.f32.mxu1 %vm1057_vm3, %v13736_v7  ;;  %11638 = vmatmul.mubr.msk.f32.gmra.mrb[14].mxu0 %vm1057_vm3, %v14095_v52  ;;  %v14142_v15 = vpop.permute.xlu0 %6005  ;;  %v4946_v7 = vsel %vm4941_vm13, %v13924_v30, %v14022_v47 }
 0x26e   : > { %12096 = vmatmul.mubr.msk.f32.vlgmr.msra.gmra.mrb[12].mxu1 %vm1057_vm3, %v13765_v31  ;;  %3599 = vmatprep.subr.mxu1 %v3505_v0 }
 0x26f   : > { %8175 = vrot.lane.b32.xlu1 %v13254_v8, %s12937_s28  ;;  %3600 = vmatpush1.msra.mxu1 %v3504_v39  ;;  %v14308_v39 = vld [vmem:[%s15663_s3 + $0xd0] sm:$0xff] }
 0x270   : > { %6731 = vrot.lane.b32.xlu0 %v13340_v11, %s12933_s19  ;;  %5026 = vmatprep.mubr.f32.mxu0 %v12916_v26  ;;  %v3500_v21 = vpop.permute.xlu1 %3499 }
 0x271   : > { %3663 = vmatprep.mubr.f32.mxu1 %v12916_v26  ;;  %11643 = vmatmul.mubr.msk.f32.vlgmr.msra.gmra.mrb[8].mxu0 %vm1057_vm3, %v14149_v29  ;;  %v3852_v31 = vpop.permute.xlu0 %3851  ;;  %v3508_v47 = vsel %vm3501_vm9, %v13643_v33, %v3500_v21  ;;  %vm8541_vm9 = vcmask 408576  }
 0x272   : > { %5117 = vmatpush1.msra.mxu0 %v4946_v7  ;;  %11605 = vmatmul.mubr.msk.f32.vlgmr.msra.gmra.mrb[8].mxu1 %vm1057_vm3, %v13823_v54  ;;  %v3865_v33 = vsel %vm3861_vm10, %v3852_v31, %v13695_v56  ;;  %v5302_v56 = vsel %vm5301_vm14, %v13961_v46, %v13946_v12  ;;  %v3864_v50 = vsel %vm3861_vm10, %v13658_v40, %v3852_v31  ;;  %v14229_v46 = vld [vmem:[%s15663_s3 + $0xc0] sm:$0xff] }
 0x273   : > { %5322 = vmatprep.subr.mxu0 %v5303_v16  ;;  %8173 = vrot.lane.b32.xlu1 %v13260_v9, %s12937_s28  ;;  %v6023_v31 = vsel %vm6021_vm0, %v14120_v37, %v14136_v45  ;;  %v14330_v16 = vld [vmem:[%s15663_s3 + $0xd8] sm:$0xff] }
 0x274   : > { %8177 = vrot.lane.b32.xlu0 %v13251_v4, %s12937_s28  ;;  %5032 = vmatprep.mubr.f32.mxu0 %v12916_v26  ;;  %v14179_v51 = vpop.permute.xlu1 %6013 }
 0x275   : > { %3669 = vmatprep.mubr.f32.mxu1 %v12916_v26  ;;  %11644 = vmatmul.mubr.msk.f32.gmra.mrb[10].mxu0 %vm1057_vm3, %v14170_v57  ;;  %v14184_v38 = vpop.permute.xlu0 %5655 }
 0x276   : > { %11606 = vmatmul.mubr.msk.f32.gmra.mrb[10].mxu1 %vm1057_vm3, %v13848_v28  ;;  %12098 = vmatprep.subr.mxu1 %v3508_v47 }
 0x277   : > { %8527 = vrot.lane.b32.xlu1 %v13239_v58, %s12938_s25  ;;  %12099 = vmatpush3.msra.mxu1 %v3508_v47 }
 0x278   : > { %6739 = vrot.lane.b32.xlu0 %v12916_v26, %s12933_s19  ;;  %5180 = vmatprep.mubr.f32.mxu0 %v12916_v26  ;;  %v14195_v32 = vpop.permute.xlu1 %6367 }
 0x279   : > { %12100 = vmatprep.mubr.msk.f32.mxu1 %vm1057_vm3, %v13823_v54  ;;  %3959 = vmatprep.subr.mxu1 %v3865_v33  ;;  %v14199_v20 = vpop.permute.xlu0 %6017  ;;  %v5307_v54 = vsel %vm5301_vm14, %v14100_v13, %v14027_v63 }
 0x27a   : > { %11647 = vmatmul.mubr.msk.f32.vlgmr.msra.gmra.mrb[12].mxu0 %vm1057_vm3, %v14149_v29  ;;  %12101 = vmatmul.mubr.msk.f32.vlgmr.msra.gmra.mrb[12].mxu1 %vm1057_vm3, %v13848_v28 }
 0x27b   : > { %5323 = vmatpush1.msra.mxu0 %v5302_v56  ;;  %3960 = vmatpush1.msra.mxu1 %v3864_v50 }
 0x27c   : > { %5476 = vmatprep.subr.mxu0 %v5307_v54  ;;  %8525 = vrot.lane.b32.xlu1 %v13245_v59, %s12938_s25  ;;  %v14215_v12 = vpop.permute.xlu1 %6365  ;;  %v14390_v54 = vld [vmem:[%s15663_s3 + $0xe0] sm:$0xff] }
 0x27d   : > { %8529 = vrot.lane.b32.xlu0 %v13237_v55, %s12938_s25  ;;  %5186 = vmatprep.mubr.f32.mxu0 %v12916_v26  ;;  %v3860_v28 = vpop.permute.xlu0 %3859 }
 0x27e   : > { %11648 = vmatmul.mubr.msk.f32.gmra.mrb[14].mxu0 %vm1057_vm3, %v14170_v57  ;;  %4023 = vmatprep.mubr.f32.mxu1 %v12916_v26  ;;  %v3868_v40 = vsel %vm3861_vm10, %v13697_v61, %v3860_v28  ;;  %vm8901_vm10 = vcmask 400384  }
 0x27f   : > { %5386 = vmatprep.mubr.f32.mxu0 %v12916_v26  ;;  %11615 = vmatmul.mubr.msk.f32.vlgmr.msra.gmra.mrb[8].mxu1 %vm1057_vm3, %v13904_v36 }
 0x280   : > { %8535 = vrot.lane.b32.xlu1 %v13254_v8, %s12938_s25  ;;  %12103 = vmatprep.subr.mxu1 %v3868_v40  ;;  %v14235_v60 = vpop.permute.xlu1 %6373 }
 0x281   : > { %7091 = vrot.lane.b32.xlu0 %v13340_v11, %s12934_s24  ;;  %4029 = vmatprep.mubr.f32.mxu1 %v12916_v26  ;;  %v14240_v61 = vpop.permute.xlu0 %6369 }
 0x282   : > { %11653 = vmatmul.mubr.msk.f32.vlgmr.msra.gmra.mrb[8].mxu0 %vm1057_vm3, %v14229_v46  ;;  %12104 = vmatpush3.msra.mxu1 %v3868_v40 }
 0x283   : > { %5477 = vmatpush1.msra.mxu0 %v5306_v41  ;;  %5392 = vmatprep.mubr.f32.mxu0 %v12916_v26  ;;  %v14417_v41 = vld [vmem:[%s15663_s3 + $0xe8] sm:$0xff] }
 0x284   : > { %5682 = vmatprep.subr.mxu0 %v5663_v10  ;;  %8533 = vrot.lane.b32.xlu1 %v13260_v9, %s12938_s25  ;;  %v14258_v5 = vpop.permute.xlu1 %6015 }
 0x285   : > { %8537 = vrot.lane.b32.xlu0 %v13251_v4, %s12938_s25  ;;  %11616 = vmatmul.mubr.msk.f32.gmra.mrb[10].mxu1 %vm1057_vm3, %v13931_v44  ;;  %v4212_v13 = vpop.permute.xlu0 %4211 }
 0x286   : > { %11654 = vmatmul.mubr.msk.f32.gmra.mrb[10].mxu0 %vm1057_vm3, %v14254_v14  ;;  %12105 = vmatprep.mubr.msk.f32.mxu1 %vm1057_vm3, %v13904_v36  ;;  %v4225_v18 = vsel %vm4221_vm11, %v4212_v13, %v13772_v35  ;;  %v4224_v43 = vsel %vm4221_vm11, %v13751_v22, %v4212_v13  ;;  %v5662_v35 = vsel %vm5661_vm15, %v14086_v23, %v14063_v62 }
 0x287   : > { %5540 = vmatprep.mubr.f32.mxu0 %v12916_v26  ;;  %4319 = vmatprep.subr.mxu1 %v4225_v18  ;;  %v5667_v22 = vsel %vm5661_vm15, %v14184_v38, %v14079_v1 }
 0x288   : > { %7451 = vrot.lane.b32.xlu1 %v13340_v11, %s12935_s18  ;;  %v4572_v0 = vpop.permute.xlu1 %4571 }
 0x289   : > { %7099 = vrot.lane.b32.xlu0 %v12916_v26, %s12934_s24  ;;  %12106 = vmatmul.mubr.msk.f32.vlgmr.msra.gmra.mrb[12].mxu1 %vm1057_vm3, %v13931_v44  ;;  %v14279_v36 = vpop.permute.xlu0 %6377  ;;  %s12939_s24 = smov 49  }
 0x28a   : > { %11657 = vmatmul.mubr.msk.f32.vlgmr.msra.gmra.mrb[12].mxu0 %vm1057_vm3, %v14229_v46  ;;  %4320 = vmatpush1.msra.mxu1 %v4224_v43 }
 0x28b   : > { %5683 = vmatpush1.msra.mxu0 %v5662_v35  ;;  %5546 = vmatprep.mubr.f32.mxu0 %v12916_v26 }
 0x28c   : > { %5836 = vmatprep.subr.mxu0 %v5667_v22  ;;  %8889 = vrot.lane.b32.xlu1 %v13237_v55, %s12939_s24  ;;  %v14292_v44 = vpop.permute.xlu1 %6729 }
 0x28d   : > { %8887 = vrot.lane.b32.xlu0 %v13239_v58, %s12939_s24  ;;  %4383 = vmatprep.mubr.f32.mxu1 %v12916_v26  ;;  %v4220_v62 = vpop.permute.xlu0 %4219 }
 0x28e   : > { %11658 = vmatmul.mubr.msk.f32.gmra.mrb[14].mxu0 %vm1057_vm3, %v14254_v14  ;;  %11625 = vmatmul.mubr.msk.f32.vlgmr.msra.gmra.mrb[8].mxu1 %vm1057_vm3, %v13986_v19  ;;  %v4228_v23 = vsel %vm4221_vm11, %v13749_v17, %v4220_v62  ;;  %v5666_v17 = vsel %vm5661_vm15, %v14105_v3, %v14184_v38  ;;  %v4585_v38 = vsel %vm4581_vm12, %v4572_v0, %v13829_v27  ;;  %vm9261_vm11 = vcmask 392192  }
 0x28f   : > { %5746 = vmatprep.mubr.f32.mxu0 %v12916_v26  ;;  %4389 = vmatprep.mubr.f32.mxu1 %v12916_v26 }
 0x290   : > { %7459 = vrot.lane.b32.xlu1 %v12916_v26, %s12935_s18  ;;  %12108 = vmatprep.subr.mxu1 %v4228_v23 }
 0x291   : > { %8885 = vrot.lane.b32.xlu0 %v13245_v59, %s12939_s24  ;;  %12109 = vmatpush3.msra.mxu1 %v4228_v23  ;;  %v4580_v21 = vpop.permute.xlu1 %4579 }
 0x292   : > { %11663 = vmatmul.mubr.msk.f32.vlgmr.msra.gmra.mrb[8].mxu0 %vm1057_vm3, %v14308_v39  ;;  %11626 = vmatmul.mubr.msk.f32.gmra.mrb[10].mxu1 %vm1057_vm3, %v14009_v48  ;;  %v14321_v7 = vpop.permute.xlu0 %6727  ;;  %v4588_v33 = vsel %vm4581_vm12, %v13850_v6, %v4580_v21  ;;  %v6022_v6 = vsel %vm6021_vm0, %v14142_v15, %v14120_v37 }
 0x293   : > { %5837 = vmatpush1.msra.mxu0 %v5666_v17  ;;  %5752 = vmatprep.mubr.f32.mxu0 %v12916_v26  ;;  %v6743_v22 = vsel %vm6741_vm4, %v14321_v7, %v14292_v44 }
 0x294   : > { %6042 = vmatprep.subr.mxu0 %v6023_v31  ;;  %8897 = vrot.lane.b32.xlu1 %v13251_v4, %s12939_s24 }
 0x295   : > { %8895 = vrot.lane.b32.xlu0 %v13254_v8, %s12939_s24  ;;  %12110 = vmatprep.mubr.msk.f32.mxu1 %vm1057_vm3, %v13986_v19  ;;  %v14338_v47 = vpop.permute.xlu1 %6375  ;;  %v4584_v19 = vsel %vm4581_vm12, %v13805_v53, %v4572_v0  ;;  %vm9621_vm12 = vcmask 359424  }
 0x296   : > { %11664 = vmatmul.mubr.msk.f32.gmra.mrb[10].mxu0 %vm1057_vm3, %v14330_v16  ;;  %12111 = vmatmul.mubr.msk.f32.vlgmr.msra.gmra.mrb[12].mxu1 %vm1057_vm3, %v14009_v48  ;;  %v14348_v56 = vpop.permute.xlu0 %6725  ;;  %v6027_v48 = vsel %vm6021_vm0, %v14258_v5, %v14199_v20  ;;  %v6387_v43 = vsel %vm6381_vm2, %v14338_v47, %v14279_v36 }
 0x297   : > { %4679 = vmatprep.subr.mxu1 %v4585_v38  ;;  %5900 = vmatprep.mubr.f32.mxu0 %v12916_v26 }
 0x298   : > { %7811 = vrot.lane.b32.xlu1 %v13340_v11, %s12936_s30  ;;  %4680 = vmatpush1.msra.mxu1 %v4584_v19 }
 0x299   : > { %8893 = vrot.lane.b32.xlu0 %v13260_v9, %s12939_s24  ;;  %12113 = vmatprep.subr.mxu1 %v4588_v33  ;;  %v14357_v27 = vpop.permute.xlu1 %6737 }
 0x29a   : > { %4743 = vmatprep.mubr.f32.mxu1 %v12916_v26  ;;  %11667 = vmatmul.mubr.msk.f32.vlgmr.msra.gmra.mrb[12].mxu0 %vm1057_vm3, %v14308_v39  ;;  %v14365_v53 = vpop.permute.xlu0 %6733 }
 0x29b   : > { %6043 = vmatpush1.msra.mxu0 %v6022_v6  ;;  %11635 = vmatmul.mubr.msk.f32.vlgmr.msra.gmra.mrb[8].mxu1 %vm1057_vm3, %v14061_v25  ;;  %v14573_v6 = vld [vmem:[%s15663_s3 + $0x108] sm:$0xff] }
 0x29c   : > { %12114 = vmatpush3.msra.mxu1 %v4588_v33  ;;  %6196 = vmatprep.subr.mxu0 %v6027_v48 }
 0x29d   : > { %9249 = vrot.lane.b32.xlu1 %v13237_v55, %s12940_s29  ;;  %9247 = vrot.lane.b32.xlu0 %v13239_v58, %s12940_s29  ;;  %v4932_v37 = vpop.permute.xlu1 %4931 }
 0x29e   : > { %5906 = vmatprep.mubr.f32.mxu0 %v12916_v26  ;;  %4749 = vmatprep.mubr.f32.mxu1 %v12916_v26  ;;  %v14378_v15 = vpop.permute.xlu0 %7087  ;;  %v4945_v50 = vsel %vm4941_vm13, %v4932_v37, %v13924_v30  ;;  %v4944_v28 = vsel %vm4941_vm13, %v13887_v42, %v4932_v37  ;;  %v6383_v42 = vsel %vm6381_vm2, %v14195_v32, %v14240_v61 }
 0x29f   : > { %11668 = vmatmul.mubr.msk.f32.gmra.mrb[14].mxu0 %vm1057_vm3, %v14330_v16  ;;  %11636 = vmatmul.mubr.msk.f32.gmra.mrb[10].mxu1 %vm1057_vm3, %v14095_v52 }
 0x2a0   : > { %6106 = vmatprep.mubr.f32.mxu0 %v12916_v26  ;;  %12115 = vmatprep.mubr.msk.f32.mxu1 %vm1057_vm3, %v14061_v25  ;;  %v6026_v25 = vsel %vm6021_vm0, %v14179_v51, %v14258_v5 }
 0x2a1   : > { %7819 = vrot.lane.b32.xlu1 %v12916_v26, %s12936_s30  ;;  %9245 = vrot.lane.b32.xlu0 %v13245_v59, %s12940_s29  ;;  %v14400_v30 = vpop.permute.xlu1 %7089 }
 0x2a2   : > { %5039 = vmatprep.subr.mxu1 %v4945_v50 }
 0x2a3   : > { %11673 = vmatmul.mubr.msk.f32.vlgmr.msra.gmra.mrb[8].mxu0 %vm1057_vm3, %v14390_v54  ;;  %12116 = vmatmul.mubr.msk.f32.vlgmr.msra.gmra.mrb[12].mxu1 %vm1057_vm3, %v14095_v52  ;;  %v14409_v40 = vpop.permute.xlu0 %7085 }
 0x2a4   : > { %6197 = vmatpush1.msra.mxu0 %v6026_v25  ;;  %5040 = vmatpush1.msra.mxu1 %v4944_v28  ;;  %v7102_v25 = vsel %vm7101_vm5, %v14409_v40, %v14378_v15 }
 0x2a5   : > { %6402 = vmatprep.subr.mxu0 %v6383_v42  ;;  %9255 = vrot.lane.b32.xlu1 %v13254_v8, %s12940_s29 }
 0x2a6   : > { %8171 = vrot.lane.b32.xlu0 %v13340_v11, %s12937_s28  ;;  %6112 = vmatprep.mubr.f32.mxu0 %v12916_v26  ;;  %v4940_v52 = vpop.permute.xlu1 %4939 }
 0x2a7   : > { %11674 = vmatmul.mubr.msk.f32.gmra.mrb[10].mxu0 %vm1057_vm3, %v14417_v41  ;;  %5103 = vmatprep.mubr.f32.mxu1 %v12916_v26  ;;  %v14427_v10 = vpop.permute.xlu0 %6735  ;;  %v4948_v5 = vsel %vm4941_vm13, %v13933_v34, %v4940_v52  ;;  %v6382_v34 = vsel %vm6381_vm2, %v14215_v12, %v14195_v32  ;;  %vm9981_vm13 = vcmask 351232  }
 0x2a8   : > { %6260 = vmatprep.mubr.f32.mxu0 %v12916_v26  ;;  %11645 = vmatmul.mubr.msk.f32.vlgmr.msra.gmra.mrb[8].mxu1 %vm1057_vm3, %v14149_v29 }
 0x2a9   : > { %9253 = vrot.lane.b32.xlu1 %v13260_v9, %s12940_s29  ;;  %12118 = vmatprep.subr.mxu1 %v4948_v5 }
 0x2aa   : > { %9257 = vrot.lane.b32.xlu0 %v13251_v4, %s12940_s29  ;;  %5109 = vmatprep.mubr.f32.mxu1 %v12916_v26  ;;  %v14439_v13 = vpop.permute.xlu1 %7093 }
 0x2ab   : > { %11677 = vmatmul.mubr.msk.f32.vlgmr.msra.gmra.mrb[12].mxu0 %vm1057_vm3, %v14390_v54  ;;  %12119 = vmatpush3.msra.mxu1 %v4948_v5  ;;  %v5292_v18 = vpop.permute.xlu0 %5291 }
 0x2ac   : > { %6403 = vmatpush1.msra.mxu0 %v6382_v34  ;;  %6266 = vmatprep.mubr.f32.mxu0 %v12916_v26  ;;  %v5305_v32 = vsel %vm5301_vm14, %v5292_v18, %v13978_v2  ;;  %v5304_v35 = vsel %vm5301_vm14, %v13988_v49, %v5292_v18  ;;  %v14472_v2 = vld [vmem:[%s15663_s3 + $0xf0] sm:$0xff]  ;;  %v6386_v49 = vsel %vm6381_vm2, %v14235_v60, %v14338_v47 }
 0x2ad   : > { %6556 = vmatprep.subr.mxu0 %v6387_v43  ;;  %9607 = vrot.lane.b32.xlu1 %v13239_v58, %s12941_s12  ;;  %v6747_v47 = vsel %vm6741_vm4, %v14427_v10, %v14357_v27 }
 0x2ae   : > { %8179 = vrot.lane.b32.xlu0 %v12916_v26, %s12937_s28  ;;  %11646 = vmatmul.mubr.msk.f32.gmra.mrb[10].mxu1 %vm1057_vm3, %v14170_v57  ;;  %v14458_v12 = vpop.permute.xlu1 %7447 }
 0x2af   : > { %11678 = vmatmul.mubr.msk.f32.gmra.mrb[14].mxu0 %vm1057_vm3, %v14417_v41  ;;  %12120 = vmatprep.mubr.msk.f32.mxu1 %vm1057_vm3, %v14149_v29  ;;  %v14464_v0 = vpop.permute.xlu0 %7097 }
 0x2b0   : > { %5399 = vmatprep.subr.mxu1 %v5305_v32  ;;  %6466 = vmatprep.mubr.f32.mxu0 %v12916_v26 }
 0x2b1   : > { %9605 = vrot.lane.b32.xlu1 %v13245_v59, %s12941_s12 }
 0x2b2   : > { %9609 = vrot.lane.b32.xlu0 %v13237_v55, %s12941_s12  ;;  %12121 = vmatmul.mubr.msk.f32.vlgmr.msra.gmra.mrb[12].mxu1 %vm1057_vm3, %v14170_v57  ;;  %v14494_v57 = vld [vmem:[%s15663_s3 + $0xf8] sm:$0xff] }
 0x2b3   : > { %5400 = vmatpush1.msra.mxu1 %v5304_v35  ;;  %11683 = vmatmul.mubr.msk.f32.vlgmr.msra.gmra.mrb[8].mxu0 %vm1057_vm3, %v14472_v2  ;;  %v14485_v29 = vpop.permute.xlu1 %7445 }
 0x2b4   : > { %6557 = vmatpush1.msra.mxu0 %v6386_v49  ;;  %6472 = vmatprep.mubr.f32.mxu0 %v12916_v26  ;;  %v5300_v62 = vpop.permute.xlu0 %5299 }
 0x2b5   : > { %6762 = vmatprep.subr.mxu0 %v6743_v22  ;;  %9615 = vrot.lane.b32.xlu1 %v13254_v8, %s12941_s12  ;;  %v5308_v23 = vsel %vm5301_vm14, %v14027_v63, %v5300_v62  ;;  %v6742_v63 = vsel %vm6741_vm4, %v14348_v56, %v14321_v7  ;;  %vm10341_vm14 = vcmask 343040  }
 0x2b6   : > { %8531 = vrot.lane.b32.xlu0 %v13340_v11, %s12938_s25  ;;  %5463 = vmatprep.mubr.f32.mxu1 %v12916_v26 }
 0x2b7   : > { %11684 = vmatmul.mubr.msk.f32.gmra.mrb[10].mxu0 %vm1057_vm3, %v14494_v57  ;;  %11655 = vmatmul.mubr.msk.f32.vlgmr.msra.gmra.mrb[8].mxu1 %vm1057_vm3, %v14229_v46  ;;  %v14507_v21 = vpop.permute.xlu1 %7095 }
 0x2b8   : > { %12123 = vmatprep.subr.mxu1 %v5308_v23  ;;  %6620 = vmatprep.mubr.f32.mxu0 %v12916_v26  ;;  %v14510_v17 = vpop.permute.xlu0 %7449  ;;  %v7107_v52 = vsel %vm7101_vm5, %v14507_v21, %v14464_v0 }
 0x2b9   : > { %9613 = vrot.lane.b32.xlu1 %v13260_v9, %s12941_s12  ;;  %12124 = vmatpush3.msra.mxu1 %v5308_v23 }
 0x2ba   : > { %9617 = vrot.lane.b32.xlu0 %v13251_v4, %s12941_s12  ;;  %5469 = vmatprep.mubr.f32.mxu1 %v12916_v26 }
 0x2bb   : > { %11687 = vmatmul.mubr.msk.f32.vlgmr.msra.gmra.mrb[12].mxu0 %vm1057_vm3, %v14472_v2  ;;  %11656 = vmatmul.mubr.msk.f32.gmra.mrb[10].mxu1 %vm1057_vm3, %v14254_v14  ;;  %v14524_v31 = vpop.permute.xlu1 %7453 }
 0x2bc   : > { %6763 = vmatpush1.msra.mxu0 %v6742_v63  ;;  %6626 = vmatprep.mubr.f32.mxu0 %v12916_v26  ;;  %v5652_v38 = vpop.permute.xlu0 %5651  ;;  %v11139_v63 = vld [vmem:[%s15667_s7 + $0x8] sm:$0xff] }
 0x2bd   : > { %6916 = vmatprep.subr.mxu0 %v6747_v47  ;;  %8891 = vrot.lane.b32.xlu1 %v13340_v11, %s12939_s24  ;;  %v5665_v7 = vsel %vm5661_vm15, %v5652_v38, %v14105_v3  ;;  %v5664_v33 = vsel %vm5661_vm15, %v14039_v24, %v5652_v38  ;;  %v14548_v3 = vld [vmem:[%s15663_s3 + $0x100] sm:$0xff]  ;;  %v6746_v24 = vsel %vm6741_vm4, %v14365_v53, %v14427_v10  ;;  %v14788_v47 = vld [vmem:[%s15663_s3 + $0x130] sm:$0xff] }
 0x2be   : > { %8539 = vrot.lane.b32.xlu0 %v12916_v26, %s12938_s25  ;;  %12125 = vmatprep.mubr.msk.f32.mxu1 %vm1057_vm3, %v14229_v46  ;;  %s12942_s25 = smov 43   ;;  %v7463_v10 = vsel %vm7461_vm6, %v14458_v12, %v14510_v17 }
 0x2bf   : > { %11688 = vmatmul.mubr.msk.f32.gmra.mrb[14].mxu0 %vm1057_vm3, %v14494_v57  ;;  %12126 = vmatmul.mubr.msk.f32.vlgmr.msra.gmra.mrb[12].mxu1 %vm1057_vm3, %v14254_v14  ;;  %v6012_v56 = vpop.permute.xlu1 %6011  ;;  %v7103_v14 = vsel %vm7101_vm5, %v14378_v15, %v14400_v30 }
 0x2c0   : > { %5759 = vmatprep.subr.mxu1 %v5665_v7  ;;  %6826 = vmatprep.mubr.f32.mxu0 %v12916_v26  ;;  %v14550_v19 = vpop.permute.xlu0 %7457 }
 0x2c1   : > { %9969 = vrot.lane.b32.xlu1 %v13237_v55, %s12942_s25  ;;  %5760 = vmatpush1.msra.mxu1 %v5664_v33  ;;  %v11141_v33 = vld [vmem:[%s15667_s7 + $0x18] sm:$0xff] }
 0x2c2   : > { %9967 = vrot.lane.b32.xlu0 %v13239_v58, %s12942_s25  ;;  %5823 = vmatprep.mubr.f32.mxu1 %v12916_v26 }
 0x2c3   : > { %11693 = vmatmul.mubr.msk.f32.vlgmr.msra.gmra.mrb[8].mxu0 %vm1057_vm3, %v14548_v3  ;;  %11665 = vmatmul.mubr.msk.f32.vlgmr.msra.gmra.mrb[8].mxu1 %vm1057_vm3, %v14308_v39  ;;  %v14564_v46 = vpop.permute.xlu1 %7809 }
 0x2c4   : > { %6917 = vmatpush1.msra.mxu0 %v6746_v24  ;;  %6832 = vmatprep.mubr.f32.mxu0 %v12916_v26  ;;  %v5660_v48 = vpop.permute.xlu0 %5659 }
 0x2c5   : > { %7122 = vmatprep.subr.mxu0 %v7103_v14  ;;  %8899 = vrot.lane.b32.xlu1 %v12916_v26, %s12939_s24  ;;  %v5668_v37 = vsel %vm5661_vm15, %v14079_v1, %v5660_v48  ;;  %v6025_v1 = vsel %vm6021_vm0, %v6012_v56, %v14179_v51  ;;  %v6024_v51 = vsel %vm6021_vm0, %v14136_v45, %v6012_v56  ;;  %s12943_s24 = smov 42   ;;  %vm11285_vm15 = vcmask 261120  }
 0x2c6   : > { %9965 = vrot.lane.b32.xlu0 %v13245_v59, %s12942_s25  ;;  %5829 = vmatprep.mubr.f32.mxu1 %v12916_v26 }
 0x2c7   : > { %11694 = vmatmul.mubr.msk.f32.gmra.mrb[10].mxu0 %vm1057_vm3, %v14573_v6  ;;  %11666 = vmatmul.mubr.msk.f32.gmra.mrb[10].mxu1 %vm1057_vm3, %v14330_v16  ;;  %v14586_v50 = vpop.permute.xlu1 %7455 }
 0x2c8   : > { %12128 = vmatprep.subr.mxu1 %v5668_v37  ;;  %6980 = vmatprep.mubr.f32.mxu0 %v12916_v26  ;;  %v14589_v28 = vpop.permute.xlu0 %7807 }
 0x2c9   : > { %9977 = vrot.lane.b32.xlu1 %v13251_v4, %s12942_s25  ;;  %12129 = vmatpush3.msra.mxu1 %v5668_v37 }
 0x2ca   : > { %9975 = vrot.lane.b32.xlu0 %v13254_v8, %s12942_s25  ;;  %12130 = vmatprep.mubr.msk.f32.mxu1 %vm1057_vm3, %v14308_v39 }
 0x2cb   : > { %11697 = vmatmul.mubr.msk.f32.vlgmr.msra.gmra.mrb[12].mxu0 %vm1057_vm3, %v14548_v3  ;;  %6119 = vmatprep.subr.mxu1 %v6025_v1  ;;  %v6020_v42 = vpop.permute.xlu1 %6019 }
 0x2cc   : > { %7123 = vmatpush1.msra.mxu0 %v7102_v25  ;;  %12131 = vmatmul.mubr.msk.f32.vlgmr.msra.gmra.mrb[12].mxu1 %vm1057_vm3, %v14330_v16  ;;  %v14609_v39 = vpop.permute.xlu0 %7805  ;;  %v6028_v15 = vsel %vm6021_vm0, %v14199_v20, %v6020_v42  ;;  %v14634_v20 = vld [vmem:[%s15663_s3 + $0x110] sm:$0xff]  ;;  %vm11375_vm0 = vcmask 31744  }
 0x2cd   : > { %7276 = vmatprep.subr.mxu0 %v7107_v52  ;;  %9251 = vrot.lane.b32.xlu1 %v13340_v11, %s12940_s29 }
 0x2ce   : > { %6120 = vmatpush1.msra.mxu1 %v6024_v51  ;;  %9973 = vrot.lane.b32.xlu0 %v13260_v9, %s12942_s25  ;;  %v11138_v51 = vld [vmem:[%s15667_s7] sm:$0xff] }
 0x2cf   : > { %6986 = vmatprep.mubr.f32.mxu0 %v12916_v26  ;;  %6183 = vmatprep.mubr.f32.mxu1 %v12916_v26  ;;  %v14621_v16 = vpop.permute.xlu1 %7817 }
 0x2d0   : > { %11698 = vmatmul.mubr.msk.f32.gmra.mrb[14].mxu0 %vm1057_vm3, %v14573_v6  ;;  %12133 = vmatprep.subr.mxu1 %v6028_v15  ;;  %v14625_v45 = vpop.permute.xlu0 %7815 }
 0x2d1   : > { %10329 = vrot.lane.b32.xlu1 %v13237_v55, %s12943_s24  ;;  %11675 = vmatmul.mubr.msk.f32.vlgmr.msra.gmra.mrb[8].mxu1 %vm1057_vm3, %v14390_v54  ;;  %v7106_v55 = vsel %vm7101_vm5, %v14439_v13, %v14507_v21  ;;  %v7827_v23 = vsel %vm7821_vm7, %v14625_v45, %v14621_v16 }
 0x2d2   : > { %10327 = vrot.lane.b32.xlu0 %v13239_v58, %s12943_s24  ;;  %12134 = vmatpush3.msra.mxu1 %v6028_v15  ;;  %v14653_v58 = vld [vmem:[%s15663_s3 + $0x118] sm:$0xff] }
 0x2d3   : > { %7186 = vmatprep.mubr.f32.mxu0 %v12916_v26  ;;  %6189 = vmatprep.mubr.f32.mxu1 %v12916_v26 }
 0x2d4   : > { %11703 = vmatmul.mubr.msk.f32.vlgmr.msra.gmra.mrb[8].mxu0 %vm1057_vm3, %v14634_v20  ;;  %v6372_v40 = vpop.permute.xlu1 %6371 }
 0x2d5   : > { %7277 = vmatpush1.msra.mxu0 %v7106_v55  ;;  %9259 = vrot.lane.b32.xlu1 %v12916_v26, %s12940_s29  ;;  %v14655_v5 = vpop.permute.xlu0 %7813  ;;  %v6385_v34 = vsel %vm6381_vm2, %v6372_v40, %v14235_v60  ;;  %v6384_v43 = vsel %vm6381_vm2, %v14240_v61, %v6372_v40  ;;  %v7462_v60 = vsel %vm7461_vm6, %v14485_v29, %v14458_v12  ;;  %v14708_v12 = vld [vmem:[%s15663_s3 + $0x120] sm:$0xff] }
 0x2d6   : > { %7482 = vmatprep.subr.mxu0 %v7463_v10  ;;  %10325 = vrot.lane.b32.xlu0 %v13245_v59, %s12943_s24  ;;  %v7467_v61 = vsel %vm7461_vm6, %v14586_v50, %v14550_v19  ;;  %v7826_v24 = vsel %vm7821_vm7, %v14655_v5, %v14625_v45 }
 0x2d7   : > { %11676 = vmatmul.mubr.msk.f32.gmra.mrb[10].mxu1 %vm1057_vm3, %v14417_v41  ;;  %7192 = vmatprep.mubr.f32.mxu0 %v12916_v26 }
 0x2d8   : > { %11704 = vmatmul.mubr.msk.f32.gmra.mrb[10].mxu0 %vm1057_vm3, %v14653_v58  ;;  %12135 = vmatprep.mubr.msk.f32.mxu1 %vm1057_vm3, %v14390_v54  ;;  %v14668_v18 = vpop.permute.xlu1 %8169 }
 0x2d9   : > { %9619 = vrot.lane.b32.xlu1 %v12916_v26, %s12941_s12  ;;  %6479 = vmatprep.subr.mxu1 %v6385_v34  ;;  %v14674_v59 = vpop.permute.xlu0 %8167 }
 0x2da   : > { %9611 = vrot.lane.b32.xlu0 %v13340_v11, %s12941_s12  ;;  %7340 = vmatprep.mubr.f32.mxu0 %v12916_v26 }
 0x2db   : > { %12136 = vmatmul.mubr.msk.f32.vlgmr.msra.gmra.mrb[12].mxu1 %vm1057_vm3, %v14417_v41 }
 0x2dc   : > { %6480 = vmatpush1.msra.mxu1 %v6384_v43  ;;  %11707 = vmatmul.mubr.msk.f32.vlgmr.msra.gmra.mrb[12].mxu0 %vm1057_vm3, %v14634_v20 }
 0x2dd   : > { %7483 = vmatpush1.msra.mxu0 %v7462_v60  ;;  %9979 = vrot.lane.b32.xlu1 %v12916_v26, %s12942_s25  ;;  %v6380_v54 = vpop.permute.xlu1 %6379 }
 0x2de   : > { %7636 = vmatprep.subr.mxu0 %v7467_v61  ;;  %9971 = vrot.lane.b32.xlu0 %v13340_v11, %s12942_s25  ;;  %v14693_v41 = vpop.permute.xlu0 %8165  ;;  %v6388_v32 = vsel %vm6381_vm2, %v14279_v36, %v6380_v54  ;;  %s12764_s25 = smul.u32 24, %s15675_s16 }
 0x2df   : > { %6543 = vmatprep.mubr.f32.mxu1 %v12916_v26  ;;  %7346 = vmatprep.mubr.f32.mxu0 %v12916_v26  ;;  %v8182_v25 = vsel %vm8181_vm8, %v14693_v41, %v14674_v59 }
 0x2e0   : > { %11685 = vmatmul.mubr.msk.f32.vlgmr.msra.gmra.mrb[8].mxu1 %vm1057_vm3, %v14472_v2  ;;  %11708 = vmatmul.mubr.msk.f32.gmra.mrb[14].mxu0 %vm1057_vm3, %v14653_v58 }
 0x2e1   : > { %10333 = vrot.lane.b32.xlu1 %v13260_v9, %s12943_s24  ;;  %12138 = vmatprep.subr.mxu1 %v6388_v32  ;;  %v14710_v36 = vpop.permute.xlu1 %8175  ;;  %v7466_v9 = vsel %vm7461_vm6, %v14524_v31, %v14586_v50 }
 0x2e2   : > { %10331 = vrot.lane.b32.xlu0 %v13340_v11, %s12943_s24  ;;  %6549 = vmatprep.mubr.f32.mxu1 %v12916_v26  ;;  %v6732_v35 = vpop.permute.xlu0 %6731  ;;  %v7823_v11 = vsel %vm7821_vm7, %v14589_v28, %v14564_v46 }
 0x2e3   : > { %12139 = vmatpush3.msra.mxu1 %v6388_v32  ;;  %7546 = vmatprep.mubr.f32.mxu0 %v12916_v26  ;;  %v6745_v49 = vsel %vm6741_vm4, %v6732_v35, %v14365_v53  ;;  %v6744_v22 = vsel %vm6741_vm4, %v14292_v44, %v6732_v35  ;;  %v14739_v53 = vld [vmem:[%s15663_s3 + $0x128] sm:$0xff] }
 0x2e4   : > { %11686 = vmatmul.mubr.msk.f32.gmra.mrb[10].mxu1 %vm1057_vm3, %v14494_v57  ;;  %11713 = vmatmul.mubr.msk.f32.vlgmr.msra.gmra.mrb[8].mxu0 %vm1057_vm3, %v14708_v12  ;;  %v10683_v44 = vld [vmem:[%s15664_s4 + $0x8] sm:$0xff] }
 0x2e5   : > { %7637 = vmatpush1.msra.mxu0 %v7466_v9  ;;  %10337 = vrot.lane.b32.xlu1 %v13251_v4, %s12943_s24  ;;  %v14730_v29 = vpop.permute.xlu1 %8173 }
 0x2e6   : > { %7842 = vmatprep.subr.mxu0 %v7823_v11  ;;  %10335 = vrot.lane.b32.xlu0 %v13254_v8, %s12943_s24  ;;  %v14741_v62 = vpop.permute.xlu0 %8177  ;;  %v8186_v55 = vsel %vm8181_vm8, %v14730_v29, %v14710_v36 }
 0x2e7   : > { %12140 = vmatprep.mubr.msk.f32.mxu1 %vm1057_vm3, %v14472_v2  ;;  %6839 = vmatprep.subr.mxu1 %v6745_v49  ;;  %v8187_v42 = vsel %vm8181_vm8, %v14710_v36, %v14741_v62  ;;  %v14942_v36 = vld [vmem:[%s15663_s3 + $0x150] sm:$0xff] }
 0x2e8   : > { %7552 = vmatprep.mubr.f32.mxu0 %v12916_v26  ;;  %12141 = vmatmul.mubr.msk.f32.vlgmr.msra.gmra.mrb[12].mxu1 %vm1057_vm3, %v14494_v57  ;;  %v7822_v57 = vsel %vm7821_vm7, %v14609_v39, %v14589_v28 }
 0x2e9   : > { %6840 = vmatpush1.msra.mxu1 %v6744_v22  ;;  %11714 = vmatmul.mubr.msk.f32.gmra.mrb[10].mxu0 %vm1057_vm3, %v14739_v53  ;;  %v14750_v4 = vpop.permute.xlu1 %8527 }
 0x2ea   : > { %10339 = vrot.lane.b32.xlu0 %v12916_v26, %s12943_s24  ;;  %7700 = vmatprep.mubr.f32.mxu0 %v12916_v26  ;;  %v6740_v8 = vpop.permute.xlu0 %6739  ;;  %s499_s24 = scalar_lea.vmem %s15670_s10, %s12764_s25 }
 0x2eb   : > { %6903 = vmatprep.mubr.f32.mxu1 %v12916_v26  ;;  %v6748_v2 = vsel %vm6741_vm4, %v14357_v27, %v6740_v8 }
 0x2ec   : > { %11695 = vmatmul.mubr.msk.f32.vlgmr.msra.gmra.mrb[8].mxu1 %vm1057_vm3, %v14548_v3  ;;  %12143 = vmatprep.subr.mxu1 %v6748_v2 }
 0x2ed   : > { %11717 = vmatmul.mubr.msk.f32.vlgmr.msra.gmra.mrb[12].mxu0 %vm1057_vm3, %v14708_v12  ;;  %12144 = vmatpush3.msra.mxu1 %v6748_v2 }
 0x2ee   : > { %7843 = vmatpush1.msra.mxu0 %v7822_v57  ;;  %10691 = vperm.xlu0 %12819, %v10683_v44   ;;  %v14771_v21 = vpop.permute.xlu1 %8525 }
 0x2ef   : > { %7996 = vmatprep.subr.mxu0 %v7827_v23  ;;  %7706 = vmatprep.mubr.f32.mxu0 %v12916_v26  ;;  %v14774_v27 = vpop.permute.xlu0 %8529  ;;  %v8542_v41 = vsel %vm8541_vm9, %v14771_v21, %v14750_v4 }
 0x2f0   : > { %6909 = vmatprep.mubr.f32.mxu1 %v12916_v26  ;;  %v8543_v40 = vsel %vm8541_vm9, %v14750_v4, %v14774_v27 }
 0x2f1   : > { %11718 = vmatmul.mubr.msk.f32.gmra.mrb[14].mxu0 %vm1057_vm3, %v14739_v53  ;;  %11696 = vmatmul.mubr.msk.f32.gmra.mrb[10].mxu1 %vm1057_vm3, %v14573_v6 }
 0x2f2   : > { %11149 = vperm.xlu0 %12819, %v11139_v63   ;;  %7906 = vmatprep.mubr.f32.mxu0 %v12916_v26  ;;  %v14790_v38 = vpop.permute.xlu1 %8535 }
 0x2f3   : > { %v7092_v7 = vpop.permute.xlu0 %7091  ;;  %12145 = vmatprep.mubr.msk.f32.mxu1 %vm1057_vm3, %v14548_v3  ;;  %v8183_v3 = vsel %vm8181_vm8, %v14674_v59, %v14668_v18  ;;  %v11267_v59 = vld [vmem:[%s15669_s9] sm:$0xff] }
 0x2f4   : > { %v7105_v56 = vsel %vm7101_vm5, %v7092_v7, %v14439_v13  ;;  %v7104_v14 = vsel %vm7101_vm5, %v14400_v30, %v7092_v7  ;;  %v14814_v13 = vld [vmem:[%s15663_s3 + $0x138] sm:$0xff]  ;;  %v11268_v30 = vld [vmem:[%s15669_s9 + $0x8] sm:$0xff] }
 0x2f5   : > { %11723 = vmatmul.mubr.msk.f32.vlgmr.msra.gmra.mrb[8].mxu0 %vm1057_vm3, %v14788_v47  ;;  %12146 = vmatmul.mubr.msk.f32.vlgmr.msra.gmra.mrb[12].mxu1 %vm1057_vm3, %v14573_v6  ;;  %v10682_v6 = vld [vmem:[%s15664_s4] sm:$0xff] }
 0x2f6   : > { %7997 = vmatpush1.msra.mxu0 %v7826_v24  ;;  %11159 = vperm.xlu0 %12819, %v11141_v33   ;;  %v14816_v48 = vpop.permute.xlu1 %8533 }
 0x2f7   : > { %8202 = vmatprep.subr.mxu0 %v8183_v3  ;;  %7199 = vmatprep.subr.mxu1 %v7105_v56  ;;  %v14818_v37 = vpop.permute.xlu0 %8537  ;;  %v8546_v11 = vsel %vm8541_vm9, %v14816_v48, %v14790_v38  ;;  %v15027_v56 = vld [vmem:[%s15663_s3 + $0x168] sm:$0xff] }
 0x2f8   : > { %7912 = vmatprep.mubr.f32.mxu0 %v12916_v26  ;;  %7200 = vmatpush1.msra.mxu1 %v7104_v14  ;;  %v8547_v32 = vsel %vm8541_vm9, %v14790_v38, %v14818_v37 }
 0x2f9   : > { %11724 = vmatmul.mubr.msk.f32.gmra.mrb[10].mxu0 %vm1057_vm3, %v14814_v13  ;;  %7263 = vmatprep.mubr.f32.mxu1 %v12916_v26 }
 0x2fa   : > { %11705 = vmatmul.mubr.msk.f32.vlgmr.msra.gmra.mrb[8].mxu1 %vm1057_vm3, %v14634_v20  ;;  %11277 = vperm.xlu0 %12819, %v11268_v30   ;;  %v7452_v50 = vpop.permute.xlu1 %7451 }
 0x2fb   : > { %8060 = vmatprep.mubr.f32.mxu0 %v12916_v26  ;;  %v7100_v28 = vpop.permute.xlu0 %7099  ;;  %7269 = vmatprep.mubr.f32.mxu1 %v12916_v26  ;;  %v7465_v39 = vsel %vm7461_vm6, %v7452_v50, %v14524_v31  ;;  %v7464_v15 = vsel %vm7461_vm6, %v14510_v17, %v7452_v50  ;;  %v14868_v31 = vld [vmem:[%s15663_s3 + $0x140] sm:$0xff] }
 0x2fc   : > { %v7108_v1 = vsel %vm7101_vm5, %v14464_v0, %v7100_v28  ;;  %10686 = vperm.xlu1 %12820, %v10682_v6  }
 0x2fd   : > { %11727 = vmatmul.mubr.msk.f32.vlgmr.msra.gmra.mrb[12].mxu0 %vm1057_vm3, %v14788_v47  ;;  %12148 = vmatprep.subr.mxu1 %v7108_v1 }
 0x2fe   : > { %8203 = vmatpush1.msra.mxu0 %v8182_v25  ;;  %11706 = vmatmul.mubr.msk.f32.gmra.mrb[10].mxu1 %vm1057_vm3, %v14653_v58  ;;  %v14846_v52 = vpop.permute.xlu1 %8889  ;;  %v15069_v25 = vld [vmem:[%s15663_s3 + $0x170] sm:$0xff] }
 0x2ff   : > { %8356 = vmatprep.subr.mxu0 %v8187_v42  ;;  %8066 = vmatprep.mubr.f32.mxu0 %v12916_v26  ;;  %v14849_v0 = vpop.permute.xlu0 %8887 }
 0x300   : > { %12149 = vmatpush3.msra.mxu1 %v7108_v1  ;;  %12150 = vmatprep.mubr.msk.f32.mxu1 %vm1057_vm3, %v14634_v20  ;;  %v8903_v22 = vsel %vm8901_vm10, %v14849_v0, %v14846_v52 }
 0x301   : > { %11728 = vmatmul.mubr.msk.f32.gmra.mrb[14].mxu0 %vm1057_vm3, %v14814_v13  ;;  %7559 = vmatprep.subr.mxu1 %v7465_v39 }
 0x302   : > { %12151 = vmatmul.mubr.msk.f32.vlgmr.msra.gmra.mrb[12].mxu1 %vm1057_vm3, %v14653_v58  ;;  %8266 = vmatprep.mubr.f32.mxu0 %v12916_v26  ;;  %v7460_v45 = vpop.permute.xlu1 %7459  ;;  %v11140_v58 = vld [vmem:[%s15667_s7 + $0x10] sm:$0xff] }
 0x303   : > { %7560 = vmatpush1.msra.mxu1 %v7464_v15  ;;  %v14870_v20 = vpop.permute.xlu0 %8885  ;;  %7623 = vmatprep.mubr.f32.mxu1 %v12916_v26  ;;  %v7468_v17 = vsel %vm7461_vm6, %v14550_v19, %v7460_v45  ;;  %v14888_v19 = vld [vmem:[%s15663_s3 + $0x148] sm:$0xff] }
 0x304   : > { %12153 = vmatprep.subr.mxu1 %v7468_v17  ;;  %11144 = vperm.xlu1 %12820, %v11138_v51   ;;  %v8902_v23 = vsel %vm8901_vm10, %v14870_v20, %v14849_v0 }
 0x305   : > { %11733 = vmatmul.mubr.msk.f32.vlgmr.msra.gmra.mrb[8].mxu0 %vm1057_vm3, %v14868_v31 }
 0x306   : > { %8357 = vmatpush1.msra.mxu0 %v8186_v55  ;;  %11715 = vmatmul.mubr.msk.f32.vlgmr.msra.gmra.mrb[8].mxu1 %vm1057_vm3, %v14708_v12  ;;  %v14890_v10 = vpop.permute.xlu1 %8897 }
 0x307   : > { %8562 = vmatprep.subr.mxu0 %v8543_v40  ;;  %12154 = vmatpush3.msra.mxu1 %v7468_v17  ;;  %v14895_v34 = vpop.permute.xlu0 %8895 }
 0x308   : > { %8272 = vmatprep.mubr.f32.mxu0 %v12916_v26  ;;  %7629 = vmatprep.mubr.f32.mxu1 %v12916_v26 }
 0x309   : > { %11734 = vmatmul.mubr.msk.f32.gmra.mrb[10].mxu0 %vm1057_vm3, %v14888_v19  ;;  %11154 = vperm.xlu1 %12820, %v11140_v58  }
 0x30a   : > { %11716 = vmatmul.mubr.msk.f32.gmra.mrb[10].mxu1 %vm1057_vm3, %v14739_v53  ;;  %8420 = vmatprep.mubr.f32.mxu0 %v12916_v26  ;;  %v7812_v43 = vpop.permute.xlu1 %7811 }
 0x30b   : > { %v14907_v60 = vpop.permute.xlu0 %8893  ;;  %12155 = vmatprep.mubr.msk.f32.mxu1 %vm1057_vm3, %v14708_v12  ;;  %v7825_v61 = vsel %vm7821_vm7, %v7812_v43, %v14655_v5  ;;  %v7824_v54 = vsel %vm7821_vm7, %v14564_v46, %v7812_v43  ;;  %v11269_v46 = vld [vmem:[%s15669_s9 + $0x10] sm:$0xf] }
 0x30c   : > { %7919 = vmatprep.subr.mxu1 %v7825_v61 }
 0x30d   : > { %11737 = vmatmul.mubr.msk.f32.vlgmr.msra.gmra.mrb[12].mxu0 %vm1057_vm3, %v14868_v31  ;;  %11272 = vperm.xlu1 %12820, %v11267_v59   ;;  %v11771_v59 = vld [vmem:[%s15663_s3 + $0x180] sm:$0xff] }
 0x30e   : > { %8563 = vmatpush1.msra.mxu0 %v8542_v41  ;;  %12156 = vmatmul.mubr.msk.f32.vlgmr.msra.gmra.mrb[12].mxu1 %vm1057_vm3, %v14739_v53  ;;  %v14960_v53 = vld [vmem:[%s15663_s3 + $0x158] sm:$0xff] }
 0x30f   : > { %8716 = vmatprep.subr.mxu0 %v8547_v32  ;;  %7920 = vmatpush1.msra.mxu1 %v7824_v54  ;;  %v14928_v5 = vpop.permute.xlu1 %9249  ;;  %v14930_v12 = vpop.permute.xlu0 %9247  ;;  %v11772_v32 = vld [vmem:[%s15663_s3 + $0x188] sm:$0xff] }
 0x310   : > { %8426 = vmatprep.mubr.f32.mxu0 %v12916_v26  ;;  %7983 = vmatprep.mubr.f32.mxu1 %v12916_v26  ;;  %v9263_v33 = vsel %vm9261_vm11, %v14930_v12, %v14928_v5 }
 0x311   : > { %11738 = vmatmul.mubr.msk.f32.gmra.mrb[14].mxu0 %vm1057_vm3, %v14888_v19  ;;  %11282 = vperm.xlu1 %12820, %v11269_v46  }
 0x312   : > { %8626 = vmatprep.mubr.f32.mxu0 %v12916_v26  ;;  %11725 = vmatmul.mubr.msk.f32.vlgmr.msra.gmra.mrb[8].mxu1 %vm1057_vm3, %v14788_v47 }
 0x313   : > { %v7820_v35 = vpop.permute.xlu1 %7819  ;;  %v14944_v9 = vpop.permute.xlu0 %9245  ;;  %7989 = vmatprep.mubr.f32.mxu1 %v12916_v26 }
 0x314   : > { %v7828_v49 = vsel %vm7821_vm7, %v14621_v16, %v7820_v35 }
 0x315   : > { %11743 = vmatmul.mubr.msk.f32.vlgmr.msra.gmra.mrb[8].mxu0 %vm1057_vm3, %v14942_v36  ;;  %12158 = vmatprep.subr.mxu1 %v7828_v49 }
 0x316   : > { %8717 = vmatpush1.msra.mxu0 %v8546_v11  ;;  %12159 = vmatpush3.msra.mxu1 %v7828_v49 }
 0x317   : > { %8922 = vmatprep.subr.mxu0 %v8903_v22  ;;  %8632 = vmatprep.mubr.f32.mxu0 %v12916_v26  ;;  %v14963_v16 = vpop.permute.xlu1 %9255 }
 0x318   : > { %11726 = vmatmul.mubr.msk.f32.gmra.mrb[10].mxu1 %vm1057_vm3, %v14814_v13  ;;  %v8172_v4 = vpop.permute.xlu0 %8171 }
 0x319   : > { %11744 = vmatmul.mubr.msk.f32.gmra.mrb[10].mxu0 %vm1057_vm3, %v14960_v53  ;;  %12160 = vmatprep.mubr.msk.f32.mxu1 %vm1057_vm3, %v14788_v47  ;;  %v8185_v8 = vsel %vm8181_vm8, %v8172_v4, %v14730_v29  ;;  %v8184_v44 = vsel %vm8181_vm8, %v14668_v18, %v8172_v4  ;;  %v8907_v18 = vsel %vm8901_vm10, %v14895_v34, %v14890_v10  ;;  %v15005_v47 = vld [vmem:[%s15663_s3 + $0x160] sm:$0xff] }
 0x31a   : > { %8279 = vmatprep.subr.mxu1 %v8185_v8  ;;  %8780 = vmatprep.mubr.f32.mxu0 %v12916_v26 }
 0x31b   : > { %v14976_v2 = vpop.permute.xlu1 %9253 }
 0x31c   : > { %12161 = vmatmul.mubr.msk.f32.vlgmr.msra.gmra.mrb[12].mxu1 %vm1057_vm3, %v14814_v13  ;;  %v14980_v57 = vpop.permute.xlu0 %9257  ;;  %v9266_v51 = vsel %vm9261_vm11, %v14976_v2, %v14963_v16 }
 0x31d   : > { %8280 = vmatpush1.msra.mxu1 %v8184_v44  ;;  %11747 = vmatmul.mubr.msk.f32.vlgmr.msra.gmra.mrb[12].mxu0 %vm1057_vm3, %v14942_v36  ;;  %v11781_v44 = vld [vmem:[%s15663_s3 + $0x190] sm:$0xff] }
 0x31e   : > { %8923 = vmatpush1.msra.mxu0 %v8902_v23  ;;  %8786 = vmatprep.mubr.f32.mxu0 %v12916_v26 }
 0x31f   : > { %9076 = vmatprep.subr.mxu0 %v8907_v18  ;;  %8343 = vmatprep.mubr.f32.mxu1 %v12916_v26  ;;  %v14992_v29 = vpop.permute.xlu1 %9607 }
 0x320   : > { %v8180_v21 = vpop.permute.xlu0 %8179  ;;  %11735 = vmatmul.mubr.msk.f32.vlgmr.msra.gmra.mrb[8].mxu1 %vm1057_vm3, %v14868_v31 }
 0x321   : > { %11748 = vmatmul.mubr.msk.f32.gmra.mrb[14].mxu0 %vm1057_vm3, %v14960_v53  ;;  %v8188_v63 = vsel %vm8181_vm8, %v14741_v62, %v8180_v21  ;;  %8349 = vmatprep.mubr.f32.mxu1 %v12916_v26  ;;  %v8906_v62 = vsel %vm8901_vm10, %v14907_v60, %v14895_v34 }
 0x322   : > { %12163 = vmatprep.subr.mxu1 %v8188_v63  ;;  %8986 = vmatprep.mubr.f32.mxu0 %v12916_v26 }
 0x323   : > { %12164 = vmatpush3.msra.mxu1 %v8188_v63  ;;  %v15007_v38 = vpop.permute.xlu1 %9605 }
 0x324   : > { %v15009_v7 = vpop.permute.xlu0 %9609  ;;  %11736 = vmatmul.mubr.msk.f32.gmra.mrb[10].mxu1 %vm1057_vm3, %v14888_v19  ;;  %v9622_v40 = vsel %vm9621_vm12, %v15007_v38, %v14992_v29 }
 0x325   : > { %11753 = vmatmul.mubr.msk.f32.vlgmr.msra.gmra.mrb[8].mxu0 %vm1057_vm3, %v15005_v47  ;;  %12165 = vmatprep.mubr.msk.f32.mxu1 %vm1057_vm3, %v14868_v31  ;;  %v9623_v15 = vsel %vm9621_vm12, %v14992_v29, %v15009_v7  ;;  %v11782_v29 = vld [vmem:[%s15663_s3 + $0x198] sm:$0xff] }
 0x326   : > { %9077 = vmatpush1.msra.mxu0 %v8906_v62  ;;  %8992 = vmatprep.mubr.f32.mxu0 %v12916_v26 }
 0x327   : > { %9282 = vmatprep.subr.mxu0 %v9263_v33  ;;  %v15029_v24 = vpop.permute.xlu1 %9615 }
 0x328   : > { %v8532_v14 = vpop.permute.xlu0 %8531  ;;  %12166 = vmatmul.mubr.msk.f32.vlgmr.msra.gmra.mrb[12].mxu1 %vm1057_vm3, %v14888_v19 }
 0x329   : > { %11754 = vmatmul.mubr.msk.f32.gmra.mrb[10].mxu0 %vm1057_vm3, %v15027_v56  ;;  %v8544_v3 = vsel %vm8541_vm9, %v14774_v27, %v8532_v14  ;;  %v8545_v13 = vsel %vm8541_vm9, %v8532_v14, %v14816_v48  ;;  %8703 = vmatprep.mubr.f32.mxu1 %v12916_v26  ;;  %v9262_v27 = vsel %vm9261_vm11, %v14944_v9, %v14930_v12  ;;  %v10738_v14 = vld [vmem:[%s15665_s5 + $0x80] sm:$0xff] }
 0x32a   : > { %8639 = vmatprep.subr.mxu1 %v8545_v13  ;;  %9140 = vmatprep.mubr.f32.mxu0 %v12916_v26  ;;  %v9267_v48 = vsel %vm9261_vm11, %v14963_v16, %v14980_v57 }
 0x32b   : > { %8640 = vmatpush1.msra.mxu1 %v8544_v3  ;;  %v15041_v30 = vpop.permute.xlu1 %9613  ;;  %v10739_v3 = vld [vmem:[%s15665_s5 + $0x88] sm:$0xff] }
 0x32c   : > { %v15043_v6 = vpop.permute.xlu0 %9617  ;;  %11745 = vmatmul.mubr.msk.f32.vlgmr.msra.gmra.mrb[8].mxu1 %vm1057_vm3, %v14942_v36  ;;  %v9626_v54 = vsel %vm9621_vm12, %v15041_v30, %v15029_v24 }
 0x32d   : > { %11757 = vmatmul.mubr.msk.f32.vlgmr.msra.gmra.mrb[12].mxu0 %vm1057_vm3, %v15005_v47  ;;  %8709 = vmatprep.mubr.f32.mxu1 %v12916_v26  ;;  %v9627_v19 = vsel %vm9621_vm12, %v15029_v24, %v15043_v6 }
 0x32e   : > { %9283 = vmatpush1.msra.mxu0 %v9262_v27  ;;  %9146 = vmatprep.mubr.f32.mxu0 %v12916_v26  ;;  %v11792_v27 = vld [vmem:[%s15663_s3 + $0x1a8] sm:$0xff] }
 0x32f   : > { %9436 = vmatprep.subr.mxu0 %v9267_v48  ;;  %v8892_v50 = vpop.permute.xlu1 %8891  ;;  %v12260_v48 = vpack.c.bf16 %v10739_v3, %v10738_v14  ;;  %v10773_v14 = vld [vmem:[%s15665_s5 + $0x198] sm:$0xff] }
 0x330   : > { %v8540_v28 = vpop.permute.xlu0 %8539  ;;  %11746 = vmatmul.mubr.msk.f32.gmra.mrb[10].mxu1 %vm1057_vm3, %v14960_v53  ;;  %v8905_v0 = vsel %vm8901_vm10, %v8892_v50, %v14907_v60 }
 0x331   : > { %11758 = vmatmul.mubr.msk.f32.gmra.mrb[14].mxu0 %vm1057_vm3, %v15027_v56  ;;  %v8548_v1 = vsel %vm8541_vm9, %v14818_v37, %v8540_v28  ;;  %12170 = vmatprep.mubr.msk.f32.mxu1 %vm1057_vm3, %v14942_v36  ;;  %v8904_v37 = vsel %vm8901_vm10, %v14846_v52, %v8892_v50  ;;  %v11762_v52 = vld [vmem:[%s15663_s3 + $0x178] sm:$0xff]  ;;  %v10722_v50 = vld [vmem:[%s15665_s5] sm:$0xff]  ;;  %v10723_v28 = vld [vmem:[%s15665_s5 + $0x8] sm:$0xff] }
 0x332   : > { %12168 = vmatprep.subr.mxu1 %v8548_v1  ;;  %9346 = vmatprep.mubr.f32.mxu0 %v12916_v26 }
 0x333   : > { %12169 = vmatpush3.msra.mxu1 %v8548_v1  ;;  %v15071_v42 = vpop.permute.xlu1 %9969  ;;  %v10740_v1 = vld [vmem:[%s15665_s5 + $0x90] sm:$0xff] }
 0x334   : > { %v15077_v39 = vpop.permute.xlu0 %9967  ;;  %12171 = vmatmul.mubr.msk.f32.vlgmr.msra.gmra.mrb[12].mxu1 %vm1057_vm3, %v14960_v53  ;;  %8999 = vmatprep.subr.mxu1 %v8905_v0 }
 0x335   : > { %11763 = vmatmul.mubr.msk.f32.vlgmr.msra.gmra.mrb[8].mxu0 %vm1057_vm3, %v15069_v25  ;;  %9000 = vmatpush1.msra.mxu1 %v8904_v37  ;;  %v9983_v41 = vsel %vm9981_vm13, %v15077_v39, %v15071_v42  ;;  %v10724_v37 = vld [vmem:[%s15665_s5 + $0x10] sm:$0xff] }
 0x336   : > { %9437 = vmatpush1.msra.mxu0 %v9266_v51  ;;  %9352 = vmatprep.mubr.f32.mxu0 %v12916_v26  ;;  %v10742_v51 = vld [vmem:[%s15665_s5 + $0xa0] sm:$0xff] }
 0x337   : > { %9642 = vmatprep.subr.mxu0 %v9623_v15  ;;  %9063 = vmatprep.mubr.f32.mxu1 %v12916_v26  ;;  %v8900_v31 = vpop.permute.xlu1 %8899  ;;  %v10743_v15 = vld [vmem:[%s15665_s5 + $0xa8] sm:$0xff] }
 0x338   : > { %v9966_v45 = vpop.permute.xlu0 %9965  ;;  %11755 = vmatmul.mubr.msk.f32.vlgmr.msra.gmra.mrb[8].mxu1 %vm1057_vm3, %v15005_v47  ;;  %v8908_v20 = vsel %vm8901_vm10, %v14890_v10, %v8900_v31  ;;  %v12268_v31 = vpack.c.bf16 %v10743_v15, %v10742_v51  ;;  %v10774_v51 = vld [vmem:[%s15665_s5 + $0x1a0] sm:$0xff]  ;;  %v10775_v15 = vld [vmem:[%s15665_s5 + $0x1a8] sm:$0xff] }
 0x339   : > { %11764 = vmatmul.mubr.msk.f32.gmra.mrb[10].mxu0 %vm1057_vm3, %v11762_v52  ;;  %12173 = vmatprep.subr.mxu1 %v8908_v20  ;;  %v9982_v9 = vsel %vm9981_vm13, %v9966_v45, %v15077_v39  ;;  %v10725_v39 = vld [vmem:[%s15665_s5 + $0x18] sm:$0xff]  ;;  %v10726_v45 = vld [vmem:[%s15665_s5 + $0x20] sm:$0xff] }
 0x33a   : > { %12174 = vmatpush3.msra.mxu1 %v8908_v20  ;;  %9500 = vmatprep.mubr.f32.mxu0 %v12916_v26  ;;  %v10727_v20 = vld [vmem:[%s15665_s5 + $0x28] sm:$0xff] }
 0x33b   : > { %9069 = vmatprep.mubr.f32.mxu1 %v12916_v26  ;;  %v15101_v17 = vpop.permute.xlu1 %9977 }
 0x33c   : > { %v15103_v55 = vpop.permute.xlu0 %9975  ;;  %11756 = vmatmul.mubr.msk.f32.gmra.mrb[10].mxu1 %vm1057_vm3, %v15027_v56 }
 0x33d   : > { %11767 = vmatmul.mubr.msk.f32.vlgmr.msra.gmra.mrb[12].mxu0 %vm1057_vm3, %v15069_v25  ;;  %12175 = vmatprep.mubr.msk.f32.mxu1 %vm1057_vm3, %v15005_v47  ;;  %v9987_v22 = vsel %vm9981_vm13, %v15103_v55, %v15101_v17 }
 0x33e   : > { %9643 = vmatpush1.msra.mxu0 %v9622_v40  ;;  %9506 = vmatprep.mubr.f32.mxu0 %v12916_v26  ;;  %v12270_v40 = vpack.c.bf16 %v10727_v20, %v10726_v45 }
 0x33f   : > { %9796 = vmatprep.subr.mxu0 %v9627_v19  ;;  %v9252_v10 = vpop.permute.xlu1 %9251 }
 0x340   : > { %v9264_v58 = vsel %vm9261_vm11, %v14928_v5, %v9252_v10  ;;  %v9974_v34 = vpop.permute.xlu0 %9973  ;;  %12176 = vmatmul.mubr.msk.f32.vlgmr.msra.gmra.mrb[12].mxu1 %vm1057_vm3, %v15027_v56  ;;  %v9265_v43 = vsel %vm9261_vm11, %v9252_v10, %v14976_v2  ;;  %v11791_v56 = vld [vmem:[%s15663_s3 + $0x1a0] sm:$0xff]  ;;  %v10728_v10 = vld [vmem:[%s15665_s5 + $0x30] sm:$0xff] }
 0x341   : > { %11768 = vmatmul.mubr.msk.f32.gmra.mrb[14].mxu0 %vm1057_vm3, %v11762_v52  ;;  %9359 = vmatprep.subr.mxu1 %v9265_v43  ;;  %v9986_v2 = vsel %vm9981_vm13, %v9974_v34, %v15103_v55  ;;  %v10745_v55 = vld [vmem:[%s15665_s5 + $0xb8] sm:$0xff]  ;;  %v10747_v43 = vld [vmem:[%s15665_s5 + $0xc8] sm:$0xff] }
 0x342   : > { %9360 = vmatpush1.msra.mxu1 %v9264_v58  ;;  %9706 = vmatprep.mubr.f32.mxu0 %v12916_v26  ;;  %v10729_v58 = vld [vmem:[%s15665_s5 + $0x38] sm:$0xff] }
 0x343   : > { %9423 = vmatprep.mubr.f32.mxu1 %v12916_v26  ;;  %v15130_v60 = vpop.permute.xlu1 %10329 }
 0x344   : > { %v15132_v61 = vpop.permute.xlu0 %10327  ;;  %11765 = vmatmul.mubr.msk.f32.vlgmr.msra.gmra.mrb[8].mxu1 %vm1057_vm3, %v15069_v25 }
 0x345   : > { %11773 = vmatmul.mubr.msk.f32.vlgmr.msra.gmra.mrb[8].mxu0 %vm1057_vm3, %v11771_v59  ;;  %9429 = vmatprep.mubr.f32.mxu1 %v12916_v26  ;;  %v10343_v18 = vsel %vm10341_vm14, %v15132_v61, %v15130_v60 }
 0x346   : > { %9797 = vmatpush1.msra.mxu0 %v9626_v54  ;;  %9712 = vmatprep.mubr.f32.mxu0 %v12916_v26  ;;  %v10731_v54 = vld [vmem:[%s15665_s5 + $0x48] sm:$0xff] }
 0x347   : > { %10002 = vmatprep.subr.mxu0 %v9983_v41  ;;  %v9260_v46 = vpop.permute.xlu1 %9259  ;;  %v10748_v41 = vld [vmem:[%s15665_s5 + $0xd0] sm:$0xff] }
 0x348   : > { %v10326_v5 = vpop.permute.xlu0 %10325  ;;  %11766 = vmatmul.mubr.msk.f32.gmra.mrb[10].mxu1 %vm1057_vm3, %v11762_v52  ;;  %v9268_v12 = vsel %vm9261_vm11, %v14980_v57, %v9260_v46 }
 0x349   : > { %11774 = vmatmul.mubr.msk.f32.gmra.mrb[10].mxu0 %vm1057_vm3, %v11772_v32  ;;  %12178 = vmatprep.subr.mxu1 %v9268_v12 }
 0x34a   : > { %12179 = vmatpush3.msra.mxu1 %v9268_v12  ;;  %9860 = vmatprep.mubr.f32.mxu0 %v12916_v26  ;;  %v10732_v12 = vld [vmem:[%s15665_s5 + $0x50] sm:$0xff] }
 0x34b   : > { %12180 = vmatprep.mubr.msk.f32.mxu1 %vm1057_vm3, %v15069_v25  ;;  %v9620_v36 = vpop.permute.xlu1 %9619  ;;  %v10741_v25 = vld [vmem:[%s15665_s5 + $0x98] sm:$0xff] }
 0x34c   : > { %v9612_v35 = vpop.permute.xlu0 %9611  ;;  %12181 = vmatmul.mubr.msk.f32.vlgmr.msra.gmra.mrb[12].mxu1 %vm1057_vm3, %v11762_v52  ;;  %v9628_v4 = vsel %vm9621_vm12, %v15043_v6, %v9620_v36  ;;  %v12264_v0 = vpack.c.bf16 %v10741_v25, %v10740_v1  ;;  %v12266_v52 = vpack.c.bf16 %v10725_v39, %v10724_v37  ;;  %v10733_v36 = vld [vmem:[%s15665_s5 + $0x58] sm:$0xff] }
 0x34d   : > { %11777 = vmatmul.mubr.msk.f32.vlgmr.msra.gmra.mrb[12].mxu0 %vm1057_vm3, %v11771_v59  ;;  %v9624_v49 = vsel %vm9621_vm12, %v15009_v7, %v9612_v35  ;;  %v9625_v11 = vsel %vm9621_vm12, %v9612_v35, %v15041_v30  ;;  %9783 = vmatprep.mubr.f32.mxu1 %v12916_v26  ;;  %v10342_v7 = vsel %vm10341_vm14, %v10326_v5, %v15132_v61  ;;  %v10730_v61 = vld [vmem:[%s15665_s5 + $0x40] sm:$0xff] }
 0x34e   : > { %10003 = vmatpush1.msra.mxu0 %v9982_v9  ;;  %9719 = vmatprep.subr.mxu1 %v9625_v11  ;;  %v12278_v46 = vpack.c.bf16 %v10731_v54, %v10730_v61  ;;  %v10750_v35 = vld [vmem:[%s15665_s5 + $0xe0] sm:$0xff]  ;;  %v10751_v9 = vld [vmem:[%s15665_s5 + $0xe8] sm:$0xff] }
 0x34f   : > { %10156 = vmatprep.subr.mxu0 %v9987_v22  ;;  %9866 = vmatprep.mubr.f32.mxu0 %v12916_v26  ;;  %v9980_v53 = vpop.permute.xlu1 %9979  ;;  %v12284_v11 = vpack.c.bf16 %v10751_v9, %v10750_v35  ;;  %v10734_v22 = vld [vmem:[%s15665_s5 + $0x60] sm:$0xff]  ;;  %v10779_v35 = vld [vmem:[%s15665_s5 + $0x1c8] sm:$0xff] }
 0x350   : > { %9720 = vmatpush1.msra.mxu1 %v9624_v49  ;;  %v9972_v16 = vpop.permute.xlu0 %9971  ;;  %v9988_v63 = vsel %vm9981_vm13, %v15101_v17, %v9980_v53  ;;  %v10744_v17 = vld [vmem:[%s15665_s5 + $0xb0] sm:$0xff]  ;;  %v12282_v49 = vpack.c.bf16 %v10733_v36, %v10732_v12  ;;  %v10735_v53 = vld [vmem:[%s15665_s5 + $0x68] sm:$0xff]  ;;  %v10761_v12 = vld [vmem:[%s15665_s5 + $0x138] sm:$0xff] }
 0x351   : > { %11778 = vmatmul.mubr.msk.f32.gmra.mrb[14].mxu0 %vm1057_vm3, %v11772_v32  ;;  %11775 = vmatmul.mubr.msk.f32.vlgmr.msra.gmra.mrb[8].mxu1 %vm1057_vm3, %v11771_v59  ;;  %v9985_v8 = vsel %vm9981_vm13, %v9972_v16, %v9974_v34  ;;  %v9984_v21 = vsel %vm9981_vm13, %v15071_v42, %v9972_v16  ;;  %v12262_v42 = vpack.c.bf16 %v10723_v28, %v10722_v50  ;;  %v10746_v34 = vld [vmem:[%s15665_s5 + $0xc0] sm:$0xff] }
 0x352   : > { %12183 = vmatprep.subr.mxu1 %v9628_v4  ;;  %10066 = vmatprep.mubr.f32.mxu0 %v12916_v26  ;;  %v12272_v19 = vpack.c.bf16 %v10745_v55, %v10744_v17  ;;  %v12286_v16 = vpack.c.bf16 %v10735_v53, %v10734_v22  ;;  %v10778_v36 = vld [vmem:[%s15665_s5 + $0x1c0] sm:$0xff]  ;;  %v10763_v22 = vld [vmem:[%s15665_s5 + $0x148] sm:$0xff]  ;;  %v10780_v53 = vld [vmem:[%s15665_s5 + $0x1d0] sm:$0xff] }
 0x353   : > { %12184 = vmatpush3.msra.mxu1 %v9628_v4  ;;  %9789 = vmatprep.mubr.f32.mxu1 %v12916_v26  ;;  %v10334_v57 = vpop.permute.xlu1 %10333  ;;  %v10752_v4 = vld [vmem:[%s15665_s5 + $0xf0] sm:$0xff] }
 0x354   : > { %10079 = vmatprep.subr.mxu1 %v9985_v8  ;;  %v10332_v23 = vpop.permute.xlu0 %10331  ;;  %v10753_v8 = vld [vmem:[%s15665_s5 + $0xf8] sm:$0xff] }
 0x355   : > { %11783 = vmatmul.mubr.msk.f32.vlgmr.msra.gmra.mrb[8].mxu0 %vm1057_vm3, %v11781_v44  ;;  %11776 = vmatmul.mubr.msk.f32.gmra.mrb[10].mxu1 %vm1057_vm3, %v11772_v32  ;;  %v10345_v33 = vsel %vm10341_vm14, %v10332_v23, %v10334_v57  ;;  %v10344_v13 = vsel %vm10341_vm14, %v15130_v60, %v10332_v23  ;;  %v12276_v60 = vpack.c.bf16 %v10747_v43, %v10746_v34  ;;  %v10759_v34 = vld [vmem:[%s15665_s5 + $0x128] sm:$0xff]  ;;  %v10776_v43 = vld [vmem:[%s15665_s5 + $0x1b0] sm:$0xff] }
 0x356   : > { %10157 = vmatpush1.msra.mxu0 %v9986_v2  ;;  %10072 = vmatprep.mubr.f32.mxu0 %v12916_v26  ;;  %v10736_v2 = vld [vmem:[%s15665_s5 + $0x70] sm:$0xff] }
 0x357   : > { %10362 = vmatprep.subr.mxu0 %v10343_v18  ;;  %12185 = vmatprep.mubr.msk.f32.mxu1 %vm1057_vm3, %v11771_v59  ;;  %v10338_v47 = vpop.permute.xlu1 %10337  ;;  %v12274_v59 = vpack.c.bf16 %v10729_v58, %v10728_v10  ;;  %v10770_v18 = vld [vmem:[%s15665_s5 + $0x180] sm:$0xff]  ;;  %v12300_v10 = vpack.c.bf16 %v10775_v15, %v10774_v51  ;;  %v10788_v51 = vld [vmem:[%s15665_s5 + $0x210] sm:$0xff]  ;;  %v10789_v15 = vld [vmem:[%s15665_s5 + $0x218] sm:$0xff] }
 0x358   : > { %v10336_v38 = vpop.permute.xlu0 %10335  ;;  %v10758_v58 = vld [vmem:[%s15665_s5 + $0x120] sm:$0xff] }
 0x359   : > { %11784 = vmatmul.mubr.msk.f32.gmra.mrb[10].mxu0 %vm1057_vm3, %v11782_v29  ;;  %12186 = vmatmul.mubr.msk.f32.vlgmr.msra.gmra.mrb[12].mxu1 %vm1057_vm3, %v11772_v32  ;;  %v10347_v62 = vsel %vm10341_vm14, %v10336_v38, %v10338_v47  ;;  %v10346_v30 = vsel %vm10341_vm14, %v10334_v57, %v10336_v38  ;;  %v10749_v32 = vld [vmem:[%s15665_s5 + $0xd8] sm:$0xff]  ;;  %v12302_v54 = vpack.c.bf16 %v10759_v34, %v10758_v58  ;;  %v10791_v58 = vld [vmem:[%s15665_s5 + $0x228] sm:$0xff] }
 0x35a   : > { %10080 = vmatpush1.msra.mxu1 %v9984_v21  ;;  %10220 = vmatprep.mubr.f32.mxu0 %v12916_v26  ;;  %v12280_v5 = vpack.c.bf16 %v10749_v32, %v10748_v41  ;;  %v10737_v57 = vld [vmem:[%s15665_s5 + $0x78] sm:$0xff] }
 0x35b   : > { %12188 = vmatprep.subr.mxu1 %v9988_v63  ;;  %10143 = vmatprep.mubr.f32.mxu1 %v12916_v26  ;;  %v12290_v23 = vpack.c.bf16 %v10737_v57, %v10736_v2  ;;  %v10765_v2 = vld [vmem:[%s15665_s5 + $0x158] sm:$0xff]  ;;  %v10782_v57 = vld [vmem:[%s15665_s5 + $0x1e0] sm:$0xff] }
 0x35c   : > { %v10340_v24 = vpop.permute.xlu0 %10339 }
 0x35d   : > { %11787 = vmatmul.mubr.msk.f32.vlgmr.msra.gmra.mrb[12].mxu0 %vm1057_vm3, %v11781_v44  ;;  %11785 = vmatmul.mubr.msk.f32.vlgmr.msra.gmra.mrb[8].mxu1 %vm1057_vm3, %v11781_v44  ;;  %v10348_v6 = vsel %vm10341_vm14, %v10338_v47, %v10340_v24  ;;  %v10772_v24 = vld [vmem:[%s15665_s5 + $0x190] sm:$0xff] }
 0x35e   : > { %10363 = vmatpush1.msra.mxu0 %v10342_v7  ;;  %12189 = vmatpush3.msra.mxu1 %v9988_v63  ;;  %v12296_v25 = vpack.c.bf16 %v10773_v14, %v10772_v24  ;;  %v10769_v24 = vld [vmem:[%s15665_s5 + $0x178] sm:$0xff]  ;;  %v10802_v14 = vld [vmem:[%s15665_s5 + $0x280] sm:$0xff] }
 0x35f   : > { %10516 = vmatprep.subr.mxu0 %v10347_v62  ;;  %10439 = vmatprep.subr.mxu1 %v10345_v33  ;;  %v10754_v62 = vld [vmem:[%s15665_s5 + $0x100] sm:$0xff]  ;;  %v10755_v33 = vld [vmem:[%s15665_s5 + $0x108] sm:$0xff] }
 0x360   : > { %10226 = vmatprep.mubr.f32.mxu0 %v12916_v26  ;;  %10149 = vmatprep.mubr.f32.mxu1 %v12916_v26 }
 0x361   : > { %11788 = vmatmul.mubr.msk.f32.gmra.mrb[14].mxu0 %vm1057_vm3, %v11782_v29  ;;  %11786 = vmatmul.mubr.msk.f32.gmra.mrb[10].mxu1 %vm1057_vm3, %v11782_v29 }
 0x362   : > { %10426 = vmatprep.mubr.f32.mxu0 %v12916_v26  ;;  %12190 = vmatprep.mubr.msk.f32.mxu1 %vm1057_vm3, %v11781_v44  ;;  %v12288_v44 = vpack.c.bf16 %v10753_v8, %v10752_v4 }
 0x365   : > { %11793 = vmatmul.mubr.msk.f32.vlgmr.msra.gmra.mrb[8].mxu0 %vm1057_vm3, %v11791_v56  ;;  %12191 = vmatmul.mubr.msk.f32.vlgmr.msra.gmra.mrb[12].mxu1 %vm1057_vm3, %v11782_v29  ;;  %v10771_v29 = vld [vmem:[%s15665_s5 + $0x188] sm:$0xff] }
 0x366   : > { %10517 = vmatpush1.msra.mxu0 %v10346_v30  ;;  %10440 = vmatpush1.msra.mxu1 %v10344_v13  ;;  %v12292_v21 = vpack.c.bf16 %v10771_v29, %v10770_v18 }
 0x367   : > { %12193 = vmatprep.subr.mxu1 %v10348_v6  ;;  %10432 = vmatprep.mubr.f32.mxu0 %v12916_v26 }
 0x368   : > { %10503 = vmatprep.mubr.f32.mxu1 %v12916_v26 }
 0x369   : > { %11794 = vmatmul.mubr.msk.f32.gmra.mrb[10].mxu0 %vm1057_vm3, %v11792_v27  ;;  %11795 = vmatmul.mubr.msk.f32.vlgmr.msra.gmra.mrb[8].mxu1 %vm1057_vm3, %v11791_v56 }
 0x36a   : > { %12194 = vmatpush3.msra.mxu1 %v10348_v6  ;;  %10580 = vmatprep.mubr.f32.mxu0 %v12916_v26 }
 0x36b   : > { %10509 = vmatprep.mubr.f32.mxu1 %v12916_v26  ;;  %12261 = vmatprep.subr.bf16.mxu1 %v12260_v48 }
 0x36d   : > { %11797 = vmatmul.mubr.msk.f32.vlgmr.msra.gmra.mrb[12].mxu0 %vm1057_vm3, %v11791_v56  ;;  %11796 = vmatmul.mubr.msk.f32.gmra.mrb[10].mxu1 %vm1057_vm3, %v11792_v27  ;;  %v15352_v3 = vpop.permute.xlu0 %10691 }
 0x36e   : > { %10586 = vmatprep.mubr.f32.mxu0 %v12916_v26  ;;  %12195 = vmatprep.mubr.msk.f32.mxu1 %vm1057_vm3, %v11791_v56 }
 0x371   : > { %11798 = vmatmul.mubr.msk.f32.gmra.mrb[14].mxu0 %vm1057_vm3, %v11792_v27  ;;  %12196 = vmatmul.mubr.msk.f32.vlgmr.msra.gmra.mrb[12].mxu1 %vm1057_vm3, %v11792_v27  ;;  %v12294_v27 = vpack.c.bf16 %v10755_v33, %v10754_v62  ;;  %vm11162_vm3 = vcmask 130048  }
 0x372   : > { %12263 = vmatpush3.bf16.msra.mxu1 %v12262_v42  ;;  %v10756_v42 = vld [vmem:[%s15665_s5 + $0x110] sm:$0xff] }
 0x373   : > { %12265 = vmatprep.subr.bf16.mxu1 %v12264_v0  ;;  %v10757_v0 = vld [vmem:[%s15665_s5 + $0x118] sm:$0xff] }
 0x374   : > { %v12298_v17 = vpack.c.bf16 %v10757_v0, %v10756_v42 }
 0x376   : > { %12267 = vmatpush3.bf16.msra.mxu1 %v12266_v52 }
 0x377   : > { %12269 = vmatprep.subr.bf16.mxu1 %v12268_v31 }
 0x37a   : > { %12271 = vmatpush3.bf16.msra.mxu1 %v12270_v40 }
 0x37b   : > { %12273 = vmatprep.subr.bf16.mxu1 %v12272_v19  ;;  %v15336_v63 = vpop.permute.xlu1 %10686 }
 0x37e   : > { %12275 = vmatpush3.bf16.msra.mxu1 %v12274_v59  ;;  %v10777_v59 = vld [vmem:[%s15665_s5 + $0x1b8] sm:$0xff] }
 0x37f   : > { %12277 = vmatprep.subr.bf16.mxu1 %v12276_v60 }
 0x382   : > { %12279 = vmatpush3.bf16.msra.mxu1 %v12278_v46  ;;  %v12304_v46 = vpack.c.bf16 %v10777_v59, %v10776_v43  ;;  %v10808_v43 = vld [vmem:[%s15665_s5 + $0x2b0] sm:$0xff]  ;;  %v10809_v59 = vld [vmem:[%s15665_s5 + $0x2b8] sm:$0xff] }
 0x383   : > { %12281 = vmatprep.subr.bf16.mxu1 %v12280_v5  ;;  %v10760_v5 = vld [vmem:[%s15665_s5 + $0x130] sm:$0xff] }
 0x384   : > { %v12306_v9 = vpack.c.bf16 %v10761_v12, %v10760_v5  ;;  %v10792_v5 = vld [vmem:[%s15665_s5 + $0x230] sm:$0xff]  ;;  %v10793_v12 = vld [vmem:[%s15665_s5 + $0x238] sm:$0xff] }
 0x386   : > { %12283 = vmatpush3.bf16.msra.mxu1 %v12282_v49  ;;  %v12308_v49 = vpack.c.bf16 %v10779_v35, %v10778_v36  ;;  %v10810_v36 = vld [vmem:[%s15665_s5 + $0x2c0] sm:$0xff]  ;;  %v10811_v35 = vld [vmem:[%s15665_s5 + $0x2c8] sm:$0xff] }
 0x387   : > { %12285 = vmatprep.subr.bf16.mxu1 %v12284_v11  ;;  %v10762_v11 = vld [vmem:[%s15665_s5 + $0x140] sm:$0xff] }
 0x388   : > { %v12310_v4 = vpack.c.bf16 %v10763_v22, %v10762_v11  ;;  %v10794_v11 = vld [vmem:[%s15665_s5 + $0x240] sm:$0xff]  ;;  %v10795_v22 = vld [vmem:[%s15665_s5 + $0x248] sm:$0xff] }
 0x38a   : > { %12287 = vmatpush3.bf16.msra.mxu1 %v12286_v16  ;;  %v10781_v16 = vld [vmem:[%s15665_s5 + $0x1d8] sm:$0xff] }
 0x38b   : > { %12289 = vmatprep.subr.bf16.mxu1 %v12288_v44  ;;  %v12312_v8 = vpack.c.bf16 %v10781_v16, %v10780_v53  ;;  %v10764_v44 = vld [vmem:[%s15665_s5 + $0x150] sm:$0xff]  ;;  %v10813_v16 = vld [vmem:[%s15665_s5 + $0x2d8] sm:$0xff] }
 0x38c   : > { %v12314_v18 = vpack.c.bf16 %v10765_v2, %v10764_v44  ;;  %v10812_v53 = vld [vmem:[%s15665_s5 + $0x2d0] sm:$0xff]  ;;  %v10797_v2 = vld [vmem:[%s15665_s5 + $0x258] sm:$0xff] }
 0x38d   : > { %v10796_v44 = vld [vmem:[%s15665_s5 + $0x250] sm:$0xff] }
 0x38e   : > { %12291 = vmatpush3.bf16.msra.mxu1 %v12290_v23  ;;  %v10783_v23 = vld [vmem:[%s15665_s5 + $0x1e8] sm:$0xff] }
 0x38f   : > { %12293 = vmatprep.subr.bf16.mxu1 %v12292_v21  ;;  %v12316_v29 = vpack.c.bf16 %v10783_v23, %v10782_v57  ;;  %v10766_v21 = vld [vmem:[%s15665_s5 + $0x160] sm:$0xff]  ;;  %v10815_v23 = vld [vmem:[%s15665_s5 + $0x2e8] sm:$0xff] }
 0x390   : > { %v10814_v57 = vld [vmem:[%s15665_s5 + $0x2e0] sm:$0xff] }
 0x438   : > { %v10428_v47 = vpop.f32.mrb[8].mxu0 }
 0x439   : > { %v10694_v38 = vadd.f32 %v15336_v63, %v10428_v47  ;;  %v10430_v7 = vpop.f32.mrb[9].mxu0  ;;  %v10767_v47 = vld [vmem:[%s15665_s5 + $0x168] sm:$0xff] }
 0x43a   : > { %v10695_v56 = vadd.f32 %v15336_v63, %v10430_v7  ;;  %v10785_v7 = vld [vmem:[%s15665_s5 + $0x1f8] sm:$0xff]  ;;  %v12318_v62 = vpack.c.bf16 %v10767_v47, %v10766_v21  ;;  %v10798_v21 = vld [vmem:[%s15665_s5 + $0x260] sm:$0xff]  ;;  %v10799_v47 = vld [vmem:[%s15665_s5 + $0x268] sm:$0xff] }
 0x43b   : > { %v10708_v48 = vmax.f32 %v10694_v38, 0.0  ;;  %v10784_v38 = vld [vmem:[%s15665_s5 + $0x1f0] sm:$0xff] }
 0x43c   : > { %v10709_v13 = vmax.f32 %v10695_v56, 0.0  ;;  %v10434_v30 = vpop.f32.mrb[10].mxu0  ;;  %v15354_v6 = vpop.f32.mrb[8].mxu1  ;;  %v12320_v33 = vpack.c.bf16 %v10785_v7, %v10784_v38  ;;  %v10768_v56 = vld [vmem:[%s15665_s5 + $0x170] sm:$0xff]  ;;  %v10817_v7 = vld [vmem:[%s15665_s5 + $0x2f8] sm:$0xff] }
 0x43d   : > { %v10701_v50 = vadd.f32 %v15352_v3, %v10434_v30  ;;  %v10436_v28 = vpop.f32.mrb[11].mxu0  ;;  %v10507_v1 = vpop.f32.mrb[9].mxu1  ;;  %v12322_v30 = vpack.c.bf16 %v10769_v24, %v10768_v56  ;;  %v10816_v38 = vld [vmem:[%s15665_s5 + $0x2f0] sm:$0xff]  ;;  %v10801_v24 = vld [vmem:[%s15665_s5 + $0x278] sm:$0xff] }
 0x43e   : > { %v10702_v37 = vadd.f32 %v15352_v3, %v10436_v28  ;;  %v10697_v39 = vadd.f32 %v15336_v63, %v10507_v1  ;;  %10898 = vmatprep.mubr.f32.mxu1 %v10709_v13  ;;  %v10803_v13 = vld [vmem:[%s15665_s5 + $0x288] sm:$0xff]  ;;  %v10800_v56 = vld [vmem:[%s15665_s5 + $0x270] sm:$0xff] }
 0x43f   : > { %10899 = vmatmul.mubr.f32.vlgmr.msra.gmra.mrb[14].mxu1 %v10708_v48  ;;  %v10715_v55 = vmax.f32 %v10701_v50, 0.0  ;;  %v12324_v48 = vpack.c.bf16 %v10803_v13, %v10802_v14  ;;  %v10786_v50 = vld [vmem:[%s15665_s5 + $0x200] sm:$0xff]  ;;  %v10787_v28 = vld [vmem:[%s15665_s5 + $0x208] sm:$0xff] }
 0x440   : > { %v10716_v52 = vmax.f32 %v10702_v37, 0.0  ;;  %v10711_v31 = vmax.f32 %v10697_v39, 0.0  ;;  %12295 = vmatpush3.bf16.msra.mxu1 %v12294_v27  ;;  %v15371_v45 = vpop.f32.mrb[12].mxu0  ;;  %v15373_v20 = vpop.f32.mrb[10].mxu1  ;;  %v10696_v27 = vadd.f32 %v15336_v63, %v15354_v6  ;;  %v10805_v6 = vld [vmem:[%s15665_s5 + $0x298] sm:$0xff]  ;;  %v12326_v42 = vpack.c.bf16 %v10787_v28, %v10786_v50  ;;  %v10818_v14 = vld [vmem:[%s15665_s5 + $0x300] sm:$0xff] }
 0x441   : > { %v15375_v40 = vpop.f32.mrb[13].mxu0  ;;  %v10513_v19 = vpop.f32.mrb[11].mxu1  ;;  %12297 = vmatprep.subr.bf16.mxu1 %v12296_v25  ;;  %v10804_v25 = vld [vmem:[%s15665_s5 + $0x290] sm:$0xff]  ;;  %v10703_v37 = vadd.f32 %v15352_v3, %v15373_v20  ;;  %v10807_v20 = vld [vmem:[%s15665_s5 + $0x2a8] sm:$0xff] }
 0x442   : > { %10903 = vmatprep.mubr.f32.mxu1 %v10716_v52  ;;  %v10704_v1 = vadd.f32 %v15352_v3, %v10513_v19  ;;  %v10710_v0 = vmax.f32 %v10696_v27, 0.0  ;;  %v12328_v39 = vpack.c.bf16 %v10805_v6, %v10804_v25  ;;  %v10699_v52 = vadd.f32 %v15336_v63, %v15375_v40  ;;  %v10790_v40 = vld [vmem:[%s15665_s5 + $0x220] sm:$0xff]  ;;  %v10819_v13 = vld [vmem:[%s15665_s5 + $0x308] sm:$0xff]  ;;  %v10820_v28 = vld [vmem:[%s15665_s5 + $0x310] sm:$0xff] }
 0x443   : > { %10904 = vmatmul.mubr.f32.gmra.mrb[16].mxu1 %v10715_v55  ;;  %v12330_v55 = vpack.c.bf16 %v10789_v15, %v10788_v51  ;;  %v10717_v19 = vmax.f32 %v10703_v37, 0.0  ;;  %v10698_v27 = vadd.f32 %v15336_v63, %v15371_v45  ;;  %v10823_v37 = vld [vmem:[%s15665_s5 + $0x328] sm:$0xff]  ;;  %v10824_v15 = vld [vmem:[%s15665_s5 + $0x330] sm:$0xff] }
 0x444   : > { %12299 = vmatpush3.bf16.msra.mxu1 %v12298_v17  ;;  %v15389_v60 = vpop.f32.mrb[14].mxu0  ;;  %10973 = vmatprep.mubr.f32.mxu1 %v10711_v31  ;;  %v15391_v61 = vpop.f32.mrb[12].mxu1  ;;  %v10718_v31 = vmax.f32 %v10704_v1, 0.0  ;;  %v10806_v17 = vld [vmem:[%s15665_s5 + $0x2a0] sm:$0xff]  ;;  %v10713_v34 = vmax.f32 %v10699_v52, 0.0  ;;  %v10821_v1 = vld [vmem:[%s15665_s5 + $0x318] sm:$0xff] }
 0x445   : > { %v15393_v41 = vpop.f32.mrb[15].mxu0  ;;  %v15395_v32 = vpop.f32.mrb[13].mxu1  ;;  %12301 = vmatprep.subr.bf16.mxu1 %v12300_v10  ;;  %v12332_v10 = vpack.c.bf16 %v10807_v20, %v10806_v17  ;;  %v10712_v25 = vmax.f32 %v10698_v27, 0.0  ;;  %v10705_v6 = vadd.f32 %v15352_v3, %v15389_v60  ;;  %v12360_v45 = vpack.c.bf16 %v10821_v1, %v10820_v28  ;;  %v10826_v52 = vld [vmem:[%s15665_s5 + $0x340] sm:$0xff]  ;;  %v10828_v20 = vld [vmem:[%s15665_s5 + $0x350] sm:$0xff] }
 0x446   : > { %v10706_v50 = vadd.f32 %v15352_v3, %v15393_v41  ;;  %v10822_v41 = vld [vmem:[%s15665_s5 + $0x320] sm:$0xff]  ;;  %v12944_v27 = vmov 0.0|0.0  }
 0x447   : > { %v12364_v60 = vpack.c.bf16 %v10823_v37, %v10822_v41 }
 0x448   : > { %12303 = vmatpush3.bf16.msra.mxu1 %v12302_v54  ;;  %v12334_v54 = vpack.c.bf16 %v10791_v58, %v10790_v40  ;;  %v10831_v40 = vld [vmem:[%s15665_s5 + $0x368] sm:$0xff] }
 0x449   : > { %12305 = vmatprep.subr.bf16.mxu1 %v12304_v46  ;;  %v12336_v46 = vpack.c.bf16 %v10809_v59, %v10808_v43  ;;  %v10833_v43 = vld [vmem:[%s15665_s5 + $0x378] sm:$0xff] }
 0x44c   : > { %12307 = vmatpush3.bf16.msra.mxu1 %v12306_v9  ;;  %v12338_v9 = vpack.c.bf16 %v10793_v12, %v10792_v5  ;;  %v11134_v5 = vld [vmem:[%s15666_s6] sm:$0xff] }
 0x44d   : > { %12309 = vmatprep.subr.bf16.mxu1 %v12308_v49  ;;  %v12340_v49 = vpack.c.bf16 %v10811_v35, %v10810_v36  ;;  %12237 = vmatprep.mubr.msk.f32.mxu0 %vm11162_vm3, %v11134_v5 }
 0x450   : > { %12311 = vmatpush3.bf16.msra.mxu1 %v12310_v4  ;;  %v12342_v4 = vpack.c.bf16 %v10795_v22, %v10794_v11 }
 0x451   : > { %12313 = vmatprep.subr.bf16.mxu1 %v12312_v8  ;;  %v12344_v8 = vpack.c.bf16 %v10813_v16, %v10812_v53 }
 0x454   : > { %12315 = vmatpush3.bf16.msra.mxu1 %v12314_v18  ;;  %v12346_v18 = vpack.c.bf16 %v10797_v2, %v10796_v44 }
 0x455   : > { %12317 = vmatprep.subr.bf16.mxu1 %v12316_v29  ;;  %v12348_v29 = vpack.c.bf16 %v10815_v23, %v10814_v57 }
 0x458   : > { %12319 = vmatpush3.bf16.msra.mxu1 %v12318_v62  ;;  %v12350_v62 = vpack.c.bf16 %v10799_v47, %v10798_v21 }
 0x459   : > { %12321 = vmatprep.subr.bf16.mxu1 %v12320_v33  ;;  %v12352_v33 = vpack.c.bf16 %v10817_v7, %v10816_v38 }
 0x45c   : > { %12323 = vmatpush3.bf16.msra.mxu1 %v12322_v30  ;;  %v12354_v30 = vpack.c.bf16 %v10801_v24, %v10800_v56 }
 0x45d   : > { %12325 = vmatprep.subr.bf16.mxu1 %v12324_v48  ;;  %v12356_v48 = vpack.c.bf16 %v10819_v13, %v10818_v14  ;;  %v11135_v14 = vld [vmem:[%s15666_s6 + $0x8] sm:$0xff]  ;;  %v11136_v13 = vld [vmem:[%s15666_s6 + $0x10] sm:$0xff] }
 0x45f   : > { %10974 = vmatmul.mubr.f32.vlgmr.msra.gmra.mrb[18].mxu1 %v10710_v0  ;;  %v10700_v0 = vadd.f32 %v15336_v63, %v15395_v32  ;;  %v10825_v63 = vld [vmem:[%s15665_s5 + $0x338] sm:$0xff] }
 0x460   : > { %10978 = vmatprep.mubr.f32.mxu1 %v10718_v31  ;;  %12327 = vmatpush3.bf16.msra.mxu1 %v12326_v42  ;;  %v10720_v42 = vmax.f32 %v10706_v50, 0.0  ;;  %v12368_v32 = vpack.c.bf16 %v10825_v63, %v10824_v15  ;;  %v10827_v31 = vld [vmem:[%s15665_s5 + $0x348] sm:$0xff]  ;;  %v11145_v50 = vpop.permute.xlu1 %11144 }
 0x461   : > { %12329 = vmatprep.subr.bf16.mxu1 %v12328_v39  ;;  %v10719_v39 = vmax.f32 %v10705_v6, 0.0  ;;  %v10714_v51 = vmax.f32 %v10700_v0, 0.0  ;;  %v12372_v17 = vpack.c.bf16 %v10827_v31, %v10826_v52  ;;  %v11264_v31 = vld [vmem:[%s15668_s8] sm:$0xff] }
 0x463   : > { %10979 = vmatmul.mubr.f32.gmra.mrb[20].mxu1 %v10717_v19 }
 0x464   : > { %12331 = vmatpush3.bf16.msra.mxu1 %v12330_v55  ;;  %11048 = vmatprep.mubr.f32.mxu1 %v10713_v34  ;;  %v10829_v55 = vld [vmem:[%s15665_s5 + $0x358] sm:$0xff]  ;;  %v10832_v34 = vld [vmem:[%s15665_s5 + $0x370] sm:$0xff]  ;;  %v11155_v37 = vpop.permute.xlu1 %11154 }
 0x465   : > { %12333 = vmatprep.subr.bf16.mxu1 %v12332_v10  ;;  %v12376_v19 = vpack.c.bf16 %v10829_v55, %v10828_v20  ;;  %v10830_v10 = vld [vmem:[%s15665_s5 + $0x360] sm:$0xff]  ;;  %v12384_v59 = vpack.c.bf16 %v10833_v43, %v10832_v34  ;;  %v11266_v20 = vld [vmem:[%s15668_s8 + $0x10] sm:$0xf] }
 0x466   : > { %v12380_v58 = vpack.c.bf16 %v10831_v40, %v10830_v10 }
 0x468   : > { %12335 = vmatpush3.bf16.msra.mxu1 %v12334_v54  ;;  %v10707_v54 = vadd.f32 %v15391_v61, %v15352_v3  ;;  %v11273_v55 = vpop.permute.xlu1 %11272 }
 0x469   : > { %12337 = vmatprep.subr.bf16.mxu1 %v12336_v46 }
 0x46a   : > { %v10721_v46 = vmax.f32 %v10707_v54, 0.0 }
 0x46c   : > { %12339 = vmatpush3.bf16.msra.mxu1 %v12338_v9 }
 0x46d   : > { %12341 = vmatprep.subr.bf16.mxu1 %v12340_v49 }
 0x470   : > { %12343 = vmatpush3.bf16.msra.mxu1 %v12342_v4 }
 0x471   : > { %12345 = vmatprep.subr.bf16.mxu1 %v12344_v8 }
 0x474   : > { %12347 = vmatpush3.bf16.msra.mxu1 %v12346_v18 }
 0x475   : > { %12349 = vmatprep.subr.bf16.mxu1 %v12348_v29 }
 0x478   : > { %12351 = vmatpush3.bf16.msra.mxu1 %v12350_v62 }
 0x479   : > { %12353 = vmatprep.subr.bf16.mxu1 %v12352_v33 }
 0x47c   : > { %12355 = vmatpush3.bf16.msra.mxu1 %v12354_v30  ;;  %v11137_v30 = vld [vmem:[%s15666_s6 + $0x18] sm:$0xff] }
 0x47d   : > { %12357 = vmatprep.subr.bf16.mxu1 %v12356_v48 }
 0x47f   : > { %11049 = vmatmul.mubr.f32.vlgmr.msra.gmra.mrb[22].mxu1 %v10712_v25 }
 0x480   : > { %11053 = vmatprep.mubr.f32.mxu1 %v10720_v42  ;;  %12359 = vmatpush3.bf16.msra.mxu1 %v12356_v48  ;;  %v11150_v48 = vpop.permute.xlu0 %11149 }
 0x481   : > { %12361 = vmatprep.subr.bf16.mxu1 %v12360_v45 }
 0x483   : > { %11054 = vmatmul.mubr.f32.gmra.mrb[24].mxu1 %v10719_v39 }
 0x484   : > { %12363 = vmatpush3.bf16.msra.mxu1 %v12360_v45  ;;  %12230 = vmatprep.mubr.f32.mxu1 %v10714_v51  ;;  %v11160_v42 = vpop.permute.xlu0 %11159 }
 0x485   : > { %12365 = vmatprep.subr.bf16.mxu1 %v12364_v60 }
 0x488   : > { %12367 = vmatpush3.bf16.msra.mxu1 %v12364_v60 }
 0x489   : > { %12369 = vmatprep.subr.bf16.mxu1 %v12368_v32 }
 0x48c   : > { %12371 = vmatpush3.bf16.msra.mxu1 %v12368_v32 }
 0x48d   : > { %12373 = vmatprep.subr.bf16.mxu1 %v12372_v17 }
 0x490   : > { %12375 = vmatpush3.bf16.msra.mxu1 %v12372_v17  ;;  %v11265_v17 = vld [vmem:[%s15668_s8 + $0x8] sm:$0xff] }
 0x491   : > { %12377 = vmatprep.subr.bf16.mxu1 %v12376_v19 }
 0x494   : > { %12379 = vmatpush3.bf16.msra.mxu1 %v12376_v19 }
 0x495   : > { %12381 = vmatprep.subr.bf16.mxu1 %v12380_v58 }
 0x498   : > { %12383 = vmatpush3.bf16.msra.mxu1 %v12380_v58 }
 0x499   : > { %12385 = vmatprep.subr.bf16.mxu1 %v12384_v59 }
 0x49c   : > { %12387 = vmatpush3.bf16.msra.mxu1 %v12384_v59  ;;  %v11283_v59 = vpop.permute.xlu1 %11282 }
 0x49f   : > { %12231 = vmatmul.mubr.f32.vlgmr.msra.gmra.mrb[26].mxu1 %v10721_v46 }
 0x512   : > { %v11932_v12 = vpop.f32.mrb[14].mxu1 }
 0x513   : > { %v11933_v36 = vpop.f32.mrb[15].mxu1 }
 0x514   : > { %v11934_v35 = vadd.f32 %v11933_v36, %v11932_v12 }
 0x516   : > { %v11935_v9 = vpop.f32.mrb[16].mxu1 }
 0x517   : > { %v11936_v49 = vpop.f32.mrb[17].mxu1 }
 0x518   : > { %v11937_v11 = vadd.f32 %v11936_v49, %v11935_v9 }
 0x532   : > { %v11970_v22 = vpop.f32.mrb[18].mxu1 }
 0x533   : > { %v11971_v53 = vpop.f32.mrb[19].mxu1 }
 0x534   : > { %v11972_v3 = vadd.f32 %v11971_v53, %v11970_v22 }
 0x536   : > { %v10976_v61 = vadd.f32 %v11972_v3, %v11934_v35  ;;  %v11973_v16 = vpop.f32.mrb[20].mxu1 }
 0x537   : > { %v11974_v4 = vpop.f32.mrb[21].mxu1 }
 0x538   : > { %v11975_v8 = vadd.f32 %v11974_v4, %v11973_v16 }
 0x53a   : > { %v10981_v44 = vadd.f32 %v11975_v8, %v11937_v11 }
 0x552   : > { %v12008_v2 = vpop.f32.mrb[22].mxu1 }
 0x553   : > { %v12009_v57 = vpop.f32.mrb[23].mxu1 }
 0x554   : > { %v12010_v23 = vadd.f32 %v12009_v57, %v12008_v2 }
 0x556   : > { %v12011_v18 = vpop.f32.mrb[24].mxu1  ;;  %v11051_v29 = vadd.f32 %v12010_v23, %v10976_v61 }
 0x557   : > { %v12012_v21 = vpop.f32.mrb[25].mxu1 }
 0x558   : > { %v12013_v47 = vadd.f32 %v12012_v21, %v12011_v18 }
 0x55a   : > { %v11056_v38 = vadd.f32 %v12013_v47, %v10981_v44 }
 0x572   : > { %v12232_v7 = vpop.f32.mrb[26].mxu1 }
 0x573   : > { %v11131_v62 = vadd.f32 %v12232_v7, %v11056_v38  ;;  %v11125_v33 = vpop.f32.mrb[27].mxu1 }
 0x574   : > { %v11126_v56 = vadd.f32 %v11125_v33, %v11051_v29 }
 0x576   : > { %v12388_v24 = vpack.c.bf16 %v11131_v62, %v11126_v56 }
 0x578   : > { %12389 = vmatprep.subr.bf16.mxu0 %v12388_v24 }
 0x579   : > { %12391 = vmatpush3.bf16.msra.mxu0 %v12388_v24 }
 0x57a   : > { %12392 = vmatprep.subr.bf16.mxu0 %v12944_v27 }
 0x57c   : > { %12238 = vmatmul.mubr.msk.f32.vlgmr.msra.gmra.mrb[16].mxu0 %vm11162_vm3, %v11135_v14 }
 0x57d   : > { %12240 = vmatprep.mubr.msk.f32.mxu0 %vm11162_vm3, %v11136_v13 }
 0x580   : > { %12241 = vmatmul.mubr.msk.f32.gmra.mrb[18].mxu0 %vm11162_vm3, %v11137_v30 }
 0x581   : > { %12251 = vmatprep.mubr.msk.f32.mxu0 %vm12917_vm1, %v12916_v26 }
 0x64f   : > { %v12239_v28 = vpop.f32.mrb[16].mxu0 }
 0x650   : > { %v11247_v1 = vadd.f32 %v12239_v28, %v11150_v48  ;;  %v11241_v25 = vpop.f32.mrb[17].mxu0 }
 0x651   : > { %v11242_v6 = vadd.f32 %v11241_v25, %v11145_v50 }
 0x652   : > { %v11261_v45 = vmax.f32 %v11247_v1, 0.0 }
 0x653   : > { %v11260_v0 = vmax.f32 %v11242_v6, 0.0  ;;  %v12242_v41 = vpop.f32.mrb[18].mxu0 }
 0x654   : > { %v11257_v39 = vadd.f32 %v12242_v41, %v11160_v42  ;;  %v11251_v60 = vpop.f32.mrb[19].mxu0 }
 0x655   : > { %v12393_v51 = vpack.c.bf16 %v11261_v45, %v11260_v0  ;;  %v11252_v15 = vadd.f32 %v11251_v60, %v11155_v37 }
 0x656   : > { %v11263_v63 = vmax.f32 %v11257_v39, 0.0 }
 0x657   : > { %v11262_v32 = vmax.f32 %v11252_v15, 0.0  ;;  %12394 = vmatpush3.bf16.msra.mxu0 %v12393_v51 }
 0x658   : > { %12395 = vmatprep.subr.bf16.mxu0 %v12944_v27 }
 0x659   : > { %v12396_v52 = vpack.c.bf16 %v11263_v63, %v11262_v32 }
 0x65b   : > { %12397 = vmatpush3.bf16.msra.mxu0 %v12396_v52 }
 0x65e   : > { %12252 = vmatmul.mubr.msk.f32.vlgmr.msra.gmra.mrb[20].mxu0 %vm11285_vm15, %v11264_v31 }
 0x65f   : > { %12254 = vmatprep.mubr.msk.f32.mxu0 %vm12917_vm1, %v12916_v26 }
 0x662   : > { %12255 = vmatmul.mubr.msk.f32.gmra.mrb[22].mxu0 %vm11285_vm15, %v11265_v17 }
 0x663   : > { %12257 = vmatprep.mubr.msk.f32.mxu0 %vm12917_vm1, %v12916_v26  ;;  %v11278_v26 = vpop.permute.xlu0 %11277  ;;  %vm11378_vm1 = vcmask 27648  }
 0x666   : > { %12258 = vmatmul.mubr.msk.f32.gmra.mrb[24].mxu0 %vm11285_vm15, %v11266_v20 }
 0x731   : > { %v11361_v19 = vpop.f32.mrb[20].mxu0 }
 0x732   : > { %v11362_v10 = vadd.f32 %v11361_v19, %v11273_v55  ;;  %v12253_v40 = vpop.f32.mrb[21].mxu0 }
 0x734   : > { %11376 = vst.msk [vmem:[%s499_s24] sm:$0xff] %vm11375_vm0, %v11362_v10 }
 0x735   : > { %v11366_v58 = vpop.f32.mrb[22].mxu0 }
 0x736   : > { %v11367_v34 = vadd.f32 %v11366_v58, %v11278_v26  ;;  %v12256_v43 = vpop.f32.mrb[23].mxu0 }
 0x738   : > { %11377 = vst.msk [vmem:[%s499_s24 + $0x8] sm:$0xff] %vm11375_vm0, %v11367_v34 }
 0x739   : > { %v11371_v54 = vpop.f32.mrb[24].mxu0 }
 0x73a   : > { %v11372_v46 = vadd.f32 %v11371_v54, %v11283_v59  ;;  %v12259_v5 = vpop.f32.mrb[25].mxu0 }
 0x73c   : > { %11379 = vst.msk [vmem:[%s499_s24 + $0x10] sm:$0xf] %vm11378_vm1, %v11372_v46 }
 0x73d PF: > { %p17_p9 = scmp.ge.s32.totalorder %s13017_s17, 4   ;;  %s15671_s13 = smov %s12909_s14 }
 0x73e   : > { %s15672_s14 = smov %s13026_s20  ;;  %s15673_s15 = smov %s13017_s17 }
 0x73f   :  { %19 = sbr.rel (!%p17_p9) target bundleno = 2 (0x2), region = 153 }

</bundles_post_ra>
